<compile_context>
chip_gen: v5e
topology: v5e:2x2
jax: 0.10.0
libtpu: 0.0.40
codegen_flags: <defaults>
</compile_context>

<pallas_src>
import functools

import jax
import jax.numpy as jnp
from jax.experimental import pallas as pl
from jax.experimental.pallas import tpu as pltpu


# ----------------------------------------------------------------------------
# Kernel
# ----------------------------------------------------------------------------
def _mlp_kernel(x_ref, w1_ref, b1_ref, w2_ref, b2_ref,
                w3_ref, b3_ref, w4_ref, b4_ref, out_ref):
    # One (tb, D) batch tile per grid step; all weights/biases VMEM-resident.
    # Everything stays f32 (intermediates never touch HBM).
    h = x_ref[...]

    h = jnp.dot(h, w1_ref[...], preferred_element_type=jnp.float32) + b1_ref[...]
    h = jnp.maximum(h, 0.0)
    h = jnp.dot(h, w2_ref[...], preferred_element_type=jnp.float32) + b2_ref[...]
    h = jnp.maximum(h, 0.0)
    h = jnp.dot(h, w3_ref[...], preferred_element_type=jnp.float32) + b3_ref[...]
    h = jnp.maximum(h, 0.0)

    # Final Linear(10 -> 1) as broadcast-multiply + lane reduction on a
    # (tb//128, 128, 10) view.  The leading-dim-only reshape is layout
    # preserving (whole sublane tiles regroup, no data movement) and the
    # result is directly lane-dense (tb//128, 128): full-lane unmasked store.
    tb, hidden = h.shape
    h3 = h.reshape(tb // 128, 128, hidden)
    w4 = w4_ref[...].reshape(1, 1, hidden)            # (1, 1, 10)
    o = jnp.sum(h3 * w4, axis=-1) + b4_ref[...]       # (tb//128, 128) + (1, 1)
    out_ref[...] = o.astype(out_ref.dtype)


# ----------------------------------------------------------------------------
# Wrapper
# ----------------------------------------------------------------------------
def _ceil_div(a, b):
    return -(-a // b)


def _round_up(n, m):
    return _ceil_div(n, m) * m


def prepare_params(params):
    """One-time param prep (hoisted out of the per-call path).

    Layers 1-3: transpose (out,in)->(in,out) so matmuls are lane-dense x @ W;
    biases become (1, out).  Layer 4 keeps the PyTorch (out,in) = (1,10)
    layout: the kernel applies it as a multiply + lane reduction.
    """
    p = {}
    for i in (1, 2, 3):
        p[f"w{i}"] = jnp.asarray(params[f"w{i}"], jnp.float32).T
        p[f"b{i}"] = jnp.asarray(params[f"b{i}"], jnp.float32).reshape(1, -1)
    p["w4"] = jnp.asarray(params["w4"], jnp.float32).reshape(1, -1)   # (1, 10)
    p["b4"] = jnp.asarray(params["b4"], jnp.float32).reshape(1, 1)    # (1, 1)
    return p


@functools.partial(jax.jit, static_argnames=("tile_b",))
def network2_forward(x, prepped, *, tile_b=2048):
    """x: (B, D) float32; prepped: output of prepare_params(). Returns (B, 1)."""
    B, D = x.shape

    # Lane-dense output blocks need tb to be a multiple of 1024
    # (so tb//128 is a multiple of 8 -> satisfies the (8,128) rule).
    tile_b = max(1024, _round_up(tile_b, 1024))

    if B <= tile_b:
        # Single tile: pad x up to one tile (at most 1023 extra rows, a few
        # hundred KiB one-time) so every block exactly matches its array.
        tb = _round_up(B, 1024)
        n_tiles = 1
        if tb != B:
            x = jnp.pad(x, ((0, tb - B), (0, 0)))
    else:
        # Multi-tile: NO padding of x.  The ragged last block is masked by
        # Pallas; garbage tail rows compute harmlessly (rows are independent)
        # and are sliced off below.
        tb = tile_b
        n_tiles = _ceil_div(B, tb)
        # v7x megacore: prefer an even number of grid steps so the "parallel"
        # batch axis splits evenly across the 2 TensorCores.
        if n_tiles % 2 == 1:
            for cand in range(tile_b, max(1024, tile_b // 2) - 1, -1024):
                if _ceil_div(B, cand) % 2 == 0:
                    tb = cand
                    n_tiles = _ceil_div(B, cand)
                    break

    out_rows = n_tiles * (tb // 128)

    operands = [x]
    in_specs = [pl.BlockSpec((tb, D), lambda i: (i, 0))]
    for k in (1, 2, 3, 4):
        w = prepped[f"w{k}"]
        b = prepped[f"b{k}"]
        operands += [w, b]
        # Constant index maps -> weights/biases stay VMEM-resident across steps.
        in_specs += [pl.BlockSpec(w.shape, lambda i: (0, 0)),
                     pl.BlockSpec(b.shape, lambda i: (0, 0))]

    out = pl.pallas_call(
        _mlp_kernel,
        out_shape=jax.ShapeDtypeStruct((out_rows, 128), jnp.float32),
        grid=(n_tiles,),
        in_specs=in_specs,
        out_specs=pl.BlockSpec((tb // 128, 128), lambda i: (i, 0)),
        compiler_params=pltpu.CompilerParams(
            dimension_semantics=("parallel",)),
    )(*operands)

    # Row r, lane l of the lane-dense output is batch row r*128 + l.
    return out.reshape(-1)[:B].reshape(B, 1)


# ----------------------------------------------------------------------------
# Init + reference (PyTorch nn.Linear convention: W is (out, in))
# ----------------------------------------------------------------------------
def init_params(key, input_size):
    dims = [(10, input_size), (20, 10), (10, 20), (1, 10)]
    params = {}
    for i, (out_f, in_f) in enumerate(dims, start=1):
        key, kw, kb = jax.random.split(key, 3)
        bound = 1.0 / jnp.sqrt(in_f)
        params[f"w{i}"] = jax.random.uniform(
            kw, (out_f, in_f), jnp.float32, -bound, bound)
        params[f"b{i}"] = jax.random.uniform(
            kb, (out_f,), jnp.float32, -bound, bound)
    return params


def _reference(x, params):
    h = x
    for i in range(1, 4):
        h = jnp.maximum(h @ params[f"w{i}"].T + params[f"b{i}"], 0.0)
    return h @ params["w4"].T + params["b4"]


# ----------------------------------------------------------------------------
# Main
# ----------------------------------------------------------------------------
if __name__ == "__main__":
    key = jax.random.PRNGKey(0)
    k_x, k_p = jax.random.split(key)

    batch, input_size = 8, 32
    x = jax.random.normal(k_x, (batch, input_size), jnp.float32)
    params = init_params(k_p, input_size)
    prepped = prepare_params(params)
    ref = _reference(x, params)

    # Small batch (single tile, padded once).
    out = network2_forward(x, prepped)
    jax.block_until_ready(out)
    assert out.shape == (batch, 1)
    assert jnp.allclose(out, ref, atol=1e-5, rtol=1e-5), "small-batch mismatch"

    # Ragged multi-tile batch (B % tb != 0): exercises the unpadded masked-tail
    # path and the even 2-step grid split (3000 rows @ tb=2048 -> 2 steps).
    x_big = jax.random.normal(k_x, (3000, input_size), jnp.float32)
    out_big = network2_forward(x_big, prepped, tile_b=2048)
    jax.block_until_ready(out_big)
    ref_big = _reference(x_big, params)
    assert out_big.shape == (3000, 1)
    assert jnp.allclose(out_big, ref_big, atol=1e-4, rtol=1e-4), "ragged-batch mismatch"

    print("KERNEL_OK")
</pallas_src>

<mosaic_0001>
module attributes {stable_mosaic.version = 11 : i64} {
  func.func @_mlp_kernel(%arg0: i32, %arg1: memref<1024x32xf32, #tpu.memory_space<vmem>>, %arg2: memref<32x10xf32, #tpu.memory_space<vmem>>, %arg3: memref<1x10xf32, #tpu.memory_space<vmem>>, %arg4: memref<10x20xf32, #tpu.memory_space<vmem>>, %arg5: memref<1x20xf32, #tpu.memory_space<vmem>>, %arg6: memref<20x10xf32, #tpu.memory_space<vmem>>, %arg7: memref<1x10xf32, #tpu.memory_space<vmem>>, %arg8: memref<1x10xf32, #tpu.memory_space<vmem>>, %arg9: memref<1x1xf32, #tpu.memory_space<vmem>>, %arg10: memref<8x128xf32, #tpu.memory_space<vmem>>) attributes {dimension_semantics = [#tpu.dimension_semantics<parallel>], iteration_bounds = array<i64: 1>, scalar_prefetch = 0 : i64, scratch_operands = 0 : i64, tpu.core_type = #tpu.core_type<tc>, window_params = [{transform_indices = @transform_0, window_bounds = array<i64: 1024, 32>}, {pipeline_mode = #tpu.pipeline_mode<synchronous>, transform_indices = @transform_1, window_bounds = array<i64: 32, 10>}, {pipeline_mode = #tpu.pipeline_mode<synchronous>, transform_indices = @transform_2, window_bounds = array<i64: 1, 10>}, {pipeline_mode = #tpu.pipeline_mode<synchronous>, transform_indices = @transform_3, window_bounds = array<i64: 10, 20>}, {pipeline_mode = #tpu.pipeline_mode<synchronous>, transform_indices = @transform_4, window_bounds = array<i64: 1, 20>}, {pipeline_mode = #tpu.pipeline_mode<synchronous>, transform_indices = @transform_5, window_bounds = array<i64: 20, 10>}, {pipeline_mode = #tpu.pipeline_mode<synchronous>, transform_indices = @transform_6, window_bounds = array<i64: 1, 10>}, {pipeline_mode = #tpu.pipeline_mode<synchronous>, transform_indices = @transform_7, window_bounds = array<i64: 1, 10>}, {pipeline_mode = #tpu.pipeline_mode<synchronous>, transform_indices = @transform_8, window_bounds = array<i64: 1, 1>}, {transform_indices = @transform_9, window_bounds = array<i64: 8, 128>}]} {
    %c0 = arith.constant 0 : index
    %c0_0 = arith.constant 0 : index
    %0 = vector.load %arg1[%c0, %c0_0] : memref<1024x32xf32, #tpu.memory_space<vmem>>, vector<1024x32xf32>
    %c0_1 = arith.constant 0 : index
    %c0_2 = arith.constant 0 : index
    %1 = vector.load %arg2[%c0_1, %c0_2] : memref<32x10xf32, #tpu.memory_space<vmem>>, vector<32x10xf32>
    %cst = arith.constant dense<0.000000e+00> : vector<1024x10xf32>
    %2 = tpu.matmul %0, %1, %cst {dimension_numbers = #tpu.dot_dimension_numbers<[1], [0], [0], [1], [0, 0, 1, 1], [], []>} : vector<1024x32xf32>, vector<32x10xf32>, vector<1024x10xf32> -> vector<1024x10xf32>
    %c0_3 = arith.constant 0 : index
    %c0_4 = arith.constant 0 : index
    %3 = vector.load %arg3[%c0_3, %c0_4] : memref<1x10xf32, #tpu.memory_space<vmem>>, vector<1x10xf32>
    %4 = vector.broadcast %3 : vector<1x10xf32> to vector<1024x10xf32>
    %5 = arith.addf %2, %4 : vector<1024x10xf32>
    %cst_5 = arith.constant 0.000000e+00 : f32
    %6 = vector.broadcast %cst_5 : f32 to vector<1024x10xf32>
    %7 = arith.maximumf %5, %6 : vector<1024x10xf32>
    %c0_6 = arith.constant 0 : index
    %c0_7 = arith.constant 0 : index
    %8 = vector.load %arg4[%c0_6, %c0_7] : memref<10x20xf32, #tpu.memory_space<vmem>>, vector<10x20xf32>
    %cst_8 = arith.constant dense<0.000000e+00> : vector<1024x20xf32>
    %9 = tpu.matmul %7, %8, %cst_8 {dimension_numbers = #tpu.dot_dimension_numbers<[1], [0], [0], [1], [0, 0, 1, 1], [], []>} : vector<1024x10xf32>, vector<10x20xf32>, vector<1024x20xf32> -> vector<1024x20xf32>
    %c0_9 = arith.constant 0 : index
    %c0_10 = arith.constant 0 : index
    %10 = vector.load %arg5[%c0_9, %c0_10] : memref<1x20xf32, #tpu.memory_space<vmem>>, vector<1x20xf32>
    %11 = vector.broadcast %10 : vector<1x20xf32> to vector<1024x20xf32>
    %12 = arith.addf %9, %11 : vector<1024x20xf32>
    %cst_11 = arith.constant 0.000000e+00 : f32
    %13 = vector.broadcast %cst_11 : f32 to vector<1024x20xf32>
    %14 = arith.maximumf %12, %13 : vector<1024x20xf32>
    %c0_12 = arith.constant 0 : index
    %c0_13 = arith.constant 0 : index
    %15 = vector.load %arg6[%c0_12, %c0_13] : memref<20x10xf32, #tpu.memory_space<vmem>>, vector<20x10xf32>
    %cst_14 = arith.constant dense<0.000000e+00> : vector<1024x10xf32>
    %16 = tpu.matmul %14, %15, %cst_14 {dimension_numbers = #tpu.dot_dimension_numbers<[1], [0], [0], [1], [0, 0, 1, 1], [], []>} : vector<1024x20xf32>, vector<20x10xf32>, vector<1024x10xf32> -> vector<1024x10xf32>
    %c0_15 = arith.constant 0 : index
    %c0_16 = arith.constant 0 : index
    %17 = vector.load %arg7[%c0_15, %c0_16] : memref<1x10xf32, #tpu.memory_space<vmem>>, vector<1x10xf32>
    %18 = vector.broadcast %17 : vector<1x10xf32> to vector<1024x10xf32>
    %19 = arith.addf %16, %18 : vector<1024x10xf32>
    %cst_17 = arith.constant 0.000000e+00 : f32
    %20 = vector.broadcast %cst_17 : f32 to vector<1024x10xf32>
    %21 = arith.maximumf %19, %20 : vector<1024x10xf32>
    %22 = vector.shape_cast %21 : vector<1024x10xf32> to vector<8x128x10xf32>
    %c0_18 = arith.constant 0 : index
    %c0_19 = arith.constant 0 : index
    %23 = vector.load %arg8[%c0_18, %c0_19] : memref<1x10xf32, #tpu.memory_space<vmem>>, vector<1x10xf32>
    %24 = vector.shape_cast %23 : vector<1x10xf32> to vector<1x1x10xf32>
    %25 = vector.broadcast %24 : vector<1x1x10xf32> to vector<8x128x10xf32>
    %26 = arith.mulf %22, %25 : vector<8x128x10xf32>
    %cst_20 = arith.constant dense<0.000000e+00> : vector<8x128xf32>
    %27 = vector.multi_reduction <add>, %26, %cst_20 [2] : vector<8x128x10xf32> to vector<8x128xf32>
    %c0_21 = arith.constant 0 : index
    %c0_22 = arith.constant 0 : index
    %28 = vector.load %arg9[%c0_21, %c0_22] : memref<1x1xf32, #tpu.memory_space<vmem>>, vector<1x1xf32>
    %29 = vector.broadcast %28 : vector<1x1xf32> to vector<8x128xf32>
    %30 = arith.addf %27, %29 : vector<8x128xf32>
    %c0_23 = arith.constant 0 : index
    %c0_24 = arith.constant 0 : index
    %31 = vector.load %arg10[%c0_23, %c0_24] : memref<8x128xf32, #tpu.memory_space<vmem>>, vector<8x128xf32>
    tpu.vector_store %arg10[%c0_23, %c0_24], %30 {strides = array<i32>} : memref<8x128xf32, #tpu.memory_space<vmem>>, vector<8x128xf32>,
    return
  }
  func.func @transform_0(%arg0: i32) -> (i32, i32) {
    %c0_i32 = arith.constant 0 : i32
    %c0_i32_0 = arith.constant 0 : i32
    return %arg0, %c0_i32 : i32, i32
  }
  func.func @transform_1(%arg0: i32) -> (i32, i32) {
    %c0_i32 = arith.constant 0 : i32
    %c0_i32_0 = arith.constant 0 : i32
    %c0_i32_1 = arith.constant 0 : i32
    return %c0_i32, %c0_i32_0 : i32, i32
  }
  func.func @transform_2(%arg0: i32) -> (i32, i32) {
    %c0_i32 = arith.constant 0 : i32
    %c0_i32_0 = arith.constant 0 : i32
    %c0_i32_1 = arith.constant 0 : i32
    return %c0_i32, %c0_i32_0 : i32, i32
  }
  func.func @transform_3(%arg0: i32) -> (i32, i32) {
    %c0_i32 = arith.constant 0 : i32
    %c0_i32_0 = arith.constant 0 : i32
    %c0_i32_1 = arith.constant 0 : i32
    return %c0_i32, %c0_i32_0 : i32, i32
  }
  func.func @transform_4(%arg0: i32) -> (i32, i32) {
    %c0_i32 = arith.constant 0 : i32
    %c0_i32_0 = arith.constant 0 : i32
    %c0_i32_1 = arith.constant 0 : i32
    return %c0_i32, %c0_i32_0 : i32, i32
  }
  func.func @transform_5(%arg0: i32) -> (i32, i32) {
    %c0_i32 = arith.constant 0 : i32
    %c0_i32_0 = arith.constant 0 : i32
    %c0_i32_1 = arith.constant 0 : i32
    return %c0_i32, %c0_i32_0 : i32, i32
  }
  func.func @transform_6(%arg0: i32) -> (i32, i32) {
    %c0_i32 = arith.constant 0 : i32
    %c0_i32_0 = arith.constant 0 : i32
    %c0_i32_1 = arith.constant 0 : i32
    return %c0_i32, %c0_i32_0 : i32, i32
  }
  func.func @transform_7(%arg0: i32) -> (i32, i32) {
    %c0_i32 = arith.constant 0 : i32
    %c0_i32_0 = arith.constant 0 : i32
    %c0_i32_1 = arith.constant 0 : i32
    return %c0_i32, %c0_i32_0 : i32, i32
  }
  func.func @transform_8(%arg0: i32) -> (i32, i32) {
    %c0_i32 = arith.constant 0 : i32
    %c0_i32_0 = arith.constant 0 : i32
    %c0_i32_1 = arith.constant 0 : i32
    return %c0_i32, %c0_i32_0 : i32, i32
  }
  func.func @transform_9(%arg0: i32) -> (i32, i32) {
    %c0_i32 = arith.constant 0 : i32
    %c0_i32_0 = arith.constant 0 : i32
    return %arg0, %c0_i32 : i32, i32
  }
}

</mosaic_0001>

<bundles_post_ra>
// kernel: network2_forward.1
= control target key start
LH: loop header
LB: loop body
LE: loop exit
PB: predicated region body
PF: predicated region fallthrough
CT: control target
= control target key end

     0   :  { %vm170_vm0 = vcmask 261120   ;;  %vm1475_vm1 = vcmask 1041408   ;;  %vm1090_vm2 = vcmask 80896   ;;  %vm2400_vm3 = vcmask 1043456   ;;  %s6665_s1 = inlined_call_operand.vmem [shape: f32[32,10], index: 1, kind: input, shape index: {}]   ;;  %s6666_s0 = inlined_call_operand.vmem [shape: f32[1024,32], index: 0, kind: input, shape index: {}]   ;;  %s6667_s2 = inlined_call_operand.vmem [shape: f32[1,10], index: 2, kind: input, shape index: {}]   ;;  %s6668_s3 = inlined_call_operand.vmem [shape: f32[10,20], index: 3, kind: input, shape index: {}]   ;;  %s6669_s4 = inlined_call_operand.vmem [shape: f32[1,20], index: 4, kind: input, shape index: {}]   ;;  %s6670_s5 = inlined_call_operand.vmem [shape: f32[20,10], index: 5, kind: input, shape index: {}]   ;;  %s6671_s6 = inlined_call_operand.vmem [shape: f32[1,10], index: 6, kind: input, shape index: {}]   ;;  %s6672_s7 = inlined_call_operand.vmem [shape: f32[1,10], index: 7, kind: input, shape index: {}]   ;;  %s6673_s8 = inlined_call_operand.<no memory space> [shape: f32[1,1], index: 8, kind: input, shape index: {}]   ;;  %s6674_s9 = inlined_call_operand.vmem [shape: f32[8,128], index: 9, kind: output, shape index: {}]  }
   0x1   :  { %v165_v0 = vld [vmem:[%s6665_s1 + $0x18] sm:$0xff]  ;;  %v164_v1 = vld [vmem:[%s6665_s1 + $0x10] sm:$0xff]  ;;  %v163_v2 = vld [vmem:[%s6665_s1 + $0x8] sm:$0xff]  ;;  %vm2015_vm4 = vcmask 162816   ;;  %vm3717_vm5 = vcmask 130112   ;;  %vm3721_vm6 = vcmask 195712  }
   0x2   :  { %567 = vmatpush.msra.mxu0 %v165_v0  ;;  %4398 = vmatpush.msra.mxu3 %v165_v0  ;;  %v162_v3 = vld [vmem:[%s6665_s1] sm:$0xff]  ;;  %v35_v5 = vld [vmem:[%s6666_s0 + $0x8] sm:$0xff]  ;;  %v36_v6 = vld [vmem:[%s6666_s0 + $0x10] sm:$0xff]  ;;  %vm3725_vm7 = vcmask 261312   ;;  %vm3729_vm8 = vcmask 326912   ;;  %vm3733_vm9 = vcmask 392512  }
   0x3   :  { %v34_v4 = vld [vmem:[%s6666_s0] sm:$0xff]  ;;  %v37_v7 = vld [vmem:[%s6666_s0 + $0x18] sm:$0xff]  ;;  %v39_v9 = vld [vmem:[%s6666_s0 + $0x28] sm:$0xff]  ;;  %vm3737_vm10 = vcmask 458112   ;;  %vm3741_vm11 = vcmask 523712   ;;  %vm3745_vm12 = vcmask 589312  }
   0x4   :  { %568 = vmatpush.msra.mxu0 %v164_v1  ;;  %4399 = vmatpush.msra.mxu3 %v164_v1  ;;  %v38_v8 = vld [vmem:[%s6666_s0 + $0x20] sm:$0xff]  ;;  %v40_v10 = vld [vmem:[%s6666_s0 + $0x30] sm:$0xff]  ;;  %v41_v11 = vld [vmem:[%s6666_s0 + $0x38] sm:$0xff]  ;;  %vm3749_vm13 = vcmask 654912   ;;  %vm3753_vm14 = vcmask 720512   ;;  %vm6678_vm15 = vcmask 786112  }
   0x5   :  { %v42_v12 = vld [vmem:[%s6666_s0 + $0x40] sm:$0xff]  ;;  %v43_v13 = vld [vmem:[%s6666_s0 + $0x48] sm:$0xff]  ;;  %v44_v14 = vld [vmem:[%s6666_s0 + $0x50] sm:$0xff] }
   0x6   :  { %569 = vmatpush.msra.mxu0 %v163_v2  ;;  %4400 = vmatpush.msra.mxu3 %v163_v2  ;;  %v45_v15 = vld [vmem:[%s6666_s0 + $0x58] sm:$0xff]  ;;  %v46_v16 = vld [vmem:[%s6666_s0 + $0x60] sm:$0xff]  ;;  %v1085_v17 = vld [vmem:[%s6668_s3 + $0x8] sm:$0x3] }
   0x7   :  { %4140 = vmatpush.msk.msra.mxu1 %vm1475_vm1, %v1085_v17  ;;  %v1084_v18 = vld [vmem:[%s6668_s3] sm:$0xff]  ;;  %v47_v19 = vld [vmem:[%s6666_s0 + $0x68] sm:$0xff]  ;;  %v48_v20 = vld [vmem:[%s6666_s0 + $0x70] sm:$0xff] }
   0x8   :  { %570 = vmatpush.msra.mxu0 %v162_v3  ;;  %4401 = vmatpush.msra.mxu3 %v162_v3  ;;  %v49_v21 = vld [vmem:[%s6666_s0 + $0x78] sm:$0xff]  ;;  %v4565_v22 = vld [vmem:[%s6667_s2] ss:$0 sm:$0xff]  ;;  %v51_v28 = vld [vmem:[%s6666_s0 + $0x88] sm:$0xff] }
   0x9   :  { %4012 = vmatmul.msk.f32.vlgmr.msra.gmra.mxu0 %vm170_vm0, %v34_v4  ;;  %1494 = vmatpush.msra.mxu1 %v1084_v18  ;;  %v50_v24 = vld [vmem:[%s6666_s0 + $0x80] sm:$0xff]  ;;  %v52_v32 = vld [vmem:[%s6666_s0 + $0x90] sm:$0xff]  ;;  %v53_v36 = vld [vmem:[%s6666_s0 + $0x98] sm:$0xff] }
   0xa   :  { %4402 = vmatpush.msk.msrb.mxu3 %vm1475_vm1, %v1085_v17  ;;  %v54_v40 = vld [vmem:[%s6666_s0 + $0xa0] sm:$0xff]  ;;  %v55_v44 = vld [vmem:[%s6666_s0 + $0xa8] sm:$0xff]  ;;  %v56_v48 = vld [vmem:[%s6666_s0 + $0xb0] sm:$0xff]  ;;  %vm6677_vm1 = vcmask 851712  }
   0xb   :  { %v57_v52 = vld [vmem:[%s6666_s0 + $0xb8] sm:$0xff]  ;;  %v58_v56 = vld [vmem:[%s6666_s0 + $0xc0] sm:$0xff]  ;;  %v59_v60 = vld [vmem:[%s6666_s0 + $0xc8] sm:$0xff] }
   0xc   :  { %4403 = vmatpush.msrb.mxu3 %v1084_v18  ;;  %v60_v0 = vld [vmem:[%s6666_s0 + $0xd0] sm:$0xff]  ;;  %v61_v4 = vld [vmem:[%s6666_s0 + $0xd8] sm:$0xff] }
  0x11   :  { %4013 = vmatmul.msk.f32.gmra.mxu0 %vm170_vm0, %v35_v5 }
  0x19   :  { %4014 = vmatmul.msk.f32.gmra.mxu0 %vm170_vm0, %v36_v6 }
  0x21   :  { %4015 = vmatmul.msk.f32.gmra.mxu0 %vm170_vm0, %v37_v7 }
  0x29   :  { %4016 = vmatmul.msk.f32.gmra.mxu0 %vm170_vm0, %v38_v8  ;;  %v62_v8 = vld [vmem:[%s6666_s0 + $0xe0] sm:$0xff] }
  0x31   :  { %4017 = vmatmul.msk.f32.gmra.mxu0 %vm170_vm0, %v39_v9 }
  0x39   :  { %4018 = vmatmul.msk.f32.gmra.mxu0 %vm170_vm0, %v40_v10  ;;  %v4646_v10 = vld [vmem:[%s6670_s5 + $0x10] sm:$0xf] }
  0x3a   :  { %4269 = vmatpush.msk.msra.mxu2 %vm2400_vm3, %v4646_v10 }
  0x41   :  { %4019 = vmatmul.msk.f32.gmra.mxu0 %vm170_vm0, %v41_v11 }
  0x49   :  { %4020 = vmatmul.msk.f32.gmra.mxu0 %vm170_vm0, %v42_v12  ;;  %v4654_v12 = vld [vmem:[%s6670_s5 + $0x8] sm:$0xff] }
  0x4a   :  { %2418 = vmatpush.msra.mxu2 %v4654_v12 }
  0x51   :  { %4021 = vmatmul.msk.f32.gmra.mxu0 %vm170_vm0, %v43_v13  ;;  %v4661_v13 = vld [vmem:[%s6670_s5] sm:$0xff] }
  0x52   :  { %2419 = vmatpush.msra.mxu2 %v4661_v13 }
  0x59   :  { %4022 = vmatmul.msk.f32.gmra.mxu0 %vm170_vm0, %v44_v14 }
  0x61   :  { %4023 = vmatmul.msk.f32.gmra.mxu0 %vm170_vm0, %v45_v15  ;;  %v63_v15 = vld [vmem:[%s6666_s0 + $0xe8] sm:$0xff] }
  0x69   :  { %4024 = vmatmul.msk.f32.gmra.mxu0 %vm170_vm0, %v46_v16 }
  0x71   :  { %4025 = vmatmul.msk.f32.gmra.mxu0 %vm170_vm0, %v47_v19  ;;  %v64_v19 = vld [vmem:[%s6666_s0 + $0xf0] sm:$0xff] }
  0x79   :  { %4026 = vmatmul.msk.f32.gmra.mxu0 %vm170_vm0, %v48_v20 }
  0x81   :  { %4027 = vmatmul.msk.f32.gmra.mxu0 %vm170_vm0, %v49_v21 }
  0x86   :  { %v572_v23 = vpop.f32.mrf.mxu0 }
  0x87   :  { %v573_v25 = vadd.f32 %v4565_v22, %v572_v23 }
  0x89   :  { %v956_v26 = vmax.f32 %v573_v25, 0.0  ;;  %4028 = vmatmul.msk.f32.gmra.mxu0 %vm170_vm0, %v50_v24  ;;  %v65_v24 = vld [vmem:[%s6666_s0 + $0xf8] sm:$0xff] }
  0x8b   :  { %4141 = vmatmul.msk.f32.vlgmr.msra.gmra.mxu1 %vm1090_vm2, %v956_v26 }
  0x8e   :  { %v575_v27 = vpop.f32.mrf.mxu0 }
  0x8f   :  { %v576_v29 = vadd.f32 %v4565_v22, %v575_v27  ;;  %v4685_v27 = vld [vmem:[%s6669_s4] ss:$0 sm:$0xff] }
  0x91   :  { %v957_v30 = vmax.f32 %v576_v29, 0.0  ;;  %4029 = vmatmul.msk.f32.gmra.mxu0 %vm170_vm0, %v51_v28  ;;  %v66_v29 = vld [vmem:[%s6666_s0 + $0x100] sm:$0xff] }
  0x93   :  { %4142 = vmatmul.msk.f32.gmra.mxu1 %vm1090_vm2, %v957_v30 }
  0x96   :  { %v578_v31 = vpop.f32.mrf.mxu0 }
  0x97   :  { %v579_v33 = vadd.f32 %v4565_v22, %v578_v31 }
  0x99   :  { %v958_v34 = vmax.f32 %v579_v33, 0.0  ;;  %4030 = vmatmul.msk.f32.gmra.mxu0 %vm170_vm0, %v52_v32 }
  0x9b   :  { %4143 = vmatmul.msk.f32.gmra.mxu1 %vm1090_vm2, %v958_v34 }
  0x9e   :  { %v581_v35 = vpop.f32.mrf.mxu0 }
  0x9f   :  { %v582_v37 = vadd.f32 %v4565_v22, %v581_v35 }
  0xa1   :  { %v959_v38 = vmax.f32 %v582_v37, 0.0  ;;  %4031 = vmatmul.msk.f32.gmra.mxu0 %vm170_vm0, %v53_v36  ;;  %v67_v36 = vld [vmem:[%s6666_s0 + $0x108] sm:$0xff] }
  0xa3   :  { %4144 = vmatmul.msk.f32.gmra.mxu1 %vm1090_vm2, %v959_v38 }
  0xa6   :  { %v584_v39 = vpop.f32.mrf.mxu0 }
  0xa7   :  { %v585_v41 = vadd.f32 %v4565_v22, %v584_v39 }
  0xa9   :  { %v960_v42 = vmax.f32 %v585_v41, 0.0  ;;  %4032 = vmatmul.msk.f32.gmra.mxu0 %vm170_vm0, %v54_v40 }
  0xab   :  { %4145 = vmatmul.msk.f32.gmra.mxu1 %vm1090_vm2, %v960_v42 }
  0xae   :  { %v587_v43 = vpop.f32.mrf.mxu0 }
  0xaf   :  { %v588_v45 = vadd.f32 %v4565_v22, %v587_v43  ;;  %v68_v43 = vld [vmem:[%s6666_s0 + $0x110] sm:$0xff] }
  0xb1   :  { %v961_v46 = vmax.f32 %v588_v45, 0.0  ;;  %4033 = vmatmul.msk.f32.gmra.mxu0 %vm170_vm0, %v55_v44 }
  0xb3   :  { %4146 = vmatmul.msk.f32.gmra.mxu1 %vm1090_vm2, %v961_v46 }
  0xb6   :  { %v590_v47 = vpop.f32.mrf.mxu0 }
  0xb7   :  { %v591_v49 = vadd.f32 %v4565_v22, %v590_v47 }
  0xb9   :  { %v962_v50 = vmax.f32 %v591_v49, 0.0  ;;  %4034 = vmatmul.msk.f32.gmra.mxu0 %vm170_vm0, %v56_v48 }
  0xbb   :  { %4147 = vmatmul.msk.f32.gmra.mxu1 %vm1090_vm2, %v962_v50  ;;  %v69_v50 = vld [vmem:[%s6666_s0 + $0x118] sm:$0xff] }
  0xbe   :  { %v593_v51 = vpop.f32.mrf.mxu0 }
  0xbf   :  { %v594_v53 = vadd.f32 %v4565_v22, %v593_v51 }
  0xc1   :  { %v963_v54 = vmax.f32 %v594_v53, 0.0  ;;  %4035 = vmatmul.msk.f32.gmra.mxu0 %vm170_vm0, %v57_v52 }
  0xc3   :  { %4148 = vmatmul.msk.f32.gmra.mxu1 %vm1090_vm2, %v963_v54 }
  0xc6   :  { %v596_v55 = vpop.f32.mrf.mxu0 }
  0xc7   :  { %v597_v57 = vadd.f32 %v4565_v22, %v596_v55 }
  0xc9   :  { %v964_v58 = vmax.f32 %v597_v57, 0.0  ;;  %4036 = vmatmul.msk.f32.gmra.mxu0 %vm170_vm0, %v58_v56  ;;  %v70_v57 = vld [vmem:[%s6666_s0 + $0x120] sm:$0xff] }
  0xcb   :  { %4149 = vmatmul.msk.f32.gmra.mxu1 %vm1090_vm2, %v964_v58 }
  0xce   :  { %v599_v59 = vpop.f32.mrf.mxu0 }
  0xcf   :  { %v600_v61 = vadd.f32 %v4565_v22, %v599_v59 }
  0xd1   :  { %v965_v62 = vmax.f32 %v600_v61, 0.0  ;;  %4037 = vmatmul.msk.f32.gmra.mxu0 %vm170_vm0, %v59_v60 }
  0xd3   :  { %4150 = vmatmul.msk.f32.gmra.mxu1 %vm1090_vm2, %v965_v62 }
  0xd6   :  { %v602_v63 = vpop.f32.mrf.mxu0 }
  0xd7   :  { %v603_v1 = vadd.f32 %v4565_v22, %v602_v63 }
  0xd9   :  { %v966_v2 = vmax.f32 %v603_v1, 0.0  ;;  %4038 = vmatmul.msk.f32.gmra.mxu0 %vm170_vm0, %v60_v0  ;;  %v71_v0 = vld [vmem:[%s6666_s0 + $0x128] sm:$0xff] }
  0xdb   :  { %4151 = vmatmul.msk.f32.gmra.mxu1 %vm1090_vm2, %v966_v2 }
  0xde   :  { %v605_v3 = vpop.f32.mrf.mxu0 }
  0xdf   :  { %v606_v5 = vadd.f32 %v4565_v22, %v605_v3 }
  0xe1   :  { %v967_v6 = vmax.f32 %v606_v5, 0.0  ;;  %4039 = vmatmul.msk.f32.gmra.mxu0 %vm170_vm0, %v61_v4 }
  0xe3   :  { %4152 = vmatmul.msk.f32.gmra.mxu1 %vm1090_vm2, %v967_v6 }
  0xe6   :  { %v608_v7 = vpop.f32.mrf.mxu0 }
  0xe7   :  { %v609_v9 = vadd.f32 %v4565_v22, %v608_v7  ;;  %v72_v7 = vld [vmem:[%s6666_s0 + $0x130] sm:$0xff] }
  0xe9   :  { %v968_v11 = vmax.f32 %v609_v9, 0.0  ;;  %4040 = vmatmul.msk.f32.gmra.mxu0 %vm170_vm0, %v62_v8 }
  0xeb   :  { %4153 = vmatmul.msk.f32.gmra.mxu1 %vm1090_vm2, %v968_v11 }
  0xee   :  { %v611_v14 = vpop.f32.mrf.mxu0 }
  0xef   :  { %v612_v16 = vadd.f32 %v4565_v22, %v611_v14 }
  0xf1   :  { %v969_v17 = vmax.f32 %v612_v16, 0.0  ;;  %4041 = vmatmul.msk.f32.gmra.mxu0 %vm170_vm0, %v63_v15 }
  0xf3   :  { %4154 = vmatmul.msk.f32.gmra.mxu1 %vm1090_vm2, %v969_v17  ;;  %v73_v17 = vld [vmem:[%s6666_s0 + $0x138] sm:$0xff] }
  0xf6   :  { %v614_v18 = vpop.f32.mrf.mxu0 }
  0xf7   :  { %v615_v20 = vadd.f32 %v4565_v22, %v614_v18 }
  0xf9   :  { %v970_v21 = vmax.f32 %v615_v20, 0.0  ;;  %4042 = vmatmul.msk.f32.gmra.mxu0 %vm170_vm0, %v64_v19 }
  0xfb   :  { %4155 = vmatmul.msk.f32.gmra.mxu1 %vm1090_vm2, %v970_v21 }
  0xfe   :  { %v617_v23 = vpop.f32.mrf.mxu0 }
  0xff   :  { %v618_v25 = vadd.f32 %v4565_v22, %v617_v23 }
 0x101   :  { %v971_v26 = vmax.f32 %v618_v25, 0.0  ;;  %4043 = vmatmul.msk.f32.gmra.mxu0 %vm170_vm0, %v65_v24  ;;  %v14_v24 = vstv %s6673_s8 }
 0x102   :  { %15 = vst [vmem:[#allocation2] sm:$0x1] %v14_v24  ;;  %v130_v24 = vld [vmem:[%s6666_s0 + $0x300] sm:$0xff] }
 0x103   :  { %4156 = vmatmul.msk.f32.gmra.mxu1 %vm1090_vm2, %v971_v26  ;;  %v74_v26 = vld [vmem:[%s6666_s0 + $0x140] sm:$0xff]  ;;  %4108 = vmatmul.msk.f32.vlgmr.msra.gmra.mxu3 %vm170_vm0, %v130_v24 }
 0x104   :  { %4404 = vmatpush.msk.msra.mxu3 %vm2400_vm3, %v4646_v10  ;;  %v131_v10 = vld [vmem:[%s6666_s0 + $0x308] sm:$0xff]  ;;  %vm6675_vm3 = vcmask 917312  }
 0x106   :  { %v620_v28 = vpop.f32.mrf.mxu0  ;;  %4405 = vmatpush.msra.mxu3 %v4654_v12  ;;  %v4841_v12 = vld [vmem:[%s6671_s6] ss:$0 sm:$0xff] }
 0x107   :  { %v621_v30 = vadd.f32 %v4565_v22, %v620_v28 }
 0x108   :  { %v1496_v31 = vpop.f32.mrf.mxu1  ;;  %4406 = vmatpush.msra.mxu3 %v4661_v13  ;;  %v83_v13 = vld [vmem:[%s6666_s0 + $0x188] sm:$0xff] }
 0x109   :  { %v972_v32 = vmax.f32 %v621_v30, 0.0  ;;  %v1497_v33 = vadd.f32 %v4685_v27, %v1496_v31  ;;  %4044 = vmatmul.msk.f32.gmra.mxu0 %vm170_vm0, %v66_v29 }
 0x10b   :  { %v1880_v34 = vmax.f32 %v1497_v33, 0.0  ;;  %4157 = vmatmul.msk.f32.gmra.mxu1 %vm1090_vm2, %v972_v32  ;;  %v4429_v33 = vmov 0   ;;  %4109 = vmatmul.msk.f32.gmra.mxu3 %vm170_vm0, %v131_v10 }
 0x10c   :  { %4408 = vset.pattern.permute.xlu0 %v4429_v33 }
 0x10d   :  { %4270 = vmatmul.msk.f32.vlgmr.msra.gmra.mxu2 %vm2015_vm4, %v1880_v34  ;;  %v4411_v34 = vld [vmem:[#allocation2] ss:$0 sm:$0xff] }
 0x10e   :  { %v623_v35 = vpop.f32.mrf.mxu0  ;;  %3453 = vperm.xlu0 %4408, %v4411_v34  }
 0x10f   :  { %v624_v37 = vadd.f32 %v4565_v22, %v623_v35 }
 0x110   :  { %v1499_v38 = vpop.f32.mrf.mxu1 }
 0x111   :  { %v973_v39 = vmax.f32 %v624_v37, 0.0  ;;  %v1500_v40 = vadd.f32 %v4685_v27, %v1499_v38  ;;  %4045 = vmatmul.msk.f32.gmra.mxu0 %vm170_vm0, %v67_v36  ;;  %v75_v36 = vld [vmem:[%s6666_s0 + $0x148] sm:$0xff] }
 0x113   :  { %v1881_v41 = vmax.f32 %v1500_v40, 0.0  ;;  %4158 = vmatmul.msk.f32.gmra.mxu1 %vm1090_vm2, %v973_v39 }
 0x115   :  { %4271 = vmatmul.msk.f32.gmra.mxu2 %vm2015_vm4, %v1881_v41 }
 0x116   :  { %v626_v42 = vpop.f32.mrf.mxu0 }
 0x117   :  { %v627_v44 = vadd.f32 %v4565_v22, %v626_v42 }
 0x118   :  { %v1502_v45 = vpop.f32.mrf.mxu1 }
 0x119   :  { %v974_v46 = vmax.f32 %v627_v44, 0.0  ;;  %v1503_v47 = vadd.f32 %v4685_v27, %v1502_v45  ;;  %4046 = vmatmul.msk.f32.gmra.mxu0 %vm170_vm0, %v68_v43  ;;  %v76_v43 = vld [vmem:[%s6666_s0 + $0x150] sm:$0xff] }
 0x11b   :  { %v1882_v48 = vmax.f32 %v1503_v47, 0.0  ;;  %4159 = vmatmul.msk.f32.gmra.mxu1 %vm1090_vm2, %v974_v46 }
 0x11d   :  { %4272 = vmatmul.msk.f32.gmra.mxu2 %vm2015_vm4, %v1882_v48 }
 0x11e   :  { %v629_v49 = vpop.f32.mrf.mxu0 }
 0x11f   :  { %v630_v51 = vadd.f32 %v4565_v22, %v629_v49 }
 0x120   :  { %v1505_v52 = vpop.f32.mrf.mxu1 }
 0x121   :  { %v975_v53 = vmax.f32 %v630_v51, 0.0  ;;  %v1506_v54 = vadd.f32 %v4685_v27, %v1505_v52  ;;  %4047 = vmatmul.msk.f32.gmra.mxu0 %vm170_vm0, %v69_v50  ;;  %v77_v50 = vld [vmem:[%s6666_s0 + $0x158] sm:$0xff] }
 0x123   :  { %v1883_v55 = vmax.f32 %v1506_v54, 0.0  ;;  %4160 = vmatmul.msk.f32.gmra.mxu1 %vm1090_vm2, %v975_v53 }
 0x125   :  { %4273 = vmatmul.msk.f32.gmra.mxu2 %vm2015_vm4, %v1883_v55 }
 0x126   :  { %v632_v56 = vpop.f32.mrf.mxu0 }
 0x127   :  { %v633_v58 = vadd.f32 %v4565_v22, %v632_v56 }
 0x128   :  { %v1508_v59 = vpop.f32.mrf.mxu1 }
 0x129   :  { %v976_v60 = vmax.f32 %v633_v58, 0.0  ;;  %v1509_v61 = vadd.f32 %v4685_v27, %v1508_v59  ;;  %4048 = vmatmul.msk.f32.gmra.mxu0 %vm170_vm0, %v70_v57  ;;  %v78_v57 = vld [vmem:[%s6666_s0 + $0x160] sm:$0xff] }
 0x12b   :  { %v1884_v62 = vmax.f32 %v1509_v61, 0.0  ;;  %4161 = vmatmul.msk.f32.gmra.mxu1 %vm1090_vm2, %v976_v60 }
 0x12d   :  { %4274 = vmatmul.msk.f32.gmra.mxu2 %vm2015_vm4, %v1884_v62 }
 0x12e   :  { %v635_v63 = vpop.f32.mrf.mxu0 }
 0x12f   :  { %v636_v1 = vadd.f32 %v4565_v22, %v635_v63 }
 0x130   :  { %v1511_v2 = vpop.f32.mrf.mxu1 }
 0x131   :  { %v977_v3 = vmax.f32 %v636_v1, 0.0  ;;  %v1512_v4 = vadd.f32 %v4685_v27, %v1511_v2  ;;  %4049 = vmatmul.msk.f32.gmra.mxu0 %vm170_vm0, %v71_v0  ;;  %v79_v0 = vld [vmem:[%s6666_s0 + $0x168] sm:$0xff] }
 0x133   :  { %v1885_v5 = vmax.f32 %v1512_v4, 0.0  ;;  %4162 = vmatmul.msk.f32.gmra.mxu1 %vm1090_vm2, %v977_v3 }
 0x135   :  { %4275 = vmatmul.msk.f32.gmra.mxu2 %vm2015_vm4, %v1885_v5 }
 0x136   :  { %v638_v6 = vpop.f32.mrf.mxu0 }
 0x137   :  { %v639_v8 = vadd.f32 %v4565_v22, %v638_v6 }
 0x138   :  { %v1514_v9 = vpop.f32.mrf.mxu1 }
 0x139   :  { %v978_v11 = vmax.f32 %v639_v8, 0.0  ;;  %v1515_v14 = vadd.f32 %v4685_v27, %v1514_v9  ;;  %4050 = vmatmul.msk.f32.gmra.mxu0 %vm170_vm0, %v72_v7  ;;  %v80_v7 = vld [vmem:[%s6666_s0 + $0x170] sm:$0xff] }
 0x13b   :  { %v1886_v15 = vmax.f32 %v1515_v14, 0.0  ;;  %4163 = vmatmul.msk.f32.gmra.mxu1 %vm1090_vm2, %v978_v11 }
 0x13d   :  { %4276 = vmatmul.msk.f32.gmra.mxu2 %vm2015_vm4, %v1886_v15 }
 0x13e   :  { %v641_v16 = vpop.f32.mrf.mxu0 }
 0x13f   :  { %v642_v18 = vadd.f32 %v4565_v22, %v641_v16 }
 0x140   :  { %v1517_v19 = vpop.f32.mrf.mxu1 }
 0x141   :  { %v979_v20 = vmax.f32 %v642_v18, 0.0  ;;  %v1518_v21 = vadd.f32 %v4685_v27, %v1517_v19  ;;  %4051 = vmatmul.msk.f32.gmra.mxu0 %vm170_vm0, %v73_v17  ;;  %v81_v17 = vld [vmem:[%s6666_s0 + $0x178] sm:$0xff] }
 0x143   :  { %v1887_v23 = vmax.f32 %v1518_v21, 0.0  ;;  %4164 = vmatmul.msk.f32.gmra.mxu1 %vm1090_vm2, %v979_v20 }
 0x145   :  { %4277 = vmatmul.msk.f32.gmra.mxu2 %vm2015_vm4, %v1887_v23 }
 0x146   :  { %v644_v25 = vpop.f32.mrf.mxu0 }
 0x147   :  { %v645_v28 = vadd.f32 %v4565_v22, %v644_v25 }
 0x148   :  { %v1520_v29 = vpop.f32.mrf.mxu1 }
 0x149   :  { %v980_v30 = vmax.f32 %v645_v28, 0.0  ;;  %v1521_v31 = vadd.f32 %v4685_v27, %v1520_v29  ;;  %4052 = vmatmul.msk.f32.gmra.mxu0 %vm170_vm0, %v74_v26  ;;  %v82_v26 = vld [vmem:[%s6666_s0 + $0x180] sm:$0xff] }
 0x14b   :  { %v1888_v32 = vmax.f32 %v1521_v31, 0.0  ;;  %4165 = vmatmul.msk.f32.gmra.mxu1 %vm1090_vm2, %v980_v30 }
 0x14d   :  { %4278 = vmatmul.msk.f32.gmra.mxu2 %vm2015_vm4, %v1888_v32 }
 0x14e   :  { %v647_v35 = vpop.f32.mrf.mxu0 }
 0x14f   :  { %v648_v37 = vadd.f32 %v4565_v22, %v647_v35 }
 0x150   :  { %v1523_v38 = vpop.f32.mrf.mxu1 }
 0x151   :  { %v981_v39 = vmax.f32 %v648_v37, 0.0  ;;  %v1524_v40 = vadd.f32 %v4685_v27, %v1523_v38  ;;  %4053 = vmatmul.msk.f32.gmra.mxu0 %vm170_vm0, %v75_v36 }
 0x153   :  { %v1889_v41 = vmax.f32 %v1524_v40, 0.0  ;;  %4166 = vmatmul.msk.f32.gmra.mxu1 %vm1090_vm2, %v981_v39  ;;  %v4853_v40 = vld [vmem:[%s6672_s7] ss:$0 sm:$0xff] }
 0x155   :  { %4279 = vmatmul.msk.f32.gmra.mxu2 %vm2015_vm4, %v1889_v41 }
 0x156   :  { %v650_v42 = vpop.f32.mrf.mxu0 }
 0x157   :  { %v651_v44 = vadd.f32 %v4565_v22, %v650_v42 }
 0x158   :  { %v1526_v45 = vpop.f32.mrf.mxu1 }
 0x159   :  { %v982_v46 = vmax.f32 %v651_v44, 0.0  ;;  %v1527_v47 = vadd.f32 %v4685_v27, %v1526_v45  ;;  %4054 = vmatmul.msk.f32.gmra.mxu0 %vm170_vm0, %v76_v43  ;;  %v132_v43 = vld [vmem:[%s6666_s0 + $0x310] sm:$0xff] }
 0x15a   :  { %4110 = vmatmul.msk.f32.gmra.mxu3 %vm170_vm0, %v132_v43 }
 0x15b   :  { %v1890_v48 = vmax.f32 %v1527_v47, 0.0  ;;  %4167 = vmatmul.msk.f32.gmra.mxu1 %vm1090_vm2, %v982_v46  ;;  %v84_v46 = vld [vmem:[%s6666_s0 + $0x190] sm:$0xff] }
 0x15d   :  { %4280 = vmatmul.msk.f32.gmra.mxu2 %vm2015_vm4, %v1890_v48 }
 0x15e   :  { %v653_v49 = vpop.f32.mrf.mxu0 }
 0x15f   :  { %v654_v51 = vadd.f32 %v4565_v22, %v653_v49 }
 0x160   :  { %v1529_v52 = vpop.f32.mrf.mxu1 }
 0x161   :  { %v983_v53 = vmax.f32 %v654_v51, 0.0  ;;  %v1530_v54 = vadd.f32 %v4685_v27, %v1529_v52  ;;  %4055 = vmatmul.msk.f32.gmra.mxu0 %vm170_vm0, %v77_v50 }
 0x163   :  { %v1891_v55 = vmax.f32 %v1530_v54, 0.0  ;;  %4168 = vmatmul.msk.f32.gmra.mxu1 %vm1090_vm2, %v983_v53 }
 0x165   :  { %4281 = vmatmul.msk.f32.gmra.mxu2 %vm2015_vm4, %v1891_v55 }
 0x166   :  { %v656_v56 = vpop.f32.mrf.mxu0 }
 0x167   :  { %v657_v58 = vadd.f32 %v4565_v22, %v656_v56  ;;  %v133_v56 = vld [vmem:[%s6666_s0 + $0x318] sm:$0xff] }
 0x168   :  { %v1532_v59 = vpop.f32.mrf.mxu1  ;;  %4111 = vmatmul.msk.f32.gmra.mxu3 %vm170_vm0, %v133_v56 }
 0x169   :  { %v984_v60 = vmax.f32 %v657_v58, 0.0  ;;  %v1533_v61 = vadd.f32 %v4685_v27, %v1532_v59  ;;  %4056 = vmatmul.msk.f32.gmra.mxu0 %vm170_vm0, %v78_v57  ;;  %v85_v59 = vld [vmem:[%s6666_s0 + $0x198] sm:$0xff] }
 0x16b   :  { %v1892_v62 = vmax.f32 %v1533_v61, 0.0  ;;  %4169 = vmatmul.msk.f32.gmra.mxu1 %vm1090_vm2, %v984_v60 }
 0x16d   :  { %4282 = vmatmul.msk.f32.gmra.mxu2 %vm2015_vm4, %v1892_v62 }
 0x16e   :  { %v659_v63 = vpop.f32.mrf.mxu0 }
 0x16f   :  { %v660_v1 = vadd.f32 %v4565_v22, %v659_v63 }
 0x170   :  { %v1535_v2 = vpop.f32.mrf.mxu1 }
 0x171   :  { %v985_v3 = vmax.f32 %v660_v1, 0.0  ;;  %v1536_v4 = vadd.f32 %v4685_v27, %v1535_v2  ;;  %4057 = vmatmul.msk.f32.gmra.mxu0 %vm170_vm0, %v79_v0 }
 0x173   :  { %v1893_v5 = vmax.f32 %v1536_v4, 0.0  ;;  %4170 = vmatmul.msk.f32.gmra.mxu1 %vm1090_vm2, %v985_v3 }
 0x175   :  { %4283 = vmatmul.msk.f32.gmra.mxu2 %vm2015_vm4, %v1893_v5  ;;  %v134_v5 = vld [vmem:[%s6666_s0 + $0x320] sm:$0xff] }
 0x176   :  { %v662_v6 = vpop.f32.mrf.mxu0  ;;  %4112 = vmatmul.msk.f32.gmra.mxu3 %vm170_vm0, %v134_v5 }
 0x177   :  { %v663_v8 = vadd.f32 %v4565_v22, %v662_v6 }
 0x178   :  { %v1538_v9 = vpop.f32.mrf.mxu1 }
 0x179   :  { %v986_v11 = vmax.f32 %v663_v8, 0.0  ;;  %v1539_v14 = vadd.f32 %v4685_v27, %v1538_v9  ;;  %4058 = vmatmul.msk.f32.gmra.mxu0 %vm170_vm0, %v80_v7  ;;  %v86_v8 = vld [vmem:[%s6666_s0 + $0x1a0] sm:$0xff] }
 0x17b   :  { %v1894_v15 = vmax.f32 %v1539_v14, 0.0  ;;  %4171 = vmatmul.msk.f32.gmra.mxu1 %vm1090_vm2, %v986_v11 }
 0x17d   :  { %4284 = vmatmul.msk.f32.gmra.mxu2 %vm2015_vm4, %v1894_v15 }
 0x17e   :  { %v665_v16 = vpop.f32.mrf.mxu0 }
 0x17f   :  { %v666_v18 = vadd.f32 %v4565_v22, %v665_v16 }
 0x180   :  { %v1541_v19 = vpop.f32.mrf.mxu1 }
 0x181   :  { %v987_v20 = vmax.f32 %v666_v18, 0.0  ;;  %v1542_v21 = vadd.f32 %v4685_v27, %v1541_v19  ;;  %4059 = vmatmul.msk.f32.gmra.mxu0 %vm170_vm0, %v81_v17 }
 0x183   :  { %v1895_v23 = vmax.f32 %v1542_v21, 0.0  ;;  %4172 = vmatmul.msk.f32.gmra.mxu1 %vm1090_vm2, %v987_v20  ;;  %v135_v21 = vld [vmem:[%s6666_s0 + $0x328] sm:$0xff] }
 0x184   :  { %4113 = vmatmul.msk.f32.gmra.mxu3 %vm170_vm0, %v135_v21 }
 0x185   :  { %4285 = vmatmul.msk.f32.gmra.mxu2 %vm2015_vm4, %v1895_v23 }
 0x186   :  { %v668_v25 = vpop.f32.mrf.mxu0 }
 0x187   :  { %v669_v28 = vadd.f32 %v4565_v22, %v668_v25  ;;  %v87_v25 = vld [vmem:[%s6666_s0 + $0x1a8] sm:$0xff] }
 0x188   :  { %v1544_v29 = vpop.f32.mrf.mxu1 }
 0x189   :  { %v988_v30 = vmax.f32 %v669_v28, 0.0  ;;  %v1545_v31 = vadd.f32 %v4685_v27, %v1544_v29  ;;  %4060 = vmatmul.msk.f32.gmra.mxu0 %vm170_vm0, %v82_v26 }
 0x18b   :  { %v1896_v32 = vmax.f32 %v1545_v31, 0.0  ;;  %4173 = vmatmul.msk.f32.gmra.mxu1 %vm1090_vm2, %v988_v30 }
 0x18d   :  { %4286 = vmatmul.msk.f32.gmra.mxu2 %vm2015_vm4, %v1896_v32 }
 0x18e   :  { %v671_v33 = vpop.f32.mrf.mxu0 }
 0x18f   :  { %v672_v34 = vadd.f32 %v4565_v22, %v671_v33 }
 0x190   :  { %v1547_v35 = vpop.f32.mrf.mxu1  ;;  %v2421_v36 = vpop.f32.mrf.mxu2 }
 0x191   :  { %v989_v37 = vmax.f32 %v672_v34, 0.0  ;;  %v1548_v38 = vadd.f32 %v4685_v27, %v1547_v35  ;;  %v2422_v39 = vadd.f32 %v4841_v12, %v2421_v36  ;;  %4061 = vmatmul.msk.f32.gmra.mxu0 %vm170_vm0, %v83_v13  ;;  %v136_v34 = vld [vmem:[%s6666_s0 + $0x330] sm:$0xff] }
 0x192   :  { %4114 = vmatmul.msk.f32.gmra.mxu3 %vm170_vm0, %v136_v34 }
 0x193   :  { %v1897_v41 = vmax.f32 %v1548_v38, 0.0  ;;  %v2805_v42 = vmax.f32 %v2422_v39, 0.0  ;;  %4174 = vmatmul.msk.f32.gmra.mxu1 %vm1090_vm2, %v989_v37  ;;  %v88_v37 = vld [vmem:[%s6666_s0 + $0x1b0] sm:$0xff] }
 0x195   :  { %4287 = vmatmul.msk.f32.gmra.mxu2 %vm2015_vm4, %v1897_v41  ;;  %v2937_v44 = vmul.f32 %v4853_v40, %v2805_v42 }
 0x196   :  { %v674_v45 = vpop.f32.mrf.mxu0 }
 0x197   :  { %v675_v47 = vadd.f32 %v4565_v22, %v674_v45  ;;  %v3065_v48 = vsel %vm1090_vm2, %v2937_v44, 0.0 }
 0x198   :  { %v1550_v49 = vpop.f32.mrf.mxu1  ;;  %v2424_v50 = vpop.f32.mrf.mxu2  ;;  %3066 = vadd.xlane.f32.xlu0 %v3065_v48  ;;  %v137_v48 = vld [vmem:[%s6666_s0 + $0x338] sm:$0xff] }
 0x199   :  { %v990_v51 = vmax.f32 %v675_v47, 0.0  ;;  %v1551_v52 = vadd.f32 %v4685_v27, %v1550_v49  ;;  %v2425_v53 = vadd.f32 %v4841_v12, %v2424_v50  ;;  %4062 = vmatmul.msk.f32.gmra.mxu0 %vm170_vm0, %v84_v46 }
 0x19a   :  { %4115 = vmatmul.msk.f32.gmra.mxu3 %vm170_vm0, %v137_v48 }
 0x19b   :  { %v1898_v54 = vmax.f32 %v1551_v52, 0.0  ;;  %v2806_v55 = vmax.f32 %v2425_v53, 0.0  ;;  %4175 = vmatmul.msk.f32.gmra.mxu1 %vm1090_vm2, %v990_v51  ;;  %v89_v51 = vld [vmem:[%s6666_s0 + $0x1b8] sm:$0xff] }
 0x19d   :  { %4288 = vmatmul.msk.f32.gmra.mxu2 %vm2015_vm4, %v1898_v54  ;;  %v2938_v57 = vmul.f32 %v4853_v40, %v2806_v55 }
 0x19e   :  { %v677_v58 = vpop.f32.mrf.mxu0 }
 0x19f   :  { %v678_v60 = vadd.f32 %v4565_v22, %v677_v58  ;;  %v3068_v61 = vsel %vm1090_vm2, %v2938_v57, 0.0 }
 0x1a0   :  { %v1553_v62 = vpop.f32.mrf.mxu1  ;;  %v2427_v63 = vpop.f32.mrf.mxu2  ;;  %3069 = vadd.xlane.f32.xlu0 %v3068_v61  ;;  %v138_v61 = vld [vmem:[%s6666_s0 + $0x340] sm:$0xff] }
 0x1a1   :  { %v991_v0 = vmax.f32 %v678_v60, 0.0  ;;  %v1554_v1 = vadd.f32 %v4685_v27, %v1553_v62  ;;  %v2428_v2 = vadd.f32 %v4841_v12, %v2427_v63  ;;  %4063 = vmatmul.msk.f32.gmra.mxu0 %vm170_vm0, %v85_v59 }
 0x1a2   :  { %4116 = vmatmul.msk.f32.gmra.mxu3 %vm170_vm0, %v138_v61 }
 0x1a3   :  { %v1899_v3 = vmax.f32 %v1554_v1, 0.0  ;;  %v2807_v4 = vmax.f32 %v2428_v2, 0.0  ;;  %4176 = vmatmul.msk.f32.gmra.mxu1 %vm1090_vm2, %v991_v0  ;;  %v90_v0 = vld [vmem:[%s6666_s0 + $0x1c0] sm:$0xff] }
 0x1a5   :  { %4289 = vmatmul.msk.f32.gmra.mxu2 %vm2015_vm4, %v1899_v3  ;;  %v2939_v6 = vmul.f32 %v4853_v40, %v2807_v4 }
 0x1a6   :  { %v680_v7 = vpop.f32.mrf.mxu0 }
 0x1a7   :  { %v681_v9 = vadd.f32 %v4565_v22, %v680_v7  ;;  %v3071_v11 = vsel %vm1090_vm2, %v2939_v6, 0.0 }
 0x1a8   :  { %v1556_v14 = vpop.f32.mrf.mxu1  ;;  %v2430_v15 = vpop.f32.mrf.mxu2  ;;  %3072 = vadd.xlane.f32.xlu1 %v3071_v11  ;;  %v139_v11 = vld [vmem:[%s6666_s0 + $0x348] sm:$0xff] }
 0x1a9   :  { %v992_v16 = vmax.f32 %v681_v9, 0.0  ;;  %v1557_v17 = vadd.f32 %v4685_v27, %v1556_v14  ;;  %v2431_v18 = vadd.f32 %v4841_v12, %v2430_v15  ;;  %4064 = vmatmul.msk.f32.gmra.mxu0 %vm170_vm0, %v86_v8 }
 0x1aa   :  { %4117 = vmatmul.msk.f32.gmra.mxu3 %vm170_vm0, %v139_v11 }
 0x1ab   :  { %v1900_v19 = vmax.f32 %v1557_v17, 0.0  ;;  %v2808_v20 = vmax.f32 %v2431_v18, 0.0  ;;  %4177 = vmatmul.msk.f32.gmra.mxu1 %vm1090_vm2, %v992_v16  ;;  %v91_v16 = vld [vmem:[%s6666_s0 + $0x1c8] sm:$0xff] }
 0x1ad   :  { %4290 = vmatmul.msk.f32.gmra.mxu2 %vm2015_vm4, %v1900_v19  ;;  %v2940_v23 = vmul.f32 %v4853_v40, %v2808_v20 }
 0x1ae   :  { %v683_v24 = vpop.f32.mrf.mxu0 }
 0x1af   :  { %v684_v26 = vadd.f32 %v4565_v22, %v683_v24  ;;  %v3074_v28 = vsel %vm1090_vm2, %v2940_v23, 0.0 }
 0x1b0   :  { %v1559_v29 = vpop.f32.mrf.mxu1  ;;  %v2433_v30 = vpop.f32.mrf.mxu2  ;;  %3075 = vadd.xlane.f32.xlu1 %v3074_v28  ;;  %v140_v28 = vld [vmem:[%s6666_s0 + $0x350] sm:$0xff] }
 0x1b1   :  { %v993_v31 = vmax.f32 %v684_v26, 0.0  ;;  %v1560_v32 = vadd.f32 %v4685_v27, %v1559_v29  ;;  %v2434_v10 = vadd.f32 %v4841_v12, %v2433_v30  ;;  %4065 = vmatmul.msk.f32.gmra.mxu0 %vm170_vm0, %v87_v25 }
 0x1b2   :  { %4118 = vmatmul.msk.f32.gmra.mxu3 %vm170_vm0, %v140_v28 }
 0x1b3   :  { %v1901_v33 = vmax.f32 %v1560_v32, 0.0  ;;  %v2809_v13 = vmax.f32 %v2434_v10, 0.0  ;;  %4178 = vmatmul.msk.f32.gmra.mxu1 %vm1090_vm2, %v993_v31  ;;  %v92_v31 = vld [vmem:[%s6666_s0 + $0x1d0] sm:$0xff] }
 0x1b5   :  { %4291 = vmatmul.msk.f32.gmra.mxu2 %vm2015_vm4, %v1901_v33  ;;  %v2941_v35 = vmul.f32 %v4853_v40, %v2809_v13 }
 0x1b6   :  { %v686_v36 = vpop.f32.mrf.mxu0 }
 0x1b7   :  { %v687_v38 = vadd.f32 %v4565_v22, %v686_v36  ;;  %v3077_v39 = vsel %vm1090_vm2, %v2941_v35, 0.0 }
 0x1b8   :  { %v1562_v41 = vpop.f32.mrf.mxu1  ;;  %v2436_v42 = vpop.f32.mrf.mxu2  ;;  %3078 = vadd.xlane.f32.xlu2 %v3077_v39  ;;  %v141_v39 = vld [vmem:[%s6666_s0 + $0x358] sm:$0xff] }
 0x1b9   :  { %v994_v43 = vmax.f32 %v687_v38, 0.0  ;;  %v1563_v44 = vadd.f32 %v4685_v27, %v1562_v41  ;;  %v2437_v45 = vadd.f32 %v4841_v12, %v2436_v42  ;;  %4066 = vmatmul.msk.f32.gmra.mxu0 %vm170_vm0, %v88_v37 }
 0x1ba   :  { %4119 = vmatmul.msk.f32.gmra.mxu3 %vm170_vm0, %v141_v39 }
 0x1bb   :  { %v1902_v46 = vmax.f32 %v1563_v44, 0.0  ;;  %v2810_v47 = vmax.f32 %v2437_v45, 0.0  ;;  %4179 = vmatmul.msk.f32.gmra.mxu1 %vm1090_vm2, %v994_v43  ;;  %v93_v43 = vld [vmem:[%s6666_s0 + $0x1d8] sm:$0xff] }
 0x1bd   :  { %4292 = vmatmul.msk.f32.gmra.mxu2 %vm2015_vm4, %v1902_v46  ;;  %v2942_v49 = vmul.f32 %v4853_v40, %v2810_v47 }
 0x1be   :  { %v689_v50 = vpop.f32.mrf.mxu0 }
 0x1bf   :  { %v690_v52 = vadd.f32 %v4565_v22, %v689_v50  ;;  %v3080_v53 = vsel %vm1090_vm2, %v2942_v49, 0.0 }
 0x1c0   :  { %v1565_v54 = vpop.f32.mrf.mxu1  ;;  %v2439_v55 = vpop.f32.mrf.mxu2  ;;  %3081 = vadd.xlane.f32.xlu2 %v3080_v53  ;;  %v142_v53 = vld [vmem:[%s6666_s0 + $0x360] sm:$0xff] }
 0x1c1   :  { %v995_v56 = vmax.f32 %v690_v52, 0.0  ;;  %v1566_v57 = vadd.f32 %v4685_v27, %v1565_v54  ;;  %v2440_v58 = vadd.f32 %v4841_v12, %v2439_v55  ;;  %4067 = vmatmul.msk.f32.gmra.mxu0 %vm170_vm0, %v89_v51 }
 0x1c2   :  { %4120 = vmatmul.msk.f32.gmra.mxu3 %vm170_vm0, %v142_v53 }
 0x1c3   :  { %v1903_v59 = vmax.f32 %v1566_v57, 0.0  ;;  %v2811_v60 = vmax.f32 %v2440_v58, 0.0  ;;  %4180 = vmatmul.msk.f32.gmra.mxu1 %vm1090_vm2, %v995_v56  ;;  %v94_v56 = vld [vmem:[%s6666_s0 + $0x1e0] sm:$0xff] }
 0x1c5   :  { %4293 = vmatmul.msk.f32.gmra.mxu2 %vm2015_vm4, %v1903_v59  ;;  %v2943_v62 = vmul.f32 %v4853_v40, %v2811_v60 }
 0x1c6   :  { %v692_v63 = vpop.f32.mrf.mxu0 }
 0x1c7   :  { %v693_v1 = vadd.f32 %v4565_v22, %v692_v63  ;;  %v3083_v2 = vsel %vm1090_vm2, %v2943_v62, 0.0 }
 0x1c8   :  { %v1568_v3 = vpop.f32.mrf.mxu1  ;;  %v2442_v4 = vpop.f32.mrf.mxu2  ;;  %3084 = vadd.xlane.f32.xlu0 %v3083_v2 }
 0x1c9   :  { %v996_v5 = vmax.f32 %v693_v1, 0.0  ;;  %v1569_v6 = vadd.f32 %v4685_v27, %v1568_v3  ;;  %v2443_v7 = vadd.f32 %v4841_v12, %v2442_v4  ;;  %4068 = vmatmul.msk.f32.gmra.mxu0 %vm170_vm0, %v90_v0  ;;  %v95_v4 = vld [vmem:[%s6666_s0 + $0x1e8] sm:$0xff] }
 0x1cb   :  { %v1904_v8 = vmax.f32 %v1569_v6, 0.0  ;;  %v2812_v9 = vmax.f32 %v2443_v7, 0.0  ;;  %4181 = vmatmul.msk.f32.gmra.mxu1 %vm1090_vm2, %v996_v5  ;;  %v5033_v5 = vld [vmem:[%s6667_s2] ss:$0 sm:$0xff] }
 0x1cd   :  { %4294 = vmatmul.msk.f32.gmra.mxu2 %vm2015_vm4, %v1904_v8  ;;  %v2944_v14 = vmul.f32 %v4853_v40, %v2812_v9 }
 0x1ce   :  { %v695_v15 = vpop.f32.mrf.mxu0 }
 0x1cf   :  { %v696_v17 = vadd.f32 %v4565_v22, %v695_v15  ;;  %v3086_v18 = vsel %vm1090_vm2, %v2944_v14, 0.0 }
 0x1d0   :  { %v1571_v19 = vpop.f32.mrf.mxu1  ;;  %v2445_v20 = vpop.f32.mrf.mxu2  ;;  %3087 = vadd.xlane.f32.xlu1 %v3086_v18  ;;  %v144_v18 = vld [vmem:[%s6666_s0 + $0x370] sm:$0xff] }
 0x1d1   :  { %v997_v21 = vmax.f32 %v696_v17, 0.0  ;;  %v1572_v23 = vadd.f32 %v4685_v27, %v1571_v19  ;;  %v2446_v24 = vadd.f32 %v4841_v12, %v2445_v20  ;;  %4069 = vmatmul.msk.f32.gmra.mxu0 %vm170_vm0, %v91_v16 }
 0x1d3   :  { %v1905_v25 = vmax.f32 %v1572_v23, 0.0  ;;  %v2813_v26 = vmax.f32 %v2446_v24, 0.0  ;;  %4182 = vmatmul.msk.f32.gmra.mxu1 %vm1090_vm2, %v997_v21  ;;  %v96_v21 = vld [vmem:[%s6666_s0 + $0x1f0] sm:$0xff] }
 0x1d5   :  { %4295 = vmatmul.msk.f32.gmra.mxu2 %vm2015_vm4, %v1905_v25  ;;  %v2945_v29 = vmul.f32 %v4853_v40, %v2813_v26 }
 0x1d6   :  { %v698_v30 = vpop.f32.mrf.mxu0 }
 0x1d7   :  { %v699_v32 = vadd.f32 %v4565_v22, %v698_v30  ;;  %v3089_v10 = vsel %vm1090_vm2, %v2945_v29, 0.0 }
 0x1d8   :  { %v1574_v33 = vpop.f32.mrf.mxu1  ;;  %v2448_v13 = vpop.f32.mrf.mxu2  ;;  %3090 = vadd.xlane.f32.xlu2 %v3089_v10  ;;  %v145_v10 = vld [vmem:[%s6666_s0 + $0x378] sm:$0xff] }
 0x1d9   :  { %v998_v34 = vmax.f32 %v699_v32, 0.0  ;;  %v1575_v35 = vadd.f32 %v4685_v27, %v1574_v33  ;;  %v2449_v36 = vadd.f32 %v4841_v12, %v2448_v13  ;;  %4070 = vmatmul.msk.f32.gmra.mxu0 %vm170_vm0, %v92_v31 }
 0x1db   :  { %v1906_v37 = vmax.f32 %v1575_v35, 0.0  ;;  %v2814_v38 = vmax.f32 %v2449_v36, 0.0  ;;  %4183 = vmatmul.msk.f32.gmra.mxu1 %vm1090_vm2, %v998_v34  ;;  %v97_v34 = vld [vmem:[%s6666_s0 + $0x1f8] sm:$0xff] }
 0x1dd   :  { %4296 = vmatmul.msk.f32.gmra.mxu2 %vm2015_vm4, %v1906_v37  ;;  %v2946_v41 = vmul.f32 %v4853_v40, %v2814_v38 }
 0x1de   :  { %v701_v42 = vpop.f32.mrf.mxu0 }
 0x1df   :  { %v702_v44 = vadd.f32 %v4565_v22, %v701_v42  ;;  %v3092_v45 = vsel %vm1090_vm2, %v2946_v41, 0.0 }
 0x1e0   :  { %v1577_v46 = vpop.f32.mrf.mxu1  ;;  %v2451_v47 = vpop.f32.mrf.mxu2  ;;  %3093 = vadd.xlane.f32.xlu0 %v3092_v45 }
 0x1e1   :  { %v999_v48 = vmax.f32 %v702_v44, 0.0  ;;  %v1578_v49 = vadd.f32 %v4685_v27, %v1577_v46  ;;  %v2452_v50 = vadd.f32 %v4841_v12, %v2451_v47  ;;  %4071 = vmatmul.msk.f32.gmra.mxu0 %vm170_vm0, %v93_v43  ;;  %v5070_v43 = vpop.permute.xlu0 %3453  ;;  %v146_v46 = vld [vmem:[%s6666_s0 + $0x380] sm:$0xff] }
 0x1e3   :  { %v1907_v51 = vmax.f32 %v1578_v49, 0.0  ;;  %v2815_v52 = vmax.f32 %v2452_v50, 0.0  ;;  %4184 = vmatmul.msk.f32.gmra.mxu1 %vm1090_vm2, %v999_v48  ;;  %v98_v49 = vld [vmem:[%s6666_s0 + $0x200] sm:$0xff] }
 0x1e5   :  { %4297 = vmatmul.msk.f32.gmra.mxu2 %vm2015_vm4, %v1907_v51  ;;  %v2947_v54 = vmul.f32 %v4853_v40, %v2815_v52 }
 0x1e6   :  { %v704_v55 = vpop.f32.mrf.mxu0 }
 0x1e7   :  { %v705_v57 = vadd.f32 %v4565_v22, %v704_v55  ;;  %v3095_v58 = vsel %vm1090_vm2, %v2947_v54, 0.0  ;;  %v143_v22 = vld [vmem:[%s6666_s0 + $0x368] sm:$0xff] }
 0x1e8   :  { %v1580_v59 = vpop.f32.mrf.mxu1  ;;  %v2454_v60 = vpop.f32.mrf.mxu2  ;;  %3096 = vadd.xlane.f32.xlu1 %v3095_v58  ;;  %4121 = vmatmul.msk.f32.gmra.mxu3 %vm170_vm0, %v143_v22 }
 0x1e9   :  { %v1000_v61 = vmax.f32 %v705_v57, 0.0  ;;  %v1581_v62 = vadd.f32 %v4685_v27, %v1580_v59  ;;  %v2455_v63 = vadd.f32 %v4841_v12, %v2454_v60  ;;  %4072 = vmatmul.msk.f32.gmra.mxu0 %vm170_vm0, %v94_v56  ;;  %v5087_v57 = vpop.f32.mrf.mxu3 }
 0x1eb   :  { %v1908_v0 = vmax.f32 %v1581_v62, 0.0  ;;  %v2816_v1 = vmax.f32 %v2455_v63, 0.0  ;;  %4185 = vmatmul.msk.f32.gmra.mxu1 %vm1090_vm2, %v1000_v61  ;;  %v3712_v61 = vlaneseq  ;;  %v147_v62 = vld [vmem:[%s6666_s0 + $0x388] sm:$0xff] }
 0x1ed   :  { %4298 = vmatmul.msk.f32.gmra.mxu2 %vm2015_vm4, %v1908_v0  ;;  %v2948_v2 = vmul.f32 %v4853_v40, %v2816_v1  ;;  %v99_v1 = vld [vmem:[%s6666_s0 + $0x208] sm:$0xff] }
 0x1ee   :  { %v707_v3 = vpop.f32.mrf.mxu0 }
 0x1ef   :  { %v708_v6 = vadd.f32 %v5033_v5, %v707_v3  ;;  %v3098_v7 = vsel %vm1090_vm2, %v2948_v2, 0.0  ;;  %v5101_v3 = vand.u32 127, %v3712_v61 }
 0x1f0   :  { %v1583_v8 = vpop.f32.mrf.mxu1  ;;  %v2457_v9 = vpop.f32.mrf.mxu2  ;;  %3099 = vadd.xlane.f32.xlu2 %v3098_v7  ;;  %4122 = vmatmul.msk.f32.gmra.mxu3 %vm170_vm0, %v144_v18 }
 0x1f1   :  { %v1001_v11 = vmax.f32 %v708_v6, 0.0  ;;  %v1584_v14 = vadd.f32 %v4685_v27, %v1583_v8  ;;  %v2458_v15 = vadd.f32 %v4841_v12, %v2457_v9  ;;  %4073 = vmatmul.msk.f32.gmra.mxu0 %vm170_vm0, %v95_v4 }
 0x1f3   :  { %v1909_v16 = vmax.f32 %v1584_v14, 0.0  ;;  %v2817_v17 = vmax.f32 %v2458_v15, 0.0  ;;  %4186 = vmatmul.msk.f32.gmra.mxu1 %vm1090_vm2, %v1001_v11  ;;  %v5106_v11 = vpop.f32.mrf.mxu3  ;;  %v5110_v15 = vadd.s32 4294967288, %v5101_v3 }
 0x1f5   :  { %4299 = vmatmul.msk.f32.gmra.mxu2 %vm2015_vm4, %v1909_v16  ;;  %v2949_v19 = vmul.f32 %v4853_v40, %v2817_v17 }
 0x1f6   :  { %v710_v20 = vpop.f32.mrf.mxu0 }
 0x1f7   :  { %v711_v23 = vadd.f32 %v5033_v5, %v710_v20  ;;  %v3101_v24 = vsel %vm1090_vm2, %v2949_v19, 0.0 }
 0x1f8   :  { %v1586_v25 = vpop.f32.mrf.mxu1  ;;  %v2460_v26 = vpop.f32.mrf.mxu2  ;;  %3102 = vadd.xlane.f32.xlu0 %v3101_v24  ;;  %4123 = vmatmul.msk.f32.gmra.mxu3 %vm170_vm0, %v145_v10  ;;  %v5131_v10 = vld [vmem:[%s6669_s4] ss:$0 sm:$0xff] }
 0x1f9   :  { %v1002_v28 = vmax.f32 %v711_v23, 0.0  ;;  %v1587_v29 = vadd.f32 %v4685_v27, %v1586_v25  ;;  %v2461_v30 = vadd.f32 %v4841_v12, %v2460_v26  ;;  %4074 = vmatmul.msk.f32.gmra.mxu0 %vm170_vm0, %v96_v21  ;;  %v100_v25 = vld [vmem:[%s6666_s0 + $0x210] sm:$0xff] }
 0x1fb   :  { %v1910_v31 = vmax.f32 %v1587_v29, 0.0  ;;  %v2818_v32 = vmax.f32 %v2461_v30, 0.0  ;;  %4187 = vmatmul.msk.f32.gmra.mxu1 %vm1090_vm2, %v1002_v28 }
 0x1fd   :  { %4300 = vmatmul.msk.f32.gmra.mxu2 %vm2015_vm4, %v1910_v31  ;;  %v2950_v33 = vmul.f32 %v4853_v40, %v2818_v32 }
 0x1fe   :  { %v713_v13 = vpop.f32.mrf.mxu0 }
 0x1ff   :  { %v714_v35 = vadd.f32 %v5033_v5, %v713_v13  ;;  %v3104_v36 = vsel %vm1090_vm2, %v2950_v33, 0.0 }
 0x200   :  { %v1589_v37 = vpop.f32.mrf.mxu1  ;;  %v2463_v38 = vpop.f32.mrf.mxu2  ;;  %3105 = vadd.xlane.f32.xlu1 %v3104_v36  ;;  %4124 = vmatmul.msk.f32.gmra.mxu3 %vm170_vm0, %v146_v46  ;;  %v101_v46 = vld [vmem:[%s6666_s0 + $0x218] sm:$0xff] }
 0x201   :  { %v1003_v39 = vmax.f32 %v714_v35, 0.0  ;;  %v1590_v41 = vadd.f32 %v4685_v27, %v1589_v37  ;;  %v2464_v42 = vadd.f32 %v4841_v12, %v2463_v38  ;;  %4075 = vmatmul.msk.f32.gmra.mxu0 %vm170_vm0, %v97_v34  ;;  %v5136_v34 = vpop.f32.mrf.mxu3  ;;  %v5139_v35 = vadd.s32 4294967280, %v5101_v3 }
 0x203   :  { %v1911_v44 = vmax.f32 %v1590_v41, 0.0  ;;  %v2819_v45 = vmax.f32 %v2464_v42, 0.0  ;;  %4188 = vmatmul.msk.f32.gmra.mxu1 %vm1090_vm2, %v1003_v39  ;;  %v149_v41 = vld [vmem:[%s6666_s0 + $0x398] sm:$0xff] }
 0x205   :  { %4301 = vmatmul.msk.f32.gmra.mxu2 %vm2015_vm4, %v1911_v44  ;;  %v2951_v47 = vmul.f32 %v4853_v40, %v2819_v45 }
 0x206   :  { %v716_v48 = vpop.f32.mrf.mxu0 }
 0x207   :  { %v717_v50 = vadd.f32 %v5033_v5, %v716_v48  ;;  %v3107_v51 = vsel %vm1090_vm2, %v2951_v47, 0.0 }
 0x208   :  { %v1592_v52 = vpop.f32.mrf.mxu1  ;;  %v2466_v53 = vpop.f32.mrf.mxu2  ;;  %3108 = vadd.xlane.f32.xlu2 %v3107_v51  ;;  %4125 = vmatmul.msk.f32.gmra.mxu3 %vm170_vm0, %v147_v62  ;;  %v150_v62 = vld [vmem:[%s6666_s0 + $0x3a0] sm:$0xff] }
 0x209   :  { %v1004_v54 = vmax.f32 %v717_v50, 0.0  ;;  %v1593_v55 = vadd.f32 %v4685_v27, %v1592_v52  ;;  %v2467_v56 = vadd.f32 %v4841_v12, %v2466_v53  ;;  %4076 = vmatmul.msk.f32.gmra.mxu0 %vm170_vm0, %v98_v49 }
 0x20b   :  { %v1912_v58 = vmax.f32 %v1593_v55, 0.0  ;;  %v2820_v59 = vmax.f32 %v2467_v56, 0.0  ;;  %4189 = vmatmul.msk.f32.gmra.mxu1 %vm1090_vm2, %v1004_v54  ;;  %v3067_v60 = vpop.xlane.xlu0 %3066  ;;  %v5159_v55 = vpop.f32.mrf.mxu3  ;;  %v5162_v56 = vadd.s32 4294967272, %v5101_v3 }
 0x20c   :  { %v3456_v14 = vadd.f32 %v5070_v43, %v3067_v60 }
 0x20d   :  { %4302 = vmatmul.msk.f32.gmra.mxu2 %vm2015_vm4, %v1912_v58  ;;  %v2952_v63 = vmul.f32 %v4853_v40, %v2820_v59 }
 0x20e   :  { %v719_v0 = vpop.f32.mrf.mxu0  ;;  %v3714_v21 = vperm.slane %v3456_v14, %v5101_v3 }
 0x20f   :  { %v720_v22 = vadd.f32 %v5033_v5, %v719_v0  ;;  %v3110_v2 = vsel %vm1090_vm2, %v2952_v63, 0.0 }
 0x210   :  { %v1595_v4 = vpop.f32.mrf.mxu1  ;;  %v2469_v6 = vpop.f32.mrf.mxu2  ;;  %3111 = vadd.xlane.f32.xlu0 %v3110_v2 }
 0x211   :  { %v1005_v7 = vmax.f32 %v720_v22, 0.0  ;;  %v1596_v8 = vadd.f32 %v4685_v27, %v1595_v4  ;;  %v2470_v9 = vadd.f32 %v4841_v12, %v2469_v6  ;;  %4077 = vmatmul.msk.f32.gmra.mxu0 %vm170_vm0, %v99_v1  ;;  %v148_v27 = vld [vmem:[%s6666_s0 + $0x390] sm:$0xff]  ;;  %v102_v22 = vld [vmem:[%s6666_s0 + $0x220] sm:$0xff] }
 0x212   :  { %4126 = vmatmul.msk.f32.gmra.mxu3 %vm170_vm0, %v148_v27 }
 0x213   :  { %v1913_v16 = vmax.f32 %v1596_v8, 0.0  ;;  %v2821_v17 = vmax.f32 %v2470_v9, 0.0  ;;  %4190 = vmatmul.msk.f32.gmra.mxu1 %vm1090_vm2, %v1005_v7  ;;  %v3070_v18 = vpop.xlane.xlu0 %3069 }
 0x214   :  { %v3457_v19 = vadd.f32 %v5070_v43, %v3070_v18  ;;  %v5185_v18 = vadd.s32 4294967264, %v5101_v3 }
 0x215   :  { %4303 = vmatmul.msk.f32.gmra.mxu2 %vm2015_vm4, %v1913_v16  ;;  %v2953_v20 = vmul.f32 %v4853_v40, %v2821_v17  ;;  %v5182_v17 = vpop.f32.mrf.mxu3 }
 0x216   :  { %v3716_v23 = vperm.slane %v3457_v19, %v5110_v15  ;;  %v722_v24 = vpop.f32.mrf.mxu0 }
 0x217   :  { %v723_v26 = vadd.f32 %v5033_v5, %v722_v24  ;;  %v3113_v28 = vsel %vm1090_vm2, %v2953_v20, 0.0 }
 0x218   :  { %v3718_v29 = vsel %vm3717_vm5, %v3716_v23, %v3714_v21  ;;  %v1598_v30 = vpop.f32.mrf.mxu1  ;;  %v2472_v31 = vpop.f32.mrf.mxu2  ;;  %3114 = vadd.xlane.f32.xlu1 %v3113_v28  ;;  %v151_v23 = vld [vmem:[%s6666_s0 + $0x3a8] sm:$0xff] }
 0x219   :  { %v1006_v32 = vmax.f32 %v723_v26, 0.0  ;;  %v1599_v33 = vadd.f32 %v5131_v10, %v1598_v30  ;;  %v2473_v13 = vadd.f32 %v4841_v12, %v2472_v31  ;;  %4078 = vmatmul.msk.f32.gmra.mxu0 %vm170_vm0, %v100_v25  ;;  %v103_v28 = vld [vmem:[%s6666_s0 + $0x228] sm:$0xff] }
 0x21a   :  { %4127 = vmatmul.msk.f32.gmra.mxu3 %vm170_vm0, %v149_v41 }
 0x21b   :  { %v1914_v36 = vmax.f32 %v1599_v33, 0.0  ;;  %v2822_v37 = vmax.f32 %v2473_v13, 0.0  ;;  %4191 = vmatmul.msk.f32.gmra.mxu1 %vm1090_vm2, %v1006_v32  ;;  %v3073_v38 = vpop.xlane.xlu1 %3072 }
 0x21c   :  { %v3458_v39 = vadd.f32 %v5070_v43, %v3073_v38 }
 0x21d   :  { %4304 = vmatmul.msk.f32.gmra.mxu2 %vm2015_vm4, %v1914_v36  ;;  %v2954_v42 = vmul.f32 %v4853_v40, %v2822_v37  ;;  %v5205_v38 = vpop.f32.mrf.mxu3 }
 0x21e   :  { %v3720_v44 = vperm.slane %v3458_v39, %v5139_v35  ;;  %v725_v45 = vpop.f32.mrf.mxu0  ;;  %v5208_v39 = vadd.s32 4294967256, %v5101_v3 }
 0x21f   :  { %v726_v47 = vadd.f32 %v5033_v5, %v725_v45  ;;  %v3116_v48 = vsel %vm1090_vm2, %v2954_v42, 0.0 }
 0x220   :  { %v3722_v49 = vsel %vm3721_vm6, %v3720_v44, %v3718_v29  ;;  %v1601_v50 = vpop.f32.mrf.mxu1  ;;  %v2475_v51 = vpop.f32.mrf.mxu2  ;;  %3117 = vadd.xlane.f32.xlu2 %v3116_v48 }
 0x221   :  { %v1007_v52 = vmax.f32 %v726_v47, 0.0  ;;  %v1602_v53 = vadd.f32 %v5131_v10, %v1601_v50  ;;  %v2476_v54 = vadd.f32 %v4841_v12, %v2475_v51  ;;  %4079 = vmatmul.msk.f32.gmra.mxu0 %vm170_vm0, %v101_v46  ;;  %v152_v46 = vld [vmem:[%s6666_s0 + $0x3b0] sm:$0xff] }
 0x222   :  { %4128 = vmatmul.msk.f32.gmra.mxu3 %vm170_vm0, %v150_v62  ;;  %v104_v50 = vld [vmem:[%s6666_s0 + $0x230] sm:$0xff] }
 0x223   :  { %v1915_v58 = vmax.f32 %v1602_v53, 0.0  ;;  %v2823_v59 = vmax.f32 %v2476_v54, 0.0  ;;  %4192 = vmatmul.msk.f32.gmra.mxu1 %vm1090_vm2, %v1007_v52  ;;  %v3076_v60 = vpop.xlane.xlu1 %3075 }
 0x224   :  { %v3459_v61 = vadd.f32 %v5070_v43, %v3076_v60 }
 0x225   :  { %4305 = vmatmul.msk.f32.gmra.mxu2 %vm2015_vm4, %v1915_v58  ;;  %v2955_v63 = vmul.f32 %v4853_v40, %v2823_v59  ;;  %v5228_v62 = vpop.f32.mrf.mxu3 }
 0x226   :  { %v3724_v0 = vperm.slane %v3459_v61, %v5162_v56  ;;  %v728_v1 = vpop.f32.mrf.mxu0 }
 0x227   :  { %v729_v2 = vadd.f32 %v5033_v5, %v728_v1  ;;  %v3119_v4 = vsel %vm1090_vm2, %v2955_v63, 0.0  ;;  %v5231_v63 = vadd.s32 4294967248, %v5101_v3 }
 0x228   :  { %v3726_v6 = vsel %vm3725_vm7, %v3724_v0, %v3722_v49  ;;  %v1604_v7 = vpop.f32.mrf.mxu1  ;;  %v2478_v8 = vpop.f32.mrf.mxu2  ;;  %3120 = vadd.xlane.f32.xlu0 %v3119_v4  ;;  %v153_v4 = vld [vmem:[%s6666_s0 + $0x3b8] sm:$0xff] }
 0x229   :  { %v1008_v9 = vmax.f32 %v729_v2, 0.0  ;;  %v1605_v14 = vadd.f32 %v5131_v10, %v1604_v7  ;;  %v2479_v16 = vadd.f32 %v4841_v12, %v2478_v8  ;;  %4080 = vmatmul.msk.f32.gmra.mxu0 %vm170_vm0, %v102_v22 }
 0x22a   :  { %4129 = vmatmul.msk.f32.gmra.mxu3 %vm170_vm0, %v151_v23 }
 0x22b   :  { %v1916_v19 = vmax.f32 %v1605_v14, 0.0  ;;  %v2824_v27 = vmax.f32 %v2479_v16, 0.0  ;;  %4193 = vmatmul.msk.f32.gmra.mxu1 %vm1090_vm2, %v1008_v9  ;;  %v3079_v20 = vpop.xlane.xlu2 %3078  ;;  %v105_v9 = vld [vmem:[%s6666_s0 + $0x238] sm:$0xff] }
 0x22c   :  { %v3460_v21 = vadd.f32 %v5070_v43, %v3079_v20 }
 0x22d   :  { %4306 = vmatmul.msk.f32.gmra.mxu2 %vm2015_vm4, %v1916_v19  ;;  %v2956_v24 = vmul.f32 %v4853_v40, %v2824_v27 }
 0x22e   :  { %v3728_v25 = vperm.slane %v3460_v21, %v5185_v18  ;;  %v731_v26 = vpop.f32.mrf.mxu0 }
 0x22f   :  { %v732_v29 = vadd.f32 %v5033_v5, %v731_v26  ;;  %v3122_v30 = vsel %vm1090_vm2, %v2956_v24, 0.0  ;;  %v5254_v26 = vadd.s32 4294967240, %v5101_v3 }
 0x230   :  { %v3730_v31 = vsel %vm3729_vm8, %v3728_v25, %v3726_v6  ;;  %v1607_v32 = vpop.f32.mrf.mxu1  ;;  %v2481_v33 = vpop.f32.mrf.mxu2  ;;  %3123 = vadd.xlane.f32.xlu1 %v3122_v30 }
 0x231   :  { %v1009_v13 = vmax.f32 %v732_v29, 0.0  ;;  %v1608_v36 = vadd.f32 %v5131_v10, %v1607_v32  ;;  %v2482_v37 = vadd.f32 %v4841_v12, %v2481_v33  ;;  %4081 = vmatmul.msk.f32.gmra.mxu0 %vm170_vm0, %v103_v28  ;;  %v5251_v25 = vpop.f32.mrf.mxu3  ;;  %v154_v32 = vld [vmem:[%s6666_s0 + $0x3c0] sm:$0xff] }
 0x232   :  { %4130 = vmatmul.msk.f32.gmra.mxu3 %vm170_vm0, %v152_v46 }
 0x233   :  { %v1917_v41 = vmax.f32 %v1608_v36, 0.0  ;;  %v2825_v42 = vmax.f32 %v2482_v37, 0.0  ;;  %4194 = vmatmul.msk.f32.gmra.mxu1 %vm1090_vm2, %v1009_v13  ;;  %v3082_v44 = vpop.xlane.xlu2 %3081  ;;  %v106_v37 = vld [vmem:[%s6666_s0 + $0x240] sm:$0xff] }
 0x234   :  { %v3461_v45 = vadd.f32 %v5070_v43, %v3082_v44 }
 0x235   :  { %4307 = vmatmul.msk.f32.gmra.mxu2 %vm2015_vm4, %v1917_v41  ;;  %v2957_v47 = vmul.f32 %v4853_v40, %v2825_v42 }
 0x236   :  { %v3732_v48 = vperm.slane %v3461_v45, %v5208_v39  ;;  %v734_v49 = vpop.f32.mrf.mxu0 }
 0x237   :  { %v735_v51 = vadd.f32 %v5033_v5, %v734_v49  ;;  %v3125_v52 = vsel %vm1090_vm2, %v2957_v47, 0.0 }
 0x238   :  { %v3734_v53 = vsel %vm3733_vm9, %v3732_v48, %v3730_v31  ;;  %v1610_v54 = vpop.f32.mrf.mxu1  ;;  %v2484_v58 = vpop.f32.mrf.mxu2  ;;  %3126 = vadd.xlane.f32.xlu2 %v3125_v52 }
 0x239   :  { %v1010_v59 = vmax.f32 %v735_v51, 0.0  ;;  %v1611_v60 = vadd.f32 %v5131_v10, %v1610_v54  ;;  %v2485_v61 = vadd.f32 %v4841_v12, %v2484_v58  ;;  %4082 = vmatmul.msk.f32.gmra.mxu0 %vm170_vm0, %v104_v50  ;;  %v5274_v50 = vpop.f32.mrf.mxu3  ;;  %v5277_v51 = vadd.s32 4294967232, %v5101_v3 }
 0x23a   :  { %4131 = vmatmul.msk.f32.gmra.mxu3 %vm170_vm0, %v153_v4 }
 0x23b   :  { %v1918_v0 = vmax.f32 %v1611_v60, 0.0  ;;  %v2826_v1 = vmax.f32 %v2485_v61, 0.0  ;;  %4195 = vmatmul.msk.f32.gmra.mxu1 %vm1090_vm2, %v1010_v59  ;;  %v3085_v22 = vpop.xlane.xlu0 %3084  ;;  %v155_v59 = vld [vmem:[%s6666_s0 + $0x3c8] sm:$0xff] }
 0x23c   :  { %v3462_v2 = vadd.f32 %v5070_v43, %v3085_v22 }
 0x23d   :  { %4308 = vmatmul.msk.f32.gmra.mxu2 %vm2015_vm4, %v1918_v0  ;;  %v2958_v6 = vmul.f32 %v4853_v40, %v2826_v1  ;;  %v107_v1 = vld [vmem:[%s6666_s0 + $0x248] sm:$0xff] }
 0x23e   :  { %v3736_v7 = vperm.slane %v3462_v2, %v5231_v63  ;;  %v737_v8 = vpop.f32.mrf.mxu0 }
 0x23f   :  { %v738_v14 = vadd.f32 %v5033_v5, %v737_v8  ;;  %v3128_v16 = vsel %vm1090_vm2, %v2958_v6, 0.0 }
 0x240   :  { %v3738_v19 = vsel %vm3737_vm10, %v3736_v7, %v3734_v53  ;;  %v1613_v27 = vpop.f32.mrf.mxu1  ;;  %v2487_v20 = vpop.f32.mrf.mxu2  ;;  %3129 = vadd.xlane.f32.xlu0 %v3128_v16  ;;  %v5298_v16 = vadd.s32 4294967224, %v5101_v3 }
 0x241   :  { %v1011_v21 = vmax.f32 %v738_v14, 0.0  ;;  %v1614_v23 = vadd.f32 %v5131_v10, %v1613_v27  ;;  %v2488_v24 = vadd.f32 %v4841_v12, %v2487_v20  ;;  %4083 = vmatmul.msk.f32.gmra.mxu0 %vm170_vm0, %v105_v9 }
 0x242   :  { %4132 = vmatmul.msk.f32.gmra.mxu3 %vm170_vm0, %v154_v32 }
 0x243   :  { %v1919_v28 = vmax.f32 %v1614_v23, 0.0  ;;  %v2827_v29 = vmax.f32 %v2488_v24, 0.0  ;;  %4196 = vmatmul.msk.f32.gmra.mxu1 %vm1090_vm2, %v1011_v21  ;;  %v3088_v30 = vpop.xlane.xlu1 %3087  ;;  %v5301_v21 = vpop.f32.mrf.mxu3  ;;  %v156_v24 = vld [vmem:[%s6666_s0 + $0x3d0] sm:$0xff] }
 0x244   :  { %v3463_v31 = vadd.f32 %v5070_v43, %v3088_v30  ;;  %v108_v30 = vld [vmem:[%s6666_s0 + $0x250] sm:$0xff] }
 0x245   :  { %4309 = vmatmul.msk.f32.gmra.mxu2 %vm2015_vm4, %v1919_v28  ;;  %v2959_v33 = vmul.f32 %v4853_v40, %v2827_v29 }
 0x246   :  { %v3740_v13 = vperm.slane %v3463_v31, %v5254_v26  ;;  %v740_v36 = vpop.f32.mrf.mxu0 }
 0x247   :  { %v741_v41 = vadd.f32 %v5033_v5, %v740_v36  ;;  %v3131_v42 = vsel %vm1090_vm2, %v2959_v33, 0.0 }
 0x248   :  { %v3742_v44 = vsel %vm3741_vm11, %v3740_v13, %v3738_v19  ;;  %v1616_v45 = vpop.f32.mrf.mxu1  ;;  %v2490_v46 = vpop.f32.mrf.mxu2  ;;  %3132 = vadd.xlane.f32.xlu1 %v3131_v42 }
 0x249   :  { %v1012_v47 = vmax.f32 %v741_v41, 0.0  ;;  %v1617_v48 = vadd.f32 %v5131_v10, %v1616_v45  ;;  %v2491_v49 = vadd.f32 %v4841_v12, %v2490_v46  ;;  %4084 = vmatmul.msk.f32.gmra.mxu0 %vm170_vm0, %v106_v37  ;;  %v5321_v41 = vld [vmem:[%s6671_s6] ss:$0 sm:$0xff] }
 0x24a   :  { %4133 = vmatmul.msk.f32.gmra.mxu3 %vm170_vm0, %v155_v59 }
 0x24b   :  { %v1920_v52 = vmax.f32 %v1617_v48, 0.0  ;;  %v2828_v53 = vmax.f32 %v2491_v49, 0.0  ;;  %4197 = vmatmul.msk.f32.gmra.mxu1 %vm1090_vm2, %v1012_v47  ;;  %v3091_v54 = vpop.xlane.xlu2 %3090  ;;  %v157_v49 = vld [vmem:[%s6666_s0 + $0x3d8] sm:$0xff] }
 0x24c   :  { %v3464_v58 = vadd.f32 %v5070_v43, %v3091_v54  ;;  %v5340_v54 = vpop.f32.mrf.mxu3 }
 0x24d   :  { %4310 = vmatmul.msk.f32.gmra.mxu2 %vm2015_vm4, %v1920_v52  ;;  %v2960_v60 = vmul.f32 %v4853_v40, %v2828_v53  ;;  %v5337_v52 = vld [vmem:[%s6672_s7] ss:$0 sm:$0xff] }
 0x24e   :  { %v3744_v61 = vperm.slane %v3464_v58, %v5277_v51  ;;  %v743_v0 = vpop.f32.mrf.mxu0 }
 0x24f   :  { %v744_v22 = vadd.f32 %v5033_v5, %v743_v0  ;;  %v3134_v2 = vsel %vm1090_vm2, %v2960_v60, 0.0  ;;  %v109_v60 = vld [vmem:[%s6666_s0 + $0x258] sm:$0xff] }
 0x250   :  { %v3746_v4 = vsel %vm3745_vm12, %v3744_v61, %v3742_v44  ;;  %v1619_v6 = vpop.f32.mrf.mxu1  ;;  %v2493_v7 = vpop.f32.mrf.mxu2  ;;  %3135 = vadd.xlane.f32.xlu2 %v3134_v2  ;;  %v5326_v44 = vadd.s32 4294967216, %v5101_v3 }
 0x251   :  { %v1013_v8 = vmax.f32 %v744_v22, 0.0  ;;  %v1620_v9 = vadd.f32 %v5131_v10, %v1619_v6  ;;  %v2494_v14 = vadd.f32 %v4841_v12, %v2493_v7  ;;  %4085 = vmatmul.msk.f32.gmra.mxu0 %vm170_vm0, %v107_v1 }
 0x252   :  { %4134 = vmatmul.msk.f32.gmra.mxu3 %vm170_vm0, %v156_v24 }
 0x253   :  { %v1921_v19 = vmax.f32 %v1620_v9, 0.0  ;;  %v2829_v27 = vmax.f32 %v2494_v14, 0.0  ;;  %4198 = vmatmul.msk.f32.gmra.mxu1 %vm1090_vm2, %v1013_v8  ;;  %v3094_v20 = vpop.xlane.xlu0 %3093  ;;  %v5354_v8 = vadd.s32 4294967208, %v5101_v3 }
 0x254   :  { %v3465_v23 = vadd.f32 %v5070_v43, %v3094_v20  ;;  %v158_v20 = vld [vmem:[%s6666_s0 + $0x3e0] sm:$0xff] }
 0x255   :  { %4311 = vmatmul.msk.f32.gmra.mxu2 %vm2015_vm4, %v1921_v19  ;;  %v2961_v12 = vmul.f32 %v4853_v40, %v2829_v27 }
 0x256   :  { %v3748_v28 = vperm.slane %v3465_v23, %v5298_v16  ;;  %v746_v29 = vpop.f32.mrf.mxu0 }
 0x257   :  { %v747_v31 = vadd.f32 %v5033_v5, %v746_v29  ;;  %v3137_v32 = vsel %vm1090_vm2, %v2961_v12, 0.0 }
 0x258   :  { %v3750_v33 = vsel %vm3749_vm13, %v3748_v28, %v3746_v4  ;;  %v1622_v13 = vpop.f32.mrf.mxu1  ;;  %v2496_v36 = vpop.f32.mrf.mxu2  ;;  %3138 = vadd.xlane.f32.xlu0 %v3137_v32  ;;  %v110_v28 = vld [vmem:[%s6666_s0 + $0x260] sm:$0xff] }
 0x259   :  { %v1014_v37 = vmax.f32 %v747_v31, 0.0  ;;  %v1623_v40 = vadd.f32 %v5131_v10, %v1622_v13  ;;  %v2497_v42 = vadd.f32 %v5321_v41, %v2496_v36  ;;  %4086 = vmatmul.msk.f32.gmra.mxu0 %vm170_vm0, %v108_v30  ;;  %v5370_v31 = vpop.f32.mrf.mxu3 }
 0x25a   :  { %4135 = vmatmul.msk.f32.gmra.mxu3 %vm170_vm0, %v157_v49  ;;  %v159_v49 = vld [vmem:[%s6666_s0 + $0x3e8] sm:$0xff] }
 0x25b   :  { %v1922_v45 = vmax.f32 %v1623_v40, 0.0  ;;  %v2830_v46 = vmax.f32 %v2497_v42, 0.0  ;;  %4199 = vmatmul.msk.f32.gmra.mxu1 %vm1090_vm2, %v1014_v37  ;;  %v3097_v47 = vpop.xlane.xlu1 %3096  ;;  %v5377_v42 = vadd.s32 4294967200, %v5101_v3 }
 0x25c   :  { %v3466_v48 = vadd.f32 %v5070_v43, %v3097_v47 }
 0x25d   :  { %4312 = vmatmul.msk.f32.gmra.mxu2 %vm2015_vm4, %v1922_v45  ;;  %v2962_v53 = vmul.f32 %v5337_v52, %v2830_v46 }
 0x25e   :  { %v3752_v58 = vperm.slane %v3466_v48, %v5326_v44  ;;  %v749_v59 = vpop.f32.mrf.mxu0 }
 0x25f   :  { %v750_v61 = vadd.f32 %v5033_v5, %v749_v59  ;;  %v3140_v0 = vsel %vm1090_vm2, %v2962_v53, 0.0 }
 0x260   :  { %v3754_v1 = vsel %vm3753_vm14, %v3752_v58, %v3750_v33  ;;  %v1625_v22 = vpop.f32.mrf.mxu1  ;;  %v2499_v2 = vpop.f32.mrf.mxu2  ;;  %3141 = vadd.xlane.f32.xlu1 %v3140_v0 }
 0x261   :  { %v1015_v4 = vmax.f32 %v750_v61, 0.0  ;;  %v1626_v6 = vadd.f32 %v5131_v10, %v1625_v22  ;;  %v2500_v7 = vadd.f32 %v5321_v41, %v2499_v2  ;;  %4087 = vmatmul.msk.f32.gmra.mxu0 %vm170_vm0, %v109_v60  ;;  %v111_v60 = vld [vmem:[%s6666_s0 + $0x268] sm:$0xff] }
 0x262   :  { %4136 = vmatmul.msk.f32.gmra.mxu3 %vm170_vm0, %v158_v20 }
 0x263   :  { %v1923_v9 = vmax.f32 %v1626_v6, 0.0  ;;  %v2831_v14 = vmax.f32 %v2500_v7, 0.0  ;;  %4200 = vmatmul.msk.f32.gmra.mxu1 %vm1090_vm2, %v1015_v4  ;;  %v3100_v19 = vpop.xlane.xlu2 %3099 }
 0x264   :  { %v3467_v27 = vadd.f32 %v5070_v43, %v3100_v19 }
 0x265   :  { %4313 = vmatmul.msk.f32.gmra.mxu2 %vm2015_vm4, %v1923_v9  ;;  %v2963_v23 = vmul.f32 %v5337_v52, %v2831_v14  ;;  %v5397_v9 = vpop.f32.mrf.mxu3  ;;  %v5400_v14 = vadd.s32 4294967192, %v5101_v3 }
 0x266   :  { %v3756_v24 = vperm.slane %v3467_v27, %v5354_v8  ;;  %v752_v12 = vpop.f32.mrf.mxu0 }
 0x267   :  { %v753_v29 = vadd.f32 %v5033_v5, %v752_v12  ;;  %v3143_v30 = vsel %vm1090_vm2, %v2963_v23, 0.0 }
 0x268   :  { %v3758_v32 = vsel %vm6678_vm15, %v3756_v24, %v3754_v1  ;;  %v1628_v33 = vpop.f32.mrf.mxu1  ;;  %v2502_v13 = vpop.f32.mrf.mxu2  ;;  %3144 = vadd.xlane.f32.xlu2 %v3143_v30  ;;  %v160_v24 = vld [vmem:[%s6666_s0 + $0x3f0] sm:$0xff] }
 0x269   :  { %v1016_v36 = vmax.f32 %v753_v29, 0.0  ;;  %v1629_v37 = vadd.f32 %v5131_v10, %v1628_v33  ;;  %v2503_v40 = vadd.f32 %v5321_v41, %v2502_v13  ;;  %4088 = vmatmul.msk.f32.gmra.mxu0 %vm170_vm0, %v110_v28  ;;  %v112_v30 = vld [vmem:[%s6666_s0 + $0x270] sm:$0xff] }
 0x26a   :  { %4137 = vmatmul.msk.f32.gmra.mxu3 %vm170_vm0, %v159_v49 }
 0x26b   :  { %v1924_v45 = vmax.f32 %v1629_v37, 0.0  ;;  %v2832_v46 = vmax.f32 %v2503_v40, 0.0  ;;  %4201 = vmatmul.msk.f32.gmra.mxu1 %vm1090_vm2, %v1016_v36  ;;  %v3103_v47 = vpop.xlane.xlu0 %3102 }
 0x26c   :  { %v3468_v48 = vadd.f32 %v5070_v43, %v3103_v47  ;;  %v5421_v47 = vadd.s32 4294967184, %v5101_v3 }
 0x26d   :  { %4314 = vmatmul.msk.f32.gmra.mxu2 %vm2015_vm4, %v1924_v45  ;;  %v2964_v53 = vmul.f32 %v5337_v52, %v2832_v46 }
 0x26e   :  { %v3760_v58 = vperm.slane %v3468_v48, %v5377_v42  ;;  %v755_v59 = vpop.f32.mrf.mxu0 }
 0x26f   :  { %v756_v61 = vadd.f32 %v5033_v5, %v755_v59  ;;  %v3146_v0 = vsel %vm1090_vm2, %v2964_v53, 0.0 }
 0x270   :  { %v3762_v1 = vsel %vm6677_vm1, %v3760_v58, %v3758_v32  ;;  %v1631_v22 = vpop.f32.mrf.mxu1  ;;  %v2505_v2 = vpop.f32.mrf.mxu2  ;;  %3147 = vadd.xlane.f32.xlu0 %v3146_v0 }
 0x271   :  { %v1017_v4 = vmax.f32 %v756_v61, 0.0  ;;  %v1632_v6 = vadd.f32 %v5131_v10, %v1631_v22  ;;  %v2506_v7 = vadd.f32 %v5321_v41, %v2505_v2  ;;  %4089 = vmatmul.msk.f32.gmra.mxu0 %vm170_vm0, %v111_v60  ;;  %v5424_v58 = vpop.f32.mrf.mxu3  ;;  %v161_v60 = vld [vmem:[%s6666_s0 + $0x3f8] sm:$0xff]  ;;  %v864_v61 = vadd.f32 %v5033_v5, %v5106_v11 }
 0x272   :  { %4138 = vmatmul.msk.f32.gmra.mxu3 %vm170_vm0, %v160_v24  ;;  %v113_v2 = vld [vmem:[%s6666_s0 + $0x278] sm:$0xff] }
 0x273   :  { %v1925_v19 = vmax.f32 %v1632_v6, 0.0  ;;  %v2833_v27 = vmax.f32 %v2506_v7, 0.0  ;;  %4202 = vmatmul.msk.f32.gmra.mxu1 %vm1090_vm2, %v1017_v4  ;;  %v3106_v20 = vpop.xlane.xlu1 %3105 }
 0x274   :  { %v3469_v23 = vadd.f32 %v5070_v43, %v3106_v20 }
 0x275   :  { %4315 = vmatmul.msk.f32.gmra.mxu2 %vm2015_vm4, %v1925_v19  ;;  %v2965_v12 = vmul.f32 %v5337_v52, %v2833_v27  ;;  %v1053_v27 = vmax.f32 %v864_v61, 0.0 }
 0x276   :  { %v3764_v28 = vperm.slane %v3469_v23, %v5400_v14  ;;  %v758_v29 = vpop.f32.mrf.mxu0 }
 0x277   :  { %v759_v32 = vadd.f32 %v5033_v5, %v758_v29  ;;  %v3149_v33 = vsel %vm1090_vm2, %v2965_v12, 0.0  ;;  %v5446_v12 = vadd.s32 4294967176, %v5101_v3 }
 0x278   :  { %v3766_v13 = vsel %vm6675_vm3, %v3764_v28, %v3762_v1  ;;  %v1634_v36 = vpop.f32.mrf.mxu1  ;;  %v2508_v37 = vpop.f32.mrf.mxu2  ;;  %3150 = vadd.xlane.f32.xlu1 %v3149_v33  ;;  %vm6676_vm3 = vcmask 982912   ;;  %v867_v33 = vadd.f32 %v5033_v5, %v5136_v34 }
 0x279   :  { %v1018_v40 = vmax.f32 %v759_v32, 0.0  ;;  %v1635_v45 = vadd.f32 %v5131_v10, %v1634_v36  ;;  %v2509_v46 = vadd.f32 %v5321_v41, %v2508_v37  ;;  %4090 = vmatmul.msk.f32.gmra.mxu0 %vm170_vm0, %v112_v30  ;;  %v5454_v36 = vpop.f32.mrf.mxu3 }
 0x27a   :  { %4139 = vmatmul.msk.f32.gmra.mxu3 %vm170_vm0, %v161_v60 }
 0x27b   :  { %v1926_v48 = vmax.f32 %v1635_v45, 0.0  ;;  %v2834_v49 = vmax.f32 %v2509_v46, 0.0  ;;  %4203 = vmatmul.msk.f32.gmra.mxu1 %vm1090_vm2, %v1018_v40  ;;  %v3109_v53 = vpop.xlane.xlu2 %3108  ;;  %v114_v45 = vld [vmem:[%s6666_s0 + $0x280] sm:$0xff] }
 0x27c   :  { %v3470_v59 = vadd.f32 %v5070_v43, %v3109_v53 }
 0x27d   :  { %4316 = vmatmul.msk.f32.gmra.mxu2 %vm2015_vm4, %v1926_v48  ;;  %v2966_v0 = vmul.f32 %v5337_v52, %v2834_v49 }
 0x27e   :  { %v3768_v1 = vperm.slane %v3470_v59, %v5421_v47  ;;  %v761_v22 = vpop.f32.mrf.mxu0  ;;  %v1054_v59 = vmax.f32 %v867_v33, 0.0 }
 0x27f   :  { %v762_v4 = vadd.f32 %v5033_v5, %v761_v22  ;;  %v3152_v6 = vsel %vm1090_vm2, %v2966_v0, 0.0 }
 0x280   :  { %v3770_v11 = vsel %vm6676_vm3, %v3768_v1, %v3766_v13  ;;  %v1637_v7 = vpop.f32.mrf.mxu1  ;;  %v2511_v19 = vpop.f32.mrf.mxu2  ;;  %3153 = vadd.xlane.f32.xlu2 %v3152_v6  ;;  %vm3773_vm3 = vcmask 1048512  }
 0x281   :  { %v1019_v20 = vmax.f32 %v762_v4, 0.0  ;;  %v1638_v23 = vadd.f32 %v5131_v10, %v1637_v7  ;;  %v2512_v24 = vadd.f32 %v5321_v41, %v2511_v19  ;;  %4091 = vmatmul.msk.f32.gmra.mxu0 %vm170_vm0, %v113_v2  ;;  %v870_v2 = vadd.f32 %v5033_v5, %v5159_v55 }
 0x282   :  { %4238 = vmatmul.msk.f32.vlgmr.msrb.gmra.mxu3 %vm1090_vm2, %v1053_v27 }
 0x283   :  { %v1927_v28 = vmax.f32 %v1638_v23, 0.0  ;;  %v2835_v29 = vmax.f32 %v2512_v24, 0.0  ;;  %4204 = vmatmul.msk.f32.gmra.mxu1 %vm1090_vm2, %v1019_v20  ;;  %v3112_v30 = vpop.xlane.xlu0 %3111  ;;  %v5480_v20 = vpop.f32.mrf.mxu3  ;;  %v1055_v24 = vmax.f32 %v870_v2, 0.0 }
 0x284   :  { %v3471_v32 = vadd.f32 %v5070_v43, %v3112_v30 }
 0x285   :  { %4317 = vmatmul.msk.f32.gmra.mxu2 %vm2015_vm4, %v1927_v28  ;;  %v2967_v13 = vmul.f32 %v5337_v52, %v2835_v29 }
 0x286   :  { %v3772_v37 = vperm.slane %v3471_v32, %v5446_v12  ;;  %v764_v40 = vpop.f32.mrf.mxu0 }
 0x287   :  { %v765_v46 = vadd.f32 %v5033_v5, %v764_v40  ;;  %v3155_v34 = vsel %vm1090_vm2, %v2967_v13, 0.0 }
 0x288   :  { %v5464_v48 = vsel %vm3773_vm3, %v3772_v37, %v3770_v11  ;;  %v1640_v49 = vpop.f32.mrf.mxu1  ;;  %v2514_v53 = vpop.f32.mrf.mxu2  ;;  %3156 = vadd.xlane.f32.xlu0 %v3155_v34  ;;  %v115_v11 = vld [vmem:[%s6666_s0 + $0x288] sm:$0xff] }
 0x289   :  { %v1020_v60 = vmax.f32 %v765_v46, 0.0  ;;  %v1641_v61 = vadd.f32 %v5131_v10, %v1640_v49  ;;  %v2515_v0 = vadd.f32 %v5321_v41, %v2514_v53  ;;  %4092 = vmatmul.msk.f32.gmra.mxu0 %vm170_vm0, %v114_v45  ;;  %v873_v45 = vadd.f32 %v5033_v5, %v5182_v17 }
 0x28a   :  { %4239 = vmatmul.msk.f32.gmra.mxu3 %vm1090_vm2, %v1054_v59  ;;  %v116_v59 = vld [vmem:[%s6666_s0 + $0x290] sm:$0xff] }
 0x28b   :  { %v1928_v1 = vmax.f32 %v1641_v61, 0.0  ;;  %v2836_v22 = vmax.f32 %v2515_v0, 0.0  ;;  %4205 = vmatmul.msk.f32.gmra.mxu1 %vm1090_vm2, %v1020_v60  ;;  %v3115_v7 = vpop.xlane.xlu1 %3114 }
 0x28c   :  { %v3472_v32 = vadd.f32 %v5070_v43, %v3115_v7 }
 0x28d   :  { %4318 = vmatmul.msk.f32.gmra.mxu2 %vm2015_vm4, %v1928_v1  ;;  %v2968_v4 = vmul.f32 %v5337_v52, %v2836_v22  ;;  %v1056_v22 = vmax.f32 %v873_v45, 0.0 }
 0x28e   :  { %v767_v6 = vpop.f32.mrf.mxu0  ;;  %v3775_v34 = vperm.slane %v3472_v32, %v5101_v3 }
 0x28f   :  { %v768_v19 = vadd.f32 %v5033_v5, %v767_v6  ;;  %v3158_v27 = vsel %vm1090_vm2, %v2968_v4, 0.0 }
 0x290   :  { %v1643_v23 = vpop.f32.mrf.mxu1  ;;  %v2517_v55 = vpop.f32.mrf.mxu2  ;;  %3159 = vadd.xlane.f32.xlu1 %v3158_v27 }
 0x291   :  { %v1021_v28 = vmax.f32 %v768_v19, 0.0  ;;  %v1644_v29 = vadd.f32 %v5131_v10, %v1643_v23  ;;  %v2518_v30 = vadd.f32 %v5321_v41, %v2517_v55  ;;  %4093 = vmatmul.msk.f32.gmra.mxu0 %vm170_vm0, %v115_v11  ;;  %v5504_v11 = vpop.f32.mrf.mxu3  ;;  %v5511_v23 = vld [vmem:[%s6667_s2] ss:$0 sm:$0xff] }
 0x292   :  { %4240 = vmatmul.msk.f32.gmra.mxu3 %vm1090_vm2, %v1055_v24  ;;  %v876_v55 = vadd.f32 %v5511_v23, %v5205_v38 }
 0x293   :  { %v1929_v33 = vmax.f32 %v1644_v29, 0.0  ;;  %v2837_v13 = vmax.f32 %v2518_v30, 0.0  ;;  %4206 = vmatmul.msk.f32.gmra.mxu1 %vm1090_vm2, %v1021_v28  ;;  %v3118_v37 = vpop.xlane.xlu2 %3117  ;;  %v117_v30 = vld [vmem:[%s6666_s0 + $0x298] sm:$0xff] }
 0x294   :  { %v3473_v40 = vadd.f32 %v5070_v43, %v3118_v37 }
 0x295   :  { %4319 = vmatmul.msk.f32.gmra.mxu2 %vm2015_vm4, %v1929_v33  ;;  %v2969_v46 = vmul.f32 %v5337_v52, %v2837_v13 }
 0x296   :  { %v3776_v49 = vperm.slane %v3473_v40, %v5110_v15  ;;  %v770_v53 = vpop.f32.mrf.mxu0  ;;  %v1057_v40 = vmax.f32 %v876_v55, 0.0 }
 0x297   :  { %v771_v60 = vadd.f32 %v5033_v5, %v770_v53  ;;  %v3161_v61 = vsel %vm1090_vm2, %v2969_v46, 0.0 }
 0x298   :  { %v3777_v17 = vsel %vm3717_vm5, %v3776_v49, %v3775_v34  ;;  %v1646_v0 = vpop.f32.mrf.mxu1  ;;  %v2520_v1 = vpop.f32.mrf.mxu2  ;;  %3162 = vadd.xlane.f32.xlu2 %v3161_v61 }
 0x299   :  { %v1022_v2 = vmax.f32 %v771_v60, 0.0  ;;  %v1647_v4 = vadd.f32 %v5131_v10, %v1646_v0  ;;  %v2521_v6 = vadd.f32 %v5321_v41, %v2520_v1  ;;  %4094 = vmatmul.msk.f32.gmra.mxu0 %vm170_vm0, %v116_v59  ;;  %v5529_v60 = vpop.f32.mrf.mxu3 }
 0x29a   :  { %4241 = vmatmul.msk.f32.gmra.mxu3 %vm1090_vm2, %v1056_v22 }
 0x29b   :  { %v1930_v7 = vmax.f32 %v1647_v4, 0.0  ;;  %v2838_v19 = vmax.f32 %v2521_v6, 0.0  ;;  %4207 = vmatmul.msk.f32.gmra.mxu1 %vm1090_vm2, %v1022_v2  ;;  %v3121_v5 = vpop.xlane.xlu0 %3120  ;;  %v118_v2 = vld [vmem:[%s6666_s0 + $0x2a0] sm:$0xff] }
 0x29c   :  { %v3474_v27 = vadd.f32 %v5070_v43, %v3121_v5 }
 0x29d   :  { %4320 = vmatmul.msk.f32.gmra.mxu2 %vm2015_vm4, %v1930_v7  ;;  %v2970_v24 = vmul.f32 %v5337_v52, %v2838_v19 }
 0x29e   :  { %v3778_v28 = vperm.slane %v3474_v27, %v5139_v35  ;;  %v773_v29 = vpop.f32.mrf.mxu0 }
 0x29f   :  { %v774_v32 = vadd.f32 %v5511_v23, %v773_v29  ;;  %v3164_v33 = vsel %vm1090_vm2, %v2970_v24, 0.0 }
 0x2a0   :  { %v3779_v13 = vsel %vm3721_vm6, %v3778_v28, %v3777_v17  ;;  %v1649_v38 = vpop.f32.mrf.mxu1  ;;  %v2523_v37 = vpop.f32.mrf.mxu2  ;;  %3165 = vadd.xlane.f32.xlu0 %v3164_v33  ;;  %v879_v17 = vadd.f32 %v5511_v23, %v5228_v62  ;;  %v882_v33 = vadd.f32 %v5511_v23, %v5251_v25 }
 0x2a1   :  { %v1023_v45 = vmax.f32 %v774_v32, 0.0  ;;  %v1650_v46 = vadd.f32 %v5131_v10, %v1649_v38  ;;  %v2524_v34 = vadd.f32 %v5321_v41, %v2523_v37  ;;  %4095 = vmatmul.msk.f32.gmra.mxu0 %vm170_vm0, %v117_v30  ;;  %v5553_v38 = vpop.f32.mrf.mxu3 }
 0x2a2   :  { %4242 = vmatmul.msk.f32.gmra.mxu3 %vm1090_vm2, %v1057_v40  ;;  %v1058_v5 = vmax.f32 %v879_v17, 0.0 }
 0x2a3   :  { %v1931_v49 = vmax.f32 %v1650_v46, 0.0  ;;  %v2839_v53 = vmax.f32 %v2524_v34, 0.0  ;;  %4208 = vmatmul.msk.f32.gmra.mxu1 %vm1090_vm2, %v1023_v45  ;;  %v3124_v59 = vpop.xlane.xlu1 %3123  ;;  %v119_v45 = vld [vmem:[%s6666_s0 + $0x2a8] sm:$0xff] }
 0x2a4   :  { %v3475_v61 = vadd.f32 %v5070_v43, %v3124_v59  ;;  %v1059_v59 = vmax.f32 %v882_v33, 0.0 }
 0x2a5   :  { %4321 = vmatmul.msk.f32.gmra.mxu2 %vm2015_vm4, %v1931_v49  ;;  %v2971_v0 = vmul.f32 %v5337_v52, %v2839_v53 }
 0x2a6   :  { %v3780_v1 = vperm.slane %v3475_v61, %v5162_v56  ;;  %v776_v22 = vpop.f32.mrf.mxu0 }
 0x2a7   :  { %v777_v4 = vadd.f32 %v5511_v23, %v776_v22  ;;  %v3167_v6 = vsel %vm1090_vm2, %v2971_v0, 0.0 }
 0x2a8   :  { %v3781_v7 = vsel %vm3725_vm7, %v3780_v1, %v3779_v13  ;;  %v1652_v62 = vpop.f32.mrf.mxu1  ;;  %v2526_v19 = vpop.f32.mrf.mxu2  ;;  %3168 = vadd.xlane.f32.xlu1 %v3167_v6  ;;  %v885_v6 = vadd.f32 %v5511_v23, %v5274_v50 }
 0x2a9   :  { %v1024_v27 = vmax.f32 %v777_v4, 0.0  ;;  %v1653_v55 = vadd.f32 %v5131_v10, %v1652_v62  ;;  %v2527_v24 = vadd.f32 %v5321_v41, %v2526_v19  ;;  %4096 = vmatmul.msk.f32.gmra.mxu0 %vm170_vm0, %v118_v2 }
 0x2aa   :  { %4243 = vmatmul.msk.f32.gmra.mxu3 %vm1090_vm2, %v1058_v5  ;;  %v120_v5 = vld [vmem:[%s6666_s0 + $0x2b0] sm:$0xff] }
 0x2ab   :  { %v1932_v28 = vmax.f32 %v1653_v55, 0.0  ;;  %v2840_v29 = vmax.f32 %v2527_v24, 0.0  ;;  %4209 = vmatmul.msk.f32.gmra.mxu1 %vm1090_vm2, %v1024_v27  ;;  %v3127_v30 = vpop.xlane.xlu2 %3126  ;;  %v5579_v24 = vpop.f32.mrf.mxu3 }
 0x2ac   :  { %v3476_v32 = vadd.f32 %v5070_v43, %v3127_v30  ;;  %v1060_v30 = vmax.f32 %v885_v6, 0.0 }
 0x2ad   :  { %4322 = vmatmul.msk.f32.gmra.mxu2 %vm2015_vm4, %v1932_v28  ;;  %v2972_v13 = vmul.f32 %v5337_v52, %v2840_v29 }
 0x2ae   :  { %v3782_v37 = vperm.slane %v3476_v32, %v5185_v18  ;;  %v779_v40 = vpop.f32.mrf.mxu0 }
 0x2af   :  { %v780_v46 = vadd.f32 %v5511_v23, %v779_v40  ;;  %v3170_v34 = vsel %vm1090_vm2, %v2972_v13, 0.0 }
 0x2b0   :  { %v3783_v25 = vsel %vm3729_vm8, %v3782_v37, %v3781_v7  ;;  %v1655_v49 = vpop.f32.mrf.mxu1  ;;  %v2529_v53 = vpop.f32.mrf.mxu2  ;;  %3171 = vadd.xlane.f32.xlu2 %v3170_v34  ;;  %v888_v34 = vadd.f32 %v5511_v23, %v5301_v21 }
 0x2b1   :  { %v1025_v61 = vmax.f32 %v780_v46, 0.0  ;;  %v1656_v17 = vadd.f32 %v5131_v10, %v1655_v49  ;;  %v2530_v0 = vadd.f32 %v5321_v41, %v2529_v53  ;;  %4097 = vmatmul.msk.f32.gmra.mxu0 %vm170_vm0, %v119_v45  ;;  %v121_v53 = vld [vmem:[%s6666_s0 + $0x2b8] sm:$0xff] }
 0x2b2   :  { %4244 = vmatmul.msk.f32.gmra.mxu3 %vm1090_vm2, %v1059_v59 }
 0x2b3   :  { %v1933_v1 = vmax.f32 %v1656_v17, 0.0  ;;  %v2841_v22 = vmax.f32 %v2530_v0, 0.0  ;;  %4210 = vmatmul.msk.f32.gmra.mxu1 %vm1090_vm2, %v1025_v61  ;;  %v3130_v2 = vpop.xlane.xlu0 %3129 }
 0x2b4   :  { %v3477_v4 = vadd.f32 %v5070_v43, %v3130_v2  ;;  %v5602_v2 = vld [vmem:[%s6669_s4] ss:$0 sm:$0xff] }
 0x2b5   :  { %4323 = vmatmul.msk.f32.gmra.mxu2 %vm2015_vm4, %v1933_v1  ;;  %v2973_v7 = vmul.f32 %v5337_v52, %v2841_v22  ;;  %v1061_v1 = vmax.f32 %v888_v34, 0.0 }
 0x2b6   :  { %v3784_v62 = vperm.slane %v3477_v4, %v5208_v39  ;;  %v782_v19 = vpop.f32.mrf.mxu0 }
 0x2b7   :  { %v783_v27 = vadd.f32 %v5511_v23, %v782_v19  ;;  %v3173_v55 = vsel %vm1090_vm2, %v2973_v7, 0.0  ;;  %v5607_v7 = vpop.f32.mrf.mxu3 }
 0x2b8   :  { %v3785_v50 = vsel %vm3733_vm9, %v3784_v62, %v3783_v25  ;;  %v1658_v28 = vpop.f32.mrf.mxu1  ;;  %v2532_v29 = vpop.f32.mrf.mxu2  ;;  %3174 = vadd.xlane.f32.xlu0 %v3173_v55  ;;  %v891_v55 = vadd.f32 %v5511_v23, %v5340_v54 }
 0x2b9   :  { %v1026_v32 = vmax.f32 %v783_v27, 0.0  ;;  %v1659_v33 = vadd.f32 %v5131_v10, %v1658_v28  ;;  %v2533_v13 = vadd.f32 %v5321_v41, %v2532_v29  ;;  %4098 = vmatmul.msk.f32.gmra.mxu0 %vm170_vm0, %v120_v5 }
 0x2ba   :  { %4245 = vmatmul.msk.f32.gmra.mxu3 %vm1090_vm2, %v1060_v30  ;;  %v122_v30 = vld [vmem:[%s6666_s0 + $0x2c0] sm:$0xff] }
 0x2bb   :  { %v1934_v37 = vmax.f32 %v1659_v33, 0.0  ;;  %v2842_v40 = vmax.f32 %v2533_v13, 0.0  ;;  %4211 = vmatmul.msk.f32.gmra.mxu1 %vm1090_vm2, %v1026_v32  ;;  %v3133_v45 = vpop.xlane.xlu1 %3132 }
 0x2bc   :  { %v3478_v46 = vadd.f32 %v5070_v43, %v3133_v45 }
 0x2bd   :  { %4324 = vmatmul.msk.f32.gmra.mxu2 %vm2015_vm4, %v1934_v37  ;;  %v2974_v25 = vmul.f32 %v5337_v52, %v2842_v40  ;;  %v1062_v40 = vmax.f32 %v891_v55, 0.0 }
 0x2be   :  { %v3786_v10 = vperm.slane %v3478_v46, %v5231_v63  ;;  %v785_v49 = vpop.f32.mrf.mxu0 }
 0x2bf   :  { %v786_v59 = vadd.f32 %v5511_v23, %v785_v49  ;;  %v3176_v61 = vsel %vm1090_vm2, %v2974_v25, 0.0 }
 0x2c0   :  { %v3787_v17 = vsel %vm3737_vm10, %v3786_v10, %v3785_v50  ;;  %v1661_v21 = vpop.f32.mrf.mxu1  ;;  %v2535_v0 = vpop.f32.mrf.mxu2  ;;  %3177 = vadd.xlane.f32.xlu1 %v3176_v61  ;;  %v894_v61 = vadd.f32 %v5511_v23, %v5370_v31 }
 0x2c1   :  { %v1027_v22 = vmax.f32 %v786_v59, 0.0  ;;  %v1662_v4 = vadd.f32 %v5602_v2, %v1661_v21  ;;  %v2536_v6 = vadd.f32 %v5321_v41, %v2535_v0  ;;  %4099 = vmatmul.msk.f32.gmra.mxu0 %vm170_vm0, %v121_v53  ;;  %v5627_v53 = vpop.f32.mrf.mxu3 }
 0x2c2   :  { %4246 = vmatmul.msk.f32.gmra.mxu3 %vm1090_vm2, %v1061_v1  ;;  %v123_v1 = vld [vmem:[%s6666_s0 + $0x2c8] sm:$0xff] }
 0x2c3   :  { %v1935_v62 = vmax.f32 %v1662_v4, 0.0  ;;  %v2843_v19 = vmax.f32 %v2536_v6, 0.0  ;;  %4212 = vmatmul.msk.f32.gmra.mxu1 %vm1090_vm2, %v1027_v22  ;;  %v3136_v5 = vpop.xlane.xlu2 %3135 }
 0x2c4   :  { %v3479_v27 = vadd.f32 %v5070_v43, %v3136_v5 }
 0x2c5   :  { %4325 = vmatmul.msk.f32.gmra.mxu2 %vm2015_vm4, %v1935_v62  ;;  %v2975_v50 = vmul.f32 %v5337_v52, %v2843_v19  ;;  %v1063_v19 = vmax.f32 %v894_v61, 0.0 }
 0x2c6   :  { %v3788_v28 = vperm.slane %v3479_v27, %v5254_v26  ;;  %v788_v29 = vpop.f32.mrf.mxu0 }
 0x2c7   :  { %v789_v32 = vadd.f32 %v5511_v23, %v788_v29  ;;  %v3179_v33 = vsel %vm1090_vm2, %v2975_v50, 0.0 }
 0x2c8   :  { %v3789_v13 = vsel %vm3741_vm11, %v3788_v28, %v3787_v17  ;;  %v1664_v54 = vpop.f32.mrf.mxu1  ;;  %v2538_v37 = vpop.f32.mrf.mxu2  ;;  %3180 = vadd.xlane.f32.xlu2 %v3179_v33 }
 0x2c9   :  { %v1028_v45 = vmax.f32 %v789_v32, 0.0  ;;  %v1665_v46 = vadd.f32 %v5602_v2, %v1664_v54  ;;  %v2539_v34 = vadd.f32 %v5321_v41, %v2538_v37  ;;  %4100 = vmatmul.msk.f32.gmra.mxu0 %vm170_vm0, %v122_v30  ;;  %v897_v32 = vadd.f32 %v5511_v23, %v5397_v9  ;;  %v5650_v33 = vpop.f32.mrf.mxu3 }
 0x2ca   :  { %4247 = vmatmul.msk.f32.gmra.mxu3 %vm1090_vm2, %v1062_v40  ;;  %v124_v40 = vld [vmem:[%s6666_s0 + $0x2d0] sm:$0xff] }
 0x2cb   :  { %v1936_v25 = vmax.f32 %v1665_v46, 0.0  ;;  %v2844_v10 = vmax.f32 %v2539_v34, 0.0  ;;  %4213 = vmatmul.msk.f32.gmra.mxu1 %vm1090_vm2, %v1028_v45  ;;  %v3139_v49 = vpop.xlane.xlu0 %3138 }
 0x2cc   :  { %v3480_v59 = vadd.f32 %v5070_v43, %v3139_v49 }
 0x2cd   :  { %4326 = vmatmul.msk.f32.gmra.mxu2 %vm2015_vm4, %v1936_v25  ;;  %v2976_v17 = vmul.f32 %v5337_v52, %v2844_v10  ;;  %v1064_v10 = vmax.f32 %v897_v32, 0.0 }
 0x2ce   :  { %v3790_v21 = vperm.slane %v3480_v59, %v5277_v51  ;;  %v791_v0 = vpop.f32.mrf.mxu0 }
 0x2cf   :  { %v792_v22 = vadd.f32 %v5511_v23, %v791_v0  ;;  %v3182_v4 = vsel %vm1090_vm2, %v2976_v17, 0.0 }
 0x2d0   :  { %v3791_v6 = vsel %vm3745_vm12, %v3790_v21, %v3789_v13  ;;  %v1667_v31 = vpop.f32.mrf.mxu1  ;;  %v2541_v62 = vpop.f32.mrf.mxu2  ;;  %3183 = vadd.xlane.f32.xlu0 %v3182_v4 }
 0x2d1   :  { %v1029_v5 = vmax.f32 %v792_v22, 0.0  ;;  %v1668_v27 = vadd.f32 %v5602_v2, %v1667_v31  ;;  %v2542_v55 = vadd.f32 %v5321_v41, %v2541_v62  ;;  %4101 = vmatmul.msk.f32.gmra.mxu0 %vm170_vm0, %v123_v1  ;;  %v900_v22 = vadd.f32 %v5511_v23, %v5424_v58  ;;  %v125_v62 = vld [vmem:[%s6666_s0 + $0x2d8] sm:$0xff] }
 0x2d2   :  { %4248 = vmatmul.msk.f32.gmra.mxu3 %vm1090_vm2, %v1063_v19 }
 0x2d3   :  { %v1937_v50 = vmax.f32 %v1668_v27, 0.0  ;;  %v2845_v28 = vmax.f32 %v2542_v55, 0.0  ;;  %4214 = vmatmul.msk.f32.gmra.mxu1 %vm1090_vm2, %v1029_v5  ;;  %v3142_v29 = vpop.xlane.xlu1 %3141  ;;  %v5676_v5 = vpop.f32.mrf.mxu3 }
 0x2d4   :  { %v3481_v30 = vadd.f32 %v5070_v43, %v3142_v29 }
 0x2d5   :  { %4327 = vmatmul.msk.f32.gmra.mxu2 %vm2015_vm4, %v1937_v50  ;;  %v2977_v13 = vmul.f32 %v5337_v52, %v2845_v28  ;;  %v1065_v28 = vmax.f32 %v900_v22, 0.0 }
 0x2d6   :  { %v3792_v54 = vperm.slane %v3481_v30, %v5298_v16  ;;  %v794_v37 = vpop.f32.mrf.mxu0 }
 0x2d7   :  { %v795_v45 = vadd.f32 %v5511_v23, %v794_v37  ;;  %v3185_v46 = vsel %vm1090_vm2, %v2977_v13, 0.0 }
 0x2d8   :  { %v3793_v9 = vsel %vm3749_vm13, %v3792_v54, %v3791_v6  ;;  %v1670_v34 = vpop.f32.mrf.mxu1  ;;  %v2544_v25 = vpop.f32.mrf.mxu2  ;;  %3186 = vadd.xlane.f32.xlu1 %v3185_v46 }
 0x2d9   :  { %v1030_v49 = vmax.f32 %v795_v45, 0.0  ;;  %v1671_v59 = vadd.f32 %v5602_v2, %v1670_v34  ;;  %v2545_v61 = vadd.f32 %v5321_v41, %v2544_v25  ;;  %4102 = vmatmul.msk.f32.gmra.mxu0 %vm170_vm0, %v124_v40  ;;  %v903_v45 = vadd.f32 %v5511_v23, %v5454_v36  ;;  %v126_v25 = vld [vmem:[%s6666_s0 + $0x2e0] sm:$0xff] }
 0x2da   :  { %4249 = vmatmul.msk.f32.gmra.mxu3 %vm1090_vm2, %v1064_v10 }
 0x2db   :  { %v1938_v17 = vmax.f32 %v1671_v59, 0.0  ;;  %v2846_v21 = vmax.f32 %v2545_v61, 0.0  ;;  %4215 = vmatmul.msk.f32.gmra.mxu1 %vm1090_vm2, %v1030_v49  ;;  %v3145_v0 = vpop.xlane.xlu2 %3144 }
 0x2dc   :  { %v3482_v1 = vadd.f32 %v5070_v43, %v3145_v0  ;;  %v5697_v0 = vpop.f32.mrf.mxu3 }
 0x2dd   :  { %4328 = vmatmul.msk.f32.gmra.mxu2 %vm2015_vm4, %v1938_v17  ;;  %v2978_v4 = vmul.f32 %v5337_v52, %v2846_v21  ;;  %v1066_v17 = vmax.f32 %v903_v45, 0.0 }
 0x2de   :  { %v3794_v6 = vperm.slane %v3482_v1, %v5326_v44  ;;  %v797_v31 = vpop.f32.mrf.mxu0 }
 0x2df   :  { %v798_v19 = vadd.f32 %v5511_v23, %v797_v31  ;;  %v3188_v27 = vsel %vm1090_vm2, %v2978_v4, 0.0 }
 0x2e0   :  { %v3795_v58 = vsel %vm3753_vm14, %v3794_v6, %v3793_v9  ;;  %v1673_v55 = vpop.f32.mrf.mxu1  ;;  %v2547_v50 = vpop.f32.mrf.mxu2  ;;  %3189 = vadd.xlane.f32.xlu2 %v3188_v27 }
 0x2e1   :  { %v1031_v29 = vmax.f32 %v798_v19, 0.0  ;;  %v1674_v30 = vadd.f32 %v5602_v2, %v1673_v55  ;;  %v2548_v32 = vadd.f32 %v5321_v41, %v2547_v50  ;;  %4103 = vmatmul.msk.f32.gmra.mxu0 %vm170_vm0, %v125_v62  ;;  %v906_v19 = vadd.f32 %v5511_v23, %v5480_v20  ;;  %v127_v50 = vld [vmem:[%s6666_s0 + $0x2e8] sm:$0xff] }
 0x2e2   :  { %4250 = vmatmul.msk.f32.gmra.mxu3 %vm1090_vm2, %v1065_v28 }
 0x2e3   :  { %v1939_v13 = vmax.f32 %v1674_v30, 0.0  ;;  %v2847_v54 = vmax.f32 %v2548_v32, 0.0  ;;  %4216 = vmatmul.msk.f32.gmra.mxu1 %vm1090_vm2, %v1031_v29  ;;  %v3148_v37 = vpop.xlane.xlu0 %3147 }
 0x2e4   :  { %v3483_v40 = vadd.f32 %v5070_v43, %v3148_v37  ;;  %v5719_v45 = vpop.f32.mrf.mxu3 }
 0x2e5   :  { %4329 = vmatmul.msk.f32.gmra.mxu2 %vm2015_vm4, %v1939_v13  ;;  %v2979_v46 = vmul.f32 %v5337_v52, %v2847_v54  ;;  %v1067_v13 = vmax.f32 %v906_v19, 0.0 }
 0x2e6   :  { %v3796_v9 = vperm.slane %v3483_v40, %v5354_v8  ;;  %v800_v34 = vpop.f32.mrf.mxu0 }
 0x2e7   :  { %v801_v10 = vadd.f32 %v5511_v23, %v800_v34  ;;  %v3191_v49 = vsel %vm1090_vm2, %v2979_v46, 0.0 }
 0x2e8   :  { %v3797_v59 = vsel %vm6678_vm15, %v3796_v9, %v3795_v58  ;;  %v1676_v36 = vpop.f32.mrf.mxu1  ;;  %v2550_v61 = vpop.f32.mrf.mxu2  ;;  %3192 = vadd.xlane.f32.xlu0 %v3191_v49 }
 0x2e9   :  { %v1032_v21 = vmax.f32 %v801_v10, 0.0  ;;  %v1677_v1 = vadd.f32 %v5602_v2, %v1676_v36  ;;  %v2551_v22 = vadd.f32 %v5321_v41, %v2550_v61  ;;  %4104 = vmatmul.msk.f32.gmra.mxu0 %vm170_vm0, %v126_v25  ;;  %v909_v10 = vadd.f32 %v5511_v23, %v5504_v11  ;;  %v128_v61 = vld [vmem:[%s6666_s0 + $0x2f0] sm:$0xff] }
 0x2ea   :  { %4251 = vmatmul.msk.f32.gmra.mxu3 %vm1090_vm2, %v1066_v17 }
 0x2eb   :  { %v1940_v4 = vmax.f32 %v1677_v1, 0.0  ;;  %v2848_v6 = vmax.f32 %v2551_v22, 0.0  ;;  %4217 = vmatmul.msk.f32.gmra.mxu1 %vm1090_vm2, %v1032_v21  ;;  %v3151_v31 = vpop.xlane.xlu1 %3150 }
 0x2ec   :  { %v3484_v62 = vadd.f32 %v5070_v43, %v3151_v31 }
 0x2ed   :  { %4330 = vmatmul.msk.f32.gmra.mxu2 %vm2015_vm4, %v1940_v4  ;;  %v2980_v27 = vmul.f32 %v5337_v52, %v2848_v6  ;;  %v1068_v4 = vmax.f32 %v909_v10, 0.0 }
 0x2ee   :  { %v3798_v58 = vperm.slane %v3484_v62, %v5377_v42  ;;  %v803_v55 = vpop.f32.mrf.mxu0 }
 0x2ef   :  { %v804_v28 = vadd.f32 %v5511_v23, %v803_v55  ;;  %v3194_v29 = vsel %vm1090_vm2, %v2980_v27, 0.0 }
 0x2f0   :  { %v3799_v30 = vsel %vm6677_vm1, %v3798_v58, %v3797_v59  ;;  %v1679_v20 = vpop.f32.mrf.mxu1  ;;  %v2553_v32 = vpop.f32.mrf.mxu2  ;;  %3195 = vadd.xlane.f32.xlu1 %v3194_v29  ;;  %vm6679_vm1 = vcmask 917312  }
 0x2f1   :  { %v1033_v54 = vmax.f32 %v804_v28, 0.0  ;;  %v1680_v37 = vadd.f32 %v5602_v2, %v1679_v20  ;;  %v2554_v40 = vadd.f32 %v5321_v41, %v2553_v32  ;;  %4105 = vmatmul.msk.f32.gmra.mxu0 %vm170_vm0, %v127_v50  ;;  %v912_v50 = vadd.f32 %v5511_v23, %v5529_v60  ;;  %v5742_v28 = vpop.f32.mrf.mxu3  ;;  %v129_v32 = vld [vmem:[%s6666_s0 + $0x2f8] sm:$0xff] }
 0x2f2   :  { %4252 = vmatmul.msk.f32.gmra.mxu3 %vm1090_vm2, %v1067_v13 }
 0x2f3   :  { %v1941_v46 = vmax.f32 %v1680_v37, 0.0  ;;  %v2849_v9 = vmax.f32 %v2554_v40, 0.0  ;;  %4218 = vmatmul.msk.f32.gmra.mxu1 %vm1090_vm2, %v1033_v54  ;;  %v3154_v34 = vpop.xlane.xlu2 %3153 }
 0x2f4   :  { %v3485_v25 = vadd.f32 %v5070_v43, %v3154_v34 }
 0x2f5   :  { %4331 = vmatmul.msk.f32.gmra.mxu2 %vm2015_vm4, %v1941_v46  ;;  %v2981_v49 = vmul.f32 %v5337_v52, %v2849_v9  ;;  %v1069_v46 = vmax.f32 %v912_v50, 0.0 }
 0x2f6   :  { %v3800_v59 = vperm.slane %v3485_v25, %v5400_v14  ;;  %v806_v36 = vpop.f32.mrf.mxu0 }
 0x2f7   :  { %v807_v17 = vadd.f32 %v5511_v23, %v806_v36  ;;  %v3197_v21 = vsel %vm1090_vm2, %v2981_v49, 0.0  ;;  %v915_v36 = vadd.f32 %v5511_v23, %v5553_v38 }
 0x2f8   :  { %v3801_v1 = vsel %vm6679_vm1, %v3800_v59, %v3799_v30  ;;  %v1682_v11 = vpop.f32.mrf.mxu1  ;;  %v2556_v22 = vpop.f32.mrf.mxu2  ;;  %3198 = vadd.xlane.f32.xlu2 %v3197_v21  ;;  %vm6680_vm1 = vcmask 982912  }
 0x2f9   :  { %v1034_v6 = vmax.f32 %v807_v17, 0.0  ;;  %v1683_v31 = vadd.f32 %v5602_v2, %v1682_v11  ;;  %v2557_v62 = vadd.f32 %v5321_v41, %v2556_v22  ;;  %4106 = vmatmul.msk.f32.gmra.mxu0 %vm170_vm0, %v128_v61 }
 0x2fa   :  { %4253 = vmatmul.msk.f32.gmra.mxu3 %vm1090_vm2, %v1068_v4  ;;  %v1070_v4 = vmax.f32 %v915_v36, 0.0 }
 0x2fb   :  { %v1942_v19 = vmax.f32 %v1683_v31, 0.0  ;;  %v2850_v27 = vmax.f32 %v2557_v62, 0.0  ;;  %4219 = vmatmul.msk.f32.gmra.mxu1 %vm1090_vm2, %v1034_v6  ;;  %v3157_v58 = vpop.xlane.xlu0 %3156 }
 0x2fc   :  { %v3486_v55 = vadd.f32 %v5070_v43, %v3157_v58 }
 0x2fd   :  { %4332 = vmatmul.msk.f32.gmra.mxu2 %vm2015_vm4, %v1942_v19  ;;  %v2982_v29 = vmul.f32 %v5337_v52, %v2850_v27  ;;  %v5777_v27 = vld [vmem:[%s6671_s6] ss:$0 sm:$0xff] }
 0x2fe   :  { %v3802_v30 = vperm.slane %v3486_v55, %v5421_v47  ;;  %v809_v20 = vpop.f32.mrf.mxu0 }
 0x2ff   :  { %v810_v13 = vadd.f32 %v5511_v23, %v809_v20  ;;  %v3200_v54 = vsel %vm1090_vm2, %v2982_v29, 0.0  ;;  %v918_v29 = vadd.f32 %v5511_v23, %v5579_v24 }
 0x300   :  { %v3803_v60 = vsel %vm6680_vm1, %v3802_v30, %v3801_v1  ;;  %v1685_v37 = vpop.f32.mrf.mxu1  ;;  %v2559_v40 = vpop.f32.mrf.mxu2  ;;  %3201 = vadd.xlane.f32.xlu0 %v3200_v54  ;;  %vm3992_vm1 = vcmask 1041409  }
 0x301   :  { %v1035_v9 = vmax.f32 %v810_v13, 0.0  ;;  %v1686_v34 = vadd.f32 %v5602_v2, %v1685_v37  ;;  %v2560_v25 = vadd.f32 %v5321_v41, %v2559_v40  ;;  %4107 = vmatmul.msk.f32.gmra.mxu0 %vm170_vm0, %v129_v32  ;;  %v5765_v1 = vpop.f32.mrf.mxu3  ;;  %v1071_v24 = vmax.f32 %v918_v29, 0.0 }
 0x302   :  { %4254 = vmatmul.msk.f32.gmra.mxu3 %vm1090_vm2, %v1069_v46  ;;  %vm6681_vm0 = vcmask 851712  }
 0x303   :  { %v1943_v10 = vmax.f32 %v1686_v34, 0.0  ;;  %v2851_v49 = vmax.f32 %v2560_v25, 0.0  ;;  %4220 = vmatmul.msk.f32.gmra.mxu1 %vm1090_vm2, %v1035_v9  ;;  %v3160_v59 = vpop.xlane.xlu1 %3159 }
 0x304   :  { %v3487_v61 = vadd.f32 %v5070_v43, %v3160_v59 }
 0x305   :  { %4333 = vmatmul.msk.f32.gmra.mxu2 %vm2015_vm4, %v1943_v10  ;;  %v2983_v17 = vmul.f32 %v5337_v52, %v2851_v49 }
 0x306   :  { %v3804_v41 = vperm.slane %v3487_v61, %v5446_v12  ;;  %v812_v21 = vpop.f32.mrf.mxu0  ;;  %v921_v61 = vadd.f32 %v5511_v23, %v5607_v7 }
 0x307   :  { %v813_v11 = vadd.f32 %v5511_v23, %v812_v21  ;;  %v3203_v22 = vsel %vm1090_vm2, %v2983_v17, 0.0 }
 0x308   :  { %v3805_v38 = vsel %vm3773_vm3, %v3804_v41, %v3803_v60  ;;  %v1688_v6 = vpop.f32.mrf.mxu1  ;;  %v2562_v31 = vpop.f32.mrf.mxu2  ;;  %3204 = vadd.xlane.f32.xlu1 %v3203_v22  ;;  %v1072_v7 = vmax.f32 %v921_v61, 0.0 }
 0x309   :  { %v5771_v52 = vsel %vm3992_vm1, %v3805_v38, %v5464_v48  ;;  %v1036_v62 = vmax.f32 %v813_v11, 0.0  ;;  %v1689_v19 = vadd.f32 %v5602_v2, %v1688_v6  ;;  %v2563_v58 = vadd.f32 %v5777_v27, %v2562_v31  ;;  %v5787_v48 = vld [vmem:[%s6672_s7] ss:$0 sm:$0xff]  ;;  %v5793_v40 = vpop.f32.mrf.mxu3 }
 0x30a   :  { %4255 = vmatmul.msk.f32.gmra.mxu3 %vm1090_vm2, %v1070_v4  ;;  %vm6682_vm1 = vcmask 917312  }
 0x30b   :  { %v1944_v55 = vmax.f32 %v1689_v19, 0.0  ;;  %v2852_v50 = vmax.f32 %v2563_v58, 0.0  ;;  %4221 = vmatmul.msk.f32.gmra.mxu1 %vm1090_vm2, %v1036_v62  ;;  %v3163_v32 = vpop.xlane.xlu2 %3162 }
 0x30c   :  { %v3488_v25 = vadd.f32 %v5070_v43, %v3163_v32  ;;  %v924_v32 = vadd.f32 %v5511_v23, %v5627_v53 }
 0x30d   :  { %4334 = vmatmul.msk.f32.gmra.mxu2 %vm2015_vm4, %v1944_v55  ;;  %v2984_v30 = vmul.f32 %v5787_v48, %v2852_v50 }
 0x30e   :  { %v815_v20 = vpop.f32.mrf.mxu0  ;;  %v3806_v41 = vperm.slane %v3488_v25, %v5101_v3  ;;  %v1073_v25 = vmax.f32 %v924_v32, 0.0 }
 0x30f   :  { %v816_v13 = vadd.f32 %v5511_v23, %v815_v20  ;;  %v3206_v54 = vsel %vm1090_vm2, %v2984_v30, 0.0 }
 0x310   :  { %v1691_v60 = vpop.f32.mrf.mxu1  ;;  %v2565_v37 = vpop.f32.mrf.mxu2  ;;  %3207 = vadd.xlane.f32.xlu2 %v3206_v54 }
 0x311   :  { %v1037_v46 = vmax.f32 %v816_v13, 0.0  ;;  %v1692_v9 = vadd.f32 %v5602_v2, %v1691_v60  ;;  %v2566_v34 = vadd.f32 %v5777_v27, %v2565_v37  ;;  %v5812_v55 = vpop.f32.mrf.mxu3 }
 0x312   :  { %4256 = vmatmul.msk.f32.gmra.mxu3 %vm1090_vm2, %v1071_v24 }
 0x313   :  { %v1945_v10 = vmax.f32 %v1692_v9, 0.0  ;;  %v2853_v49 = vmax.f32 %v2566_v34, 0.0  ;;  %4222 = vmatmul.msk.f32.gmra.mxu1 %vm1090_vm2, %v1037_v46  ;;  %v3166_v59 = vpop.xlane.xlu0 %3165 }
 0x314   :  { %v3489_v36 = vadd.f32 %v5070_v43, %v3166_v59 }
 0x315   :  { %4335 = vmatmul.msk.f32.gmra.mxu2 %vm2015_vm4, %v1945_v10  ;;  %v2985_v17 = vmul.f32 %v5787_v48, %v2853_v49 }
 0x316   :  { %v3807_v21 = vperm.slane %v3489_v36, %v5110_v15  ;;  %v818_v11 = vpop.f32.mrf.mxu0 }
 0x317   :  { %v819_v22 = vadd.f32 %v5511_v23, %v818_v11  ;;  %v3209_v4 = vsel %vm1090_vm2, %v2985_v17, 0.0 }
 0x318   :  { %v3808_v38 = vsel %vm3717_vm5, %v3807_v21, %v3806_v41  ;;  %v1694_v6 = vpop.f32.mrf.mxu1  ;;  %v2568_v31 = vpop.f32.mrf.mxu2  ;;  %3210 = vadd.xlane.f32.xlu0 %v3209_v4  ;;  %v927_v41 = vadd.f32 %v5511_v23, %v5650_v33 }
 0x319   :  { %v1038_v62 = vmax.f32 %v819_v22, 0.0  ;;  %v1695_v19 = vadd.f32 %v5602_v2, %v1694_v6  ;;  %v2569_v58 = vadd.f32 %v5777_v27, %v2568_v31  ;;  %v5831_v21 = vpop.f32.mrf.mxu3 }
 0x31a   :  { %4257 = vmatmul.msk.f32.gmra.mxu3 %vm1090_vm2, %v1072_v7  ;;  %v1074_v33 = vmax.f32 %v927_v41, 0.0 }
 0x31b   :  { %v1946_v50 = vmax.f32 %v1695_v19, 0.0  ;;  %v2854_v29 = vmax.f32 %v2569_v58, 0.0  ;;  %4223 = vmatmul.msk.f32.gmra.mxu1 %vm1090_vm2, %v1038_v62  ;;  %v3169_v30 = vpop.xlane.xlu1 %3168 }
 0x31c   :  { %v3490_v20 = vadd.f32 %v5070_v43, %v3169_v30 }
 0x31d   :  { %4336 = vmatmul.msk.f32.gmra.mxu2 %vm2015_vm4, %v1946_v50  ;;  %v2986_v13 = vmul.f32 %v5787_v48, %v2854_v29 }
 0x31e   :  { %v3809_v54 = vperm.slane %v3490_v20, %v5139_v35  ;;  %v821_v60 = vpop.f32.mrf.mxu0 }
 0x31f   :  { %v822_v37 = vadd.f32 %v5511_v23, %v821_v60  ;;  %v3212_v24 = vsel %vm1090_vm2, %v2986_v13, 0.0  ;;  %v930_v13 = vadd.f32 %v5511_v23, %v5676_v5 }
 0x320   :  { %v3810_v46 = vsel %vm3721_vm6, %v3809_v54, %v3808_v38  ;;  %v1697_v9 = vpop.f32.mrf.mxu1  ;;  %v2571_v34 = vpop.f32.mrf.mxu2  ;;  %3213 = vadd.xlane.f32.xlu1 %v3212_v24 }
 0x321   :  { %v1039_v53 = vmax.f32 %v822_v37, 0.0  ;;  %v1698_v10 = vadd.f32 %v5602_v2, %v1697_v9  ;;  %v2572_v49 = vadd.f32 %v5777_v27, %v2571_v34  ;;  %v5850_v24 = vpop.f32.mrf.mxu3  ;;  %v1075_v5 = vmax.f32 %v930_v13, 0.0 }
 0x322   :  { %4258 = vmatmul.msk.f32.gmra.mxu3 %vm1090_vm2, %v1073_v25 }
 0x323   :  { %v1947_v59 = vmax.f32 %v1698_v10, 0.0  ;;  %v2855_v36 = vmax.f32 %v2572_v49, 0.0  ;;  %4224 = vmatmul.msk.f32.gmra.mxu1 %vm1090_vm2, %v1039_v53  ;;  %v3172_v61 = vpop.xlane.xlu2 %3171 }
 0x324   :  { %v3491_v17 = vadd.f32 %v5070_v43, %v3172_v61 }
 0x325   :  { %4337 = vmatmul.msk.f32.gmra.mxu2 %vm2015_vm4, %v1947_v59  ;;  %v2987_v11 = vmul.f32 %v5787_v48, %v2855_v36 }
 0x326   :  { %v3811_v22 = vperm.slane %v3491_v17, %v5162_v56  ;;  %v824_v4 = vpop.f32.mrf.mxu0 }
 0x327   :  { %v825_v38 = vadd.f32 %v5511_v23, %v824_v4  ;;  %v3215_v6 = vsel %vm1090_vm2, %v2987_v11, 0.0  ;;  %v933_v11 = vadd.f32 %v5511_v23, %v5697_v0 }
 0x328   :  { %v3812_v31 = vsel %vm3725_vm7, %v3811_v22, %v3810_v46  ;;  %v1700_v7 = vpop.f32.mrf.mxu1  ;;  %v2574_v62 = vpop.f32.mrf.mxu2  ;;  %3216 = vadd.xlane.f32.xlu2 %v3215_v6 }
 0x329   :  { %v1040_v19 = vmax.f32 %v825_v38, 0.0  ;;  %v1701_v58 = vadd.f32 %v5602_v2, %v1700_v7  ;;  %v2575_v50 = vadd.f32 %v5777_v27, %v2574_v62  ;;  %v5868_v0 = vpop.f32.mrf.mxu3 }
 0x32a   :  { %4259 = vmatmul.msk.f32.gmra.mxu3 %vm1090_vm2, %v1074_v33 }
 0x32b   :  { %v1948_v29 = vmax.f32 %v1701_v58, 0.0  ;;  %v2856_v30 = vmax.f32 %v2575_v50, 0.0  ;;  %4225 = vmatmul.msk.f32.gmra.mxu1 %vm1090_vm2, %v1040_v19  ;;  %v3175_v20 = vpop.xlane.xlu0 %3174  ;;  %v1076_v19 = vmax.f32 %v933_v11, 0.0 }
 0x32c   :  { %v3492_v32 = vadd.f32 %v5070_v43, %v3175_v20 }
 0x32d   :  { %4338 = vmatmul.msk.f32.gmra.mxu2 %vm2015_vm4, %v1948_v29  ;;  %v2988_v54 = vmul.f32 %v5787_v48, %v2856_v30 }
 0x32e   :  { %v3813_v60 = vperm.slane %v3492_v32, %v5185_v18  ;;  %v827_v37 = vpop.f32.mrf.mxu0 }
 0x32f   :  { %v828_v46 = vadd.f32 %v5511_v23, %v827_v37  ;;  %v3218_v9 = vsel %vm1090_vm2, %v2988_v54, 0.0  ;;  %v936_v54 = vadd.f32 %v5511_v23, %v5719_v45 }
 0x330   :  { %v3814_v34 = vsel %vm3729_vm8, %v3813_v60, %v3812_v31  ;;  %v1703_v25 = vpop.f32.mrf.mxu1  ;;  %v2577_v53 = vpop.f32.mrf.mxu2  ;;  %3219 = vadd.xlane.f32.xlu0 %v3218_v9 }
 0x331   :  { %v1041_v10 = vmax.f32 %v828_v46, 0.0  ;;  %v1704_v49 = vadd.f32 %v5602_v2, %v1703_v25  ;;  %v2578_v59 = vadd.f32 %v5777_v27, %v2577_v53 }
 0x332   :  { %4260 = vmatmul.msk.f32.gmra.mxu3 %vm1090_vm2, %v1075_v5 }
 0x333   :  { %v1949_v36 = vmax.f32 %v1704_v49, 0.0  ;;  %v2857_v61 = vmax.f32 %v2578_v59, 0.0  ;;  %4226 = vmatmul.msk.f32.gmra.mxu1 %vm1090_vm2, %v1041_v10  ;;  %v3178_v17 = vpop.xlane.xlu1 %3177  ;;  %v1077_v10 = vmax.f32 %v936_v54, 0.0  ;;  %v942_v54 = vadd.f32 %v5511_v23, %v5765_v1 }
 0x334   :  { %v3493_v41 = vadd.f32 %v5070_v43, %v3178_v17 }
 0x335   :  { %4339 = vmatmul.msk.f32.gmra.mxu2 %vm2015_vm4, %v1949_v36  ;;  %v2989_v22 = vmul.f32 %v5787_v48, %v2857_v61  ;;  %v5885_v36 = vpop.f32.mrf.mxu3 }
 0x336   :  { %v3815_v4 = vperm.slane %v3493_v41, %v5208_v39  ;;  %v830_v38 = vpop.f32.mrf.mxu0 }
 0x337   :  { %v831_v6 = vadd.f32 %v5511_v23, %v830_v38  ;;  %v3221_v31 = vsel %vm1090_vm2, %v2989_v22, 0.0  ;;  %v939_v22 = vadd.f32 %v5511_v23, %v5742_v28 }
 0x338   :  { %v3816_v7 = vsel %vm3733_vm9, %v3815_v4, %v3814_v34  ;;  %v1706_v62 = vpop.f32.mrf.mxu1  ;;  %v2580_v33 = vpop.f32.mrf.mxu2  ;;  %3222 = vadd.xlane.f32.xlu1 %v3221_v31 }
 0x339   :  { %v1042_v58 = vmax.f32 %v831_v6, 0.0  ;;  %v1707_v50 = vadd.f32 %v5602_v2, %v1706_v62  ;;  %v2581_v29 = vadd.f32 %v5777_v27, %v2580_v33 }
 0x33a   :  { %4261 = vmatmul.msk.f32.gmra.mxu3 %vm1090_vm2, %v1076_v19 }
 0x33b   :  { %v1950_v30 = vmax.f32 %v1707_v50, 0.0  ;;  %v2858_v20 = vmax.f32 %v2581_v29, 0.0  ;;  %4227 = vmatmul.msk.f32.gmra.mxu1 %vm1090_vm2, %v1042_v58  ;;  %v3181_v32 = vpop.xlane.xlu2 %3180  ;;  %v1078_v58 = vmax.f32 %v939_v22, 0.0 }
 0x33c   :  { %v3494_v13 = vadd.f32 %v5070_v43, %v3181_v32 }
 0x33d   :  { %4340 = vmatmul.msk.f32.gmra.mxu2 %vm2015_vm4, %v1950_v30  ;;  %v2990_v60 = vmul.f32 %v5787_v48, %v2858_v20 }
 0x33e   :  { %v3817_v37 = vperm.slane %v3494_v13, %v5231_v63  ;;  %v833_v46 = vpop.f32.mrf.mxu0 }
 0x33f   :  { %v834_v9 = vadd.f32 %v5511_v23, %v833_v46  ;;  %v3224_v34 = vsel %vm1090_vm2, %v2990_v60, 0.0  ;;  %v5904_v60 = vpop.f32.mrf.mxu3 }
 0x340   :  { %v3818_v25 = vsel %vm3737_vm10, %v3817_v37, %v3816_v7  ;;  %v1709_v53 = vpop.f32.mrf.mxu1  ;;  %v2583_v5 = vpop.f32.mrf.mxu2  ;;  %3225 = vadd.xlane.f32.xlu2 %v3224_v34  ;;  %v5913_v34 = vld [vmem:[%s6667_s2] ss:$0 sm:$0xff] }
 0x341   :  { %v1043_v45 = vmax.f32 %v834_v9, 0.0  ;;  %v1710_v49 = vadd.f32 %v5602_v2, %v1709_v53  ;;  %v2584_v59 = vadd.f32 %v5777_v27, %v2583_v5  ;;  %v945_v22 = vadd.f32 %v5913_v34, %v5793_v40 }
 0x342   :  { %4262 = vmatmul.msk.f32.gmra.mxu3 %vm1090_vm2, %v1077_v10  ;;  %v1079_v10 = vmax.f32 %v942_v54, 0.0  ;;  %v948_v54 = vadd.f32 %v5913_v34, %v5812_v55 }
 0x343   :  { %v1951_v61 = vmax.f32 %v1710_v49, 0.0  ;;  %v2859_v17 = vmax.f32 %v2584_v59, 0.0  ;;  %4228 = vmatmul.msk.f32.gmra.mxu1 %vm1090_vm2, %v1043_v45  ;;  %v3184_v41 = vpop.xlane.xlu0 %3183  ;;  %v1080_v40 = vmax.f32 %v945_v22, 0.0  ;;  %v951_v22 = vadd.f32 %v5913_v34, %v5831_v21 }
 0x344   :  { %v3495_v11 = vadd.f32 %v5070_v43, %v3184_v41 }
 0x345   :  { %4341 = vmatmul.msk.f32.gmra.mxu2 %vm2015_vm4, %v1951_v61  ;;  %v2991_v4 = vmul.f32 %v5787_v48, %v2859_v17 }
 0x346   :  { %v3819_v38 = vperm.slane %v3495_v11, %v5254_v26  ;;  %v836_v6 = vpop.f32.mrf.mxu0 }
 0x347   :  { %v837_v31 = vadd.f32 %v5511_v23, %v836_v6  ;;  %v3227_v7 = vsel %vm1090_vm2, %v2991_v4, 0.0 }
 0x348   :  { %v3820_v62 = vsel %vm3741_vm11, %v3819_v38, %v3818_v25  ;;  %v1712_v33 = vpop.f32.mrf.mxu1  ;;  %v2586_v19 = vpop.f32.mrf.mxu2  ;;  %3228 = vadd.xlane.f32.xlu0 %v3227_v7 }
 0x349   :  { %v1044_v28 = vmax.f32 %v837_v31, 0.0  ;;  %v1713_v50 = vadd.f32 %v5602_v2, %v1712_v33  ;;  %v2587_v29 = vadd.f32 %v5777_v27, %v2586_v19  ;;  %v5928_v31 = vpop.f32.mrf.mxu3 }
 0x34a   :  { %4263 = vmatmul.msk.f32.gmra.mxu3 %vm1090_vm2, %v1078_v58 }
 0x34b   :  { %v1952_v30 = vmax.f32 %v1713_v50, 0.0  ;;  %v2860_v20 = vmax.f32 %v2587_v29, 0.0  ;;  %4229 = vmatmul.msk.f32.gmra.mxu1 %vm1090_vm2, %v1044_v28  ;;  %v3187_v32 = vpop.xlane.xlu1 %3186 }
 0x34c   :  { %v3496_v13 = vadd.f32 %v5070_v43, %v3187_v32 }
 0x34d   :  { %4342 = vmatmul.msk.f32.gmra.mxu2 %vm2015_vm4, %v1952_v30  ;;  %v2992_v37 = vmul.f32 %v5787_v48, %v2860_v20 }
 0x34e   :  { %v3821_v46 = vperm.slane %v3496_v13, %v5277_v51  ;;  %v839_v9 = vpop.f32.mrf.mxu0 }
 0x34f   :  { %v840_v25 = vadd.f32 %v5913_v34, %v839_v9  ;;  %v3230_v23 = vsel %vm1090_vm2, %v2992_v37, 0.0 }
 0x350   :  { %v3822_v1 = vsel %vm3745_vm12, %v3821_v46, %v3820_v62  ;;  %v1715_v53 = vpop.f32.mrf.mxu1  ;;  %v2589_v5 = vpop.f32.mrf.mxu2  ;;  %3231 = vadd.xlane.f32.xlu1 %v3230_v23 }
 0x351   :  { %v1045_v45 = vmax.f32 %v840_v25, 0.0  ;;  %v1716_v49 = vadd.f32 %v5602_v2, %v1715_v53  ;;  %v2590_v59 = vadd.f32 %v5777_v27, %v2589_v5  ;;  %v5946_v55 = vpop.f32.mrf.mxu3 }
 0x352   :  { %4264 = vmatmul.msk.f32.gmra.mxu3 %vm1090_vm2, %v1079_v10  ;;  %v1081_v10 = vmax.f32 %v948_v54, 0.0  ;;  %v954_v54 = vadd.f32 %v5913_v34, %v5850_v24 }
 0x353   :  { %v1953_v61 = vmax.f32 %v1716_v49, 0.0  ;;  %v2861_v17 = vmax.f32 %v2590_v59, 0.0  ;;  %4230 = vmatmul.msk.f32.gmra.mxu1 %vm1090_vm2, %v1045_v45  ;;  %v3190_v41 = vpop.xlane.xlu2 %3189 }
 0x354   :  { %v3497_v11 = vadd.f32 %v5070_v43, %v3190_v41 }
 0x355   :  { %4343 = vmatmul.msk.f32.gmra.mxu2 %vm2015_vm4, %v1953_v61  ;;  %v2993_v4 = vmul.f32 %v5787_v48, %v2861_v17 }
 0x356   :  { %v3823_v38 = vperm.slane %v3497_v11, %v5298_v16  ;;  %v842_v6 = vpop.f32.mrf.mxu0 }
 0x357   :  { %v843_v7 = vadd.f32 %v5913_v34, %v842_v6  ;;  %v3233_v62 = vsel %vm1090_vm2, %v2993_v4, 0.0 }
 0x358   :  { %v3824_v33 = vsel %vm3749_vm13, %v3823_v38, %v3822_v1  ;;  %v1718_v19 = vpop.f32.mrf.mxu1  ;;  %v2592_v58 = vpop.f32.mrf.mxu2  ;;  %3234 = vadd.xlane.f32.xlu2 %v3233_v62 }
 0x359   :  { %v1046_v28 = vmax.f32 %v843_v7, 0.0  ;;  %v1719_v50 = vadd.f32 %v5602_v2, %v1718_v19  ;;  %v2593_v29 = vadd.f32 %v5777_v27, %v2592_v58 }
 0x35a   :  { %4265 = vmatmul.msk.f32.gmra.mxu3 %vm1090_vm2, %v1080_v40  ;;  %v1082_v40 = vmax.f32 %v951_v22, 0.0 }
 0x35b   :  { %v1954_v30 = vmax.f32 %v1719_v50, 0.0  ;;  %v2862_v20 = vmax.f32 %v2593_v29, 0.0  ;;  %4231 = vmatmul.msk.f32.gmra.mxu1 %vm1090_vm2, %v1046_v28  ;;  %v3193_v32 = vpop.xlane.xlu0 %3192  ;;  %v5963_v29 = vpop.f32.mrf.mxu3 }
 0x35c   :  { %v3498_v13 = vadd.f32 %v5070_v43, %v3193_v32 }
 0x35d   :  { %4344 = vmatmul.msk.f32.gmra.mxu2 %vm2015_vm4, %v1954_v30  ;;  %v2994_v37 = vmul.f32 %v5787_v48, %v2862_v20 }
 0x35e   :  { %v3825_v46 = vperm.slane %v3498_v13, %v5326_v44  ;;  %v845_v9 = vpop.f32.mrf.mxu0 }
 0x35f   :  { %v846_v25 = vadd.f32 %v5913_v34, %v845_v9  ;;  %v3236_v23 = vsel %vm1090_vm2, %v2994_v37, 0.0 }
 0x360   :  { %v3826_v1 = vsel %vm3753_vm14, %v3825_v46, %v3824_v33  ;;  %v1721_v53 = vpop.f32.mrf.mxu1  ;;  %v2595_v5 = vpop.f32.mrf.mxu2  ;;  %3237 = vadd.xlane.f32.xlu0 %v3236_v23 }
 0x361   :  { %v1047_v45 = vmax.f32 %v846_v25, 0.0  ;;  %v1722_v49 = vadd.f32 %v5602_v2, %v1721_v53  ;;  %v2596_v59 = vadd.f32 %v5777_v27, %v2595_v5 }
 0x362   :  { %4266 = vmatmul.msk.f32.gmra.mxu3 %vm1090_vm2, %v1081_v10  ;;  %v1083_v10 = vmax.f32 %v954_v54, 0.0 }
 0x363   :  { %v1955_v61 = vmax.f32 %v1722_v49, 0.0  ;;  %v2863_v17 = vmax.f32 %v2596_v59, 0.0  ;;  %4232 = vmatmul.msk.f32.gmra.mxu1 %vm1090_vm2, %v1047_v45  ;;  %v3196_v41 = vpop.xlane.xlu1 %3195 }
 0x364   :  { %v3499_v11 = vadd.f32 %v5070_v43, %v3196_v41 }
 0x365   :  { %4345 = vmatmul.msk.f32.gmra.mxu2 %vm2015_vm4, %v1955_v61  ;;  %v2995_v4 = vmul.f32 %v5787_v48, %v2863_v17 }
 0x366   :  { %v3827_v38 = vperm.slane %v3499_v11, %v5354_v8  ;;  %v848_v6 = vpop.f32.mrf.mxu0  ;;  %v5980_v11 = vpop.f32.mrf.mxu3 }
 0x367   :  { %v849_v7 = vadd.f32 %v5913_v34, %v848_v6  ;;  %v3239_v62 = vsel %vm1090_vm2, %v2995_v4, 0.0 }
 0x368   :  { %v3828_v33 = vsel %vm6678_vm15, %v3827_v38, %v3826_v1  ;;  %v1724_v19 = vpop.f32.mrf.mxu1  ;;  %v2598_v58 = vpop.f32.mrf.mxu2  ;;  %3240 = vadd.xlane.f32.xlu1 %v3239_v62 }
 0x369   :  { %v1048_v21 = vmax.f32 %v849_v7, 0.0  ;;  %v1725_v28 = vadd.f32 %v5602_v2, %v1724_v19  ;;  %v2599_v50 = vadd.f32 %v5777_v27, %v2598_v58  ;;  %v5992_v58 = vld [vmem:[%s6669_s4] ss:$0 sm:$0xff] }
 0x36a   :  { %4267 = vmatmul.msk.f32.gmra.mxu3 %vm1090_vm2, %v1082_v40 }
 0x36b   :  { %v1956_v30 = vmax.f32 %v1725_v28, 0.0  ;;  %v2864_v20 = vmax.f32 %v2599_v50, 0.0  ;;  %4233 = vmatmul.msk.f32.gmra.mxu1 %vm1090_vm2, %v1048_v21  ;;  %v3199_v32 = vpop.xlane.xlu2 %3198 }
 0x36c   :  { %v3500_v13 = vadd.f32 %v5070_v43, %v3199_v32 }
 0x36d   :  { %4346 = vmatmul.msk.f32.gmra.mxu2 %vm2015_vm4, %v1956_v30  ;;  %v2996_v37 = vmul.f32 %v5787_v48, %v2864_v20 }
 0x36e   :  { %v3829_v46 = vperm.slane %v3500_v13, %v5377_v42  ;;  %v851_v9 = vpop.f32.mrf.mxu0 }
 0x36f   :  { %v852_v25 = vadd.f32 %v5913_v34, %v851_v9  ;;  %v3242_v23 = vsel %vm1090_vm2, %v2996_v37, 0.0 }
 0x370   :  { %v3830_v1 = vsel %vm6681_vm0, %v3829_v46, %v3828_v33  ;;  %v1727_v53 = vpop.f32.mrf.mxu1  ;;  %v2601_v5 = vpop.f32.mrf.mxu2  ;;  %3243 = vadd.xlane.f32.xlu2 %v3242_v23  ;;  %vm6683_vm0 = vcmask 982912  }
 0x371   :  { %v1049_v24 = vmax.f32 %v852_v25, 0.0  ;;  %v1728_v45 = vadd.f32 %v5602_v2, %v1727_v53  ;;  %v2602_v49 = vadd.f32 %v5777_v27, %v2601_v5 }
 0x372   :  { %4268 = vmatmul.msk.f32.gmra.mxu3 %vm1090_vm2, %v1083_v10 }
 0x373   :  { %v1957_v59 = vmax.f32 %v1728_v45, 0.0  ;;  %v2865_v61 = vmax.f32 %v2602_v49, 0.0  ;;  %4234 = vmatmul.msk.f32.gmra.mxu1 %vm1090_vm2, %v1049_v24  ;;  %v3202_v17 = vpop.xlane.xlu0 %3201 }
 0x374   :  { %v3501_v41 = vadd.f32 %v5070_v43, %v3202_v17 }
 0x375   :  { %4347 = vmatmul.msk.f32.gmra.mxu2 %vm2015_vm4, %v1957_v59  ;;  %v2997_v22 = vmul.f32 %v5787_v48, %v2865_v61  ;;  %v861_v59 = vadd.f32 %v5913_v34, %v5087_v57 }
 0x376   :  { %v3831_v4 = vperm.slane %v3501_v41, %v5400_v14  ;;  %v854_v2 = vpop.f32.mrf.mxu0 }
 0x377   :  { %v855_v38 = vadd.f32 %v5913_v34, %v854_v2  ;;  %v3245_v6 = vsel %vm1090_vm2, %v2997_v22, 0.0 }
 0x378   :  { %v3832_v7 = vsel %vm6682_vm1, %v3831_v4, %v3830_v1  ;;  %v1730_v62 = vpop.f32.mrf.mxu1  ;;  %v2604_v33 = vpop.f32.mrf.mxu2  ;;  %3246 = vadd.xlane.f32.xlu0 %v3245_v6  ;;  %vm3994_vm1 = vcmask 1042434  }
 0x379   :  { %v1050_v19 = vmax.f32 %v855_v38, 0.0  ;;  %v1731_v40 = vadd.f32 %v5992_v58, %v1730_v62  ;;  %v2605_v21 = vadd.f32 %v5777_v27, %v2604_v33  ;;  %v1052_v38 = vmax.f32 %v861_v59, 0.0 }
 0x37b   :  { %v1958_v28 = vmax.f32 %v1731_v40, 0.0  ;;  %v2866_v50 = vmax.f32 %v2605_v21, 0.0  ;;  %4235 = vmatmul.msk.f32.gmra.mxu1 %vm1090_vm2, %v1050_v19  ;;  %v3205_v30 = vpop.xlane.xlu1 %3204 }
 0x37c   :  { %v3502_v20 = vadd.f32 %v5070_v43, %v3205_v30 }
 0x37d   :  { %4348 = vmatmul.msk.f32.gmra.mxu2 %vm2015_vm4, %v1958_v28  ;;  %v2998_v32 = vmul.f32 %v5787_v48, %v2866_v50 }
 0x37e   :  { %v3833_v13 = vperm.slane %v3502_v20, %v5421_v47  ;;  %v857_v54 = vpop.f32.mrf.mxu0 }
 0x37f   :  { %v858_v37 = vadd.f32 %v5913_v34, %v857_v54  ;;  %v3248_v46 = vsel %vm1090_vm2, %v2998_v32, 0.0 }
 0x380   :  { %v3834_v9 = vsel %vm6683_vm0, %v3833_v13, %v3832_v7  ;;  %v1733_v25 = vpop.f32.mrf.mxu1  ;;  %v2607_v23 = vpop.f32.mrf.mxu2  ;;  %3249 = vadd.xlane.f32.xlu1 %v3248_v46  ;;  %vm6684_vm0 = vcmask 851712  }
 0x381   :  { %v1051_v1 = vmax.f32 %v858_v37, 0.0  ;;  %v1734_v53 = vadd.f32 %v5992_v58, %v1733_v25  ;;  %v2608_v5 = vadd.f32 %v5777_v27, %v2607_v23 }
 0x383   :  { %v1959_v10 = vmax.f32 %v1734_v53, 0.0  ;;  %v2867_v24 = vmax.f32 %v2608_v5, 0.0  ;;  %4236 = vmatmul.msk.f32.gmra.mxu1 %vm1090_vm2, %v1051_v1  ;;  %v3208_v45 = vpop.xlane.xlu2 %3207 }
 0x384   :  { %v3503_v49 = vadd.f32 %v5070_v43, %v3208_v45 }
 0x385   :  { %4349 = vmatmul.msk.f32.gmra.mxu2 %vm2015_vm4, %v1959_v10  ;;  %v2999_v61 = vmul.f32 %v5787_v48, %v2867_v24 }
 0x386   :  { %v3835_v17 = vperm.slane %v3503_v49, %v5446_v12 }
 0x387   :  { %v3251_v41 = vsel %vm1090_vm2, %v2999_v61, 0.0 }
 0x388   :  { %v3836_v22 = vsel %vm3773_vm3, %v3835_v17, %v3834_v9  ;;  %v1736_v4 = vpop.f32.mrf.mxu1  ;;  %v2610_v2 = vpop.f32.mrf.mxu2  ;;  %3252 = vadd.xlane.f32.xlu2 %v3251_v41 }
 0x389   :  { %v6016_v6 = vsel %vm3994_vm1, %v3836_v22, %v5771_v52  ;;  %v1737_v57 = vadd.f32 %v5992_v58, %v1736_v4  ;;  %v2611_v34 = vadd.f32 %v5777_v27, %v2610_v2  ;;  %vm6685_vm1 = vcmask 917312  }
 0x38b   :  { %v1960_v7 = vmax.f32 %v1737_v57, 0.0  ;;  %v2868_v62 = vmax.f32 %v2611_v34, 0.0  ;;  %4237 = vmatmul.msk.f32.gmra.mxu1 %vm1090_vm2, %v1052_v38  ;;  %v3211_v19 = vpop.xlane.xlu0 %3210  ;;  %v6042_v38 = vpop.f32.mrf.mxu3 }
 0x38c   :  { %v3504_v30 = vadd.f32 %v5070_v43, %v3211_v19 }
 0x38d   :  { %4350 = vmatmul.msk.f32.gmra.mxu2 %vm2015_vm4, %v1960_v7  ;;  %v3000_v33 = vmul.f32 %v5787_v48, %v2868_v62 }
 0x38e   :  { %v3837_v46 = vperm.slane %v3504_v30, %v5101_v3 }
 0x38f   :  { %v3254_v40 = vsel %vm1090_vm2, %v3000_v33, 0.0 }
 0x390   :  { %v1739_v21 = vpop.f32.mrf.mxu1  ;;  %v2613_v28 = vpop.f32.mrf.mxu2  ;;  %3255 = vadd.xlane.f32.xlu0 %v3254_v40 }
 0x391   :  { %v1740_v52 = vadd.f32 %v5992_v58, %v1739_v21  ;;  %v2614_v50 = vadd.f32 %v5777_v27, %v2613_v28 }
 0x393   :  { %v1961_v20 = vmax.f32 %v1740_v52, 0.0  ;;  %v2869_v32 = vmax.f32 %v2614_v50, 0.0  ;;  %v3214_v13 = vpop.xlane.xlu1 %3213 }
 0x394   :  { %v3505_v54 = vadd.f32 %v5070_v43, %v3214_v13  ;;  %v6054_v13 = vpop.f32.mrf.mxu3 }
 0x395   :  { %4351 = vmatmul.msk.f32.gmra.mxu2 %vm2015_vm4, %v1961_v20  ;;  %v3001_v37 = vmul.f32 %v5787_v48, %v2869_v32 }
 0x396   :  { %v3838_v9 = vperm.slane %v3505_v54, %v5110_v15 }
 0x397   :  { %v3257_v25 = vsel %vm1090_vm2, %v3001_v37, 0.0 }
 0x398   :  { %v3839_v23 = vsel %vm3717_vm5, %v3838_v9, %v3837_v46  ;;  %v1742_v1 = vpop.f32.mrf.mxu1  ;;  %v2616_v53 = vpop.f32.mrf.mxu2  ;;  %3258 = vadd.xlane.f32.xlu1 %v3257_v25 }
 0x399   :  { %v1743_v5 = vadd.f32 %v5992_v58, %v1742_v1  ;;  %v2617_v10 = vadd.f32 %v5777_v27, %v2616_v53 }
 0x39b   :  { %v1962_v24 = vmax.f32 %v1743_v5, 0.0  ;;  %v2870_v45 = vmax.f32 %v2617_v10, 0.0  ;;  %v3217_v49 = vpop.xlane.xlu2 %3216 }
 0x39c   :  { %v3506_v59 = vadd.f32 %v5070_v43, %v3217_v49 }
 0x39d   :  { %4352 = vmatmul.msk.f32.gmra.mxu2 %vm2015_vm4, %v1962_v24  ;;  %v3002_v61 = vmul.f32 %v5787_v48, %v2870_v45 }
 0x39e   :  { %v3840_v17 = vperm.slane %v3506_v59, %v5139_v35 }
 0x39f   :  { %v3260_v41 = vsel %vm1090_vm2, %v3002_v61, 0.0 }
 0x3a0   :  { %v3841_v22 = vsel %vm3721_vm6, %v3840_v17, %v3839_v23  ;;  %v1745_v4 = vpop.f32.mrf.mxu1  ;;  %v2619_v2 = vpop.f32.mrf.mxu2  ;;  %3261 = vadd.xlane.f32.xlu2 %v3260_v41 }
 0x3a1   :  { %v1746_v57 = vadd.f32 %v5992_v58, %v1745_v4  ;;  %v2620_v34 = vadd.f32 %v5777_v27, %v2619_v2  ;;  %v6065_v41 = vpop.f32.mrf.mxu3 }
 0x3a3   :  { %v1963_v7 = vmax.f32 %v1746_v57, 0.0  ;;  %v2871_v62 = vmax.f32 %v2620_v34, 0.0  ;;  %v3220_v33 = vpop.xlane.xlu0 %3219 }
 0x3a4   :  { %v3507_v19 = vadd.f32 %v5070_v43, %v3220_v33 }
 0x3a5   :  { %4353 = vmatmul.msk.f32.gmra.mxu2 %vm2015_vm4, %v1963_v7  ;;  %v3003_v40 = vmul.f32 %v5787_v48, %v2871_v62 }
 0x3a6   :  { %v3842_v21 = vperm.slane %v3507_v19, %v5162_v56 }
 0x3a7   :  { %v3263_v28 = vsel %vm1090_vm2, %v3003_v40, 0.0 }
 0x3a8   :  { %v3843_v52 = vsel %vm3725_vm7, %v3842_v21, %v3841_v22  ;;  %v1748_v50 = vpop.f32.mrf.mxu1  ;;  %v2622_v30 = vpop.f32.mrf.mxu2  ;;  %3264 = vadd.xlane.f32.xlu0 %v3263_v28 }
 0x3a9   :  { %v1749_v20 = vadd.f32 %v5992_v58, %v1748_v50  ;;  %v2623_v32 = vadd.f32 %v5777_v27, %v2622_v30  ;;  %v6078_v30 = vpop.f32.mrf.mxu3 }
 0x3ab   :  { %v1964_v54 = vmax.f32 %v1749_v20, 0.0  ;;  %v2872_v37 = vmax.f32 %v2623_v32, 0.0  ;;  %v3223_v46 = vpop.xlane.xlu1 %3222 }
 0x3ac   :  { %v3508_v9 = vadd.f32 %v5070_v43, %v3223_v46 }
 0x3ad   :  { %4354 = vmatmul.msk.f32.gmra.mxu2 %vm2015_vm4, %v1964_v54  ;;  %v3004_v25 = vmul.f32 %v5787_v48, %v2872_v37 }
 0x3ae   :  { %v3844_v23 = vperm.slane %v3508_v9, %v5185_v18 }
 0x3af   :  { %v3266_v1 = vsel %vm1090_vm2, %v3004_v25, 0.0 }
 0x3b0   :  { %v3845_v53 = vsel %vm3729_vm8, %v3844_v23, %v3843_v52  ;;  %v1751_v5 = vpop.f32.mrf.mxu1  ;;  %v2625_v10 = vpop.f32.mrf.mxu2  ;;  %3267 = vadd.xlane.f32.xlu1 %v3266_v1 }
 0x3b1   :  { %v1752_v24 = vadd.f32 %v5992_v58, %v1751_v5  ;;  %v2626_v45 = vadd.f32 %v5777_v27, %v2625_v10 }
 0x3b3   :  { %v1965_v49 = vmax.f32 %v1752_v24, 0.0  ;;  %v2873_v59 = vmax.f32 %v2626_v45, 0.0  ;;  %v3226_v61 = vpop.xlane.xlu2 %3225 }
 0x3b4   :  { %v3509_v17 = vadd.f32 %v5070_v43, %v3226_v61  ;;  %v6090_v61 = vpop.f32.mrf.mxu3 }
 0x3b5   :  { %4355 = vmatmul.msk.f32.gmra.mxu2 %vm2015_vm4, %v1965_v49  ;;  %v3005_v22 = vmul.f32 %v5787_v48, %v2873_v59 }
 0x3b6   :  { %v3846_v4 = vperm.slane %v3509_v17, %v5208_v39 }
 0x3b7   :  { %v3269_v2 = vsel %vm1090_vm2, %v3005_v22, 0.0 }
 0x3b8   :  { %v3847_v57 = vsel %vm3733_vm9, %v3846_v4, %v3845_v53  ;;  %v1754_v34 = vpop.f32.mrf.mxu1  ;;  %v2628_v7 = vpop.f32.mrf.mxu2  ;;  %3270 = vadd.xlane.f32.xlu2 %v3269_v2 }
 0x3b9   :  { %v1755_v62 = vadd.f32 %v5992_v58, %v1754_v34  ;;  %v2629_v33 = vadd.f32 %v5777_v27, %v2628_v7 }
 0x3bb   :  { %v1966_v19 = vmax.f32 %v1755_v62, 0.0  ;;  %v2874_v40 = vmax.f32 %v2629_v33, 0.0  ;;  %v3229_v21 = vpop.xlane.xlu0 %3228 }
 0x3bc   :  { %v3510_v28 = vadd.f32 %v5070_v43, %v3229_v21 }
 0x3bd   :  { %4356 = vmatmul.msk.f32.gmra.mxu2 %vm2015_vm4, %v1966_v19  ;;  %v3006_v52 = vmul.f32 %v5787_v48, %v2874_v40 }
 0x3be   :  { %v3848_v50 = vperm.slane %v3510_v28, %v5231_v63 }
 0x3bf   :  { %v3272_v20 = vsel %vm1090_vm2, %v3006_v52, 0.0 }
 0x3c0   :  { %v3849_v32 = vsel %vm3737_vm10, %v3848_v50, %v3847_v57  ;;  %v1757_v54 = vpop.f32.mrf.mxu1  ;;  %v2631_v37 = vpop.f32.mrf.mxu2  ;;  %3273 = vadd.xlane.f32.xlu0 %v3272_v20 }
 0x3c1   :  { %v1758_v46 = vadd.f32 %v5992_v58, %v1757_v54  ;;  %v2632_v9 = vadd.f32 %v5777_v27, %v2631_v37  ;;  %v6102_v50 = vpop.f32.mrf.mxu3 }
 0x3c3   :  { %v1967_v25 = vmax.f32 %v1758_v46, 0.0  ;;  %v2875_v23 = vmax.f32 %v2632_v9, 0.0  ;;  %v3232_v1 = vpop.xlane.xlu1 %3231 }
 0x3c4   :  { %v3511_v53 = vadd.f32 %v5070_v43, %v3232_v1 }
 0x3c5   :  { %4357 = vmatmul.msk.f32.gmra.mxu2 %vm2015_vm4, %v1967_v25  ;;  %v3007_v5 = vmul.f32 %v5787_v48, %v2875_v23 }
 0x3c6   :  { %v3850_v10 = vperm.slane %v3511_v53, %v5254_v26 }
 0x3c7   :  { %v3275_v24 = vsel %vm1090_vm2, %v3007_v5, 0.0 }
 0x3c8   :  { %v3851_v45 = vsel %vm3741_vm11, %v3850_v10, %v3849_v32  ;;  %v1760_v49 = vpop.f32.mrf.mxu1  ;;  %v2634_v59 = vpop.f32.mrf.mxu2  ;;  %3276 = vadd.xlane.f32.xlu1 %v3275_v24 }
 0x3c9   :  { %v1761_v17 = vadd.f32 %v5992_v58, %v1760_v49  ;;  %v2635_v22 = vadd.f32 %v5777_v27, %v2634_v59 }
 0x3cb   :  { %v1968_v4 = vmax.f32 %v1761_v17, 0.0  ;;  %v2876_v2 = vmax.f32 %v2635_v22, 0.0  ;;  %v3235_v57 = vpop.xlane.xlu2 %3234  ;;  %v6113_v17 = vpop.f32.mrf.mxu3 }
 0x3cc   :  { %v3512_v34 = vadd.f32 %v5070_v43, %v3235_v57 }
 0x3cd   :  { %4358 = vmatmul.msk.f32.gmra.mxu2 %vm2015_vm4, %v1968_v4  ;;  %v3008_v7 = vmul.f32 %v5787_v48, %v2876_v2 }
 0x3ce   :  { %v3852_v62 = vperm.slane %v3512_v34, %v5277_v51 }
 0x3cf   :  { %v3278_v33 = vsel %vm1090_vm2, %v3008_v7, 0.0 }
 0x3d0   :  { %v3853_v19 = vsel %vm3745_vm12, %v3852_v62, %v3851_v45  ;;  %v1763_v40 = vpop.f32.mrf.mxu1  ;;  %v2637_v21 = vpop.f32.mrf.mxu2  ;;  %3279 = vadd.xlane.f32.xlu2 %v3278_v33 }
 0x3d1   :  { %v1764_v28 = vadd.f32 %v5992_v58, %v1763_v40  ;;  %v2638_v52 = vadd.f32 %v5777_v27, %v2637_v21 }
 0x3d3   :  { %v1969_v20 = vmax.f32 %v1764_v28, 0.0  ;;  %v2877_v32 = vmax.f32 %v2638_v52, 0.0  ;;  %v3238_v54 = vpop.xlane.xlu0 %3237 }
 0x3d4   :  { %v3513_v37 = vadd.f32 %v5070_v43, %v3238_v54 }
 0x3d5   :  { %4359 = vmatmul.msk.f32.gmra.mxu2 %vm2015_vm4, %v1969_v20  ;;  %v3009_v46 = vmul.f32 %v5787_v48, %v2877_v32  ;;  %v6126_v32 = vpop.f32.mrf.mxu3 }
 0x3d6   :  { %v3854_v9 = vperm.slane %v3513_v37, %v5298_v16 }
 0x3d7   :  { %v3281_v25 = vsel %vm1090_vm2, %v3009_v46, 0.0 }
 0x3d8   :  { %v3855_v23 = vsel %vm3749_vm13, %v3854_v9, %v3853_v19  ;;  %v1766_v1 = vpop.f32.mrf.mxu1  ;;  %v2640_v53 = vpop.f32.mrf.mxu2  ;;  %3282 = vadd.xlane.f32.xlu0 %v3281_v25  ;;  %v6134_v25 = vld [vmem:[%s6671_s6] ss:$0 sm:$0xff] }
 0x3d9   :  { %v1767_v5 = vadd.f32 %v5992_v58, %v1766_v1  ;;  %v2641_v10 = vadd.f32 %v5777_v27, %v2640_v53 }
 0x3db   :  { %v1970_v24 = vmax.f32 %v1767_v5, 0.0  ;;  %v2878_v45 = vmax.f32 %v2641_v10, 0.0  ;;  %v3241_v49 = vpop.xlane.xlu1 %3240  ;;  %v6142_v10 = vld [vmem:[%s6672_s7] ss:$0 sm:$0xff] }
 0x3dc   :  { %v3514_v59 = vadd.f32 %v5070_v43, %v3241_v49 }
 0x3dd   :  { %4360 = vmatmul.msk.f32.gmra.mxu2 %vm2015_vm4, %v1970_v24  ;;  %v3010_v22 = vmul.f32 %v5787_v48, %v2878_v45 }
 0x3de   :  { %v3856_v4 = vperm.slane %v3514_v59, %v5326_v44 }
 0x3df   :  { %v3284_v2 = vsel %vm1090_vm2, %v3010_v22, 0.0 }
 0x3e0   :  { %v3857_v57 = vsel %vm3753_vm14, %v3856_v4, %v3855_v23  ;;  %v1769_v34 = vpop.f32.mrf.mxu1  ;;  %v2643_v7 = vpop.f32.mrf.mxu2  ;;  %3285 = vadd.xlane.f32.xlu1 %v3284_v2 }
 0x3e1   :  { %v1770_v62 = vadd.f32 %v5992_v58, %v1769_v34  ;;  %v2644_v33 = vadd.f32 %v5777_v27, %v2643_v7  ;;  %v6150_v34 = vpop.f32.mrf.mxu3 }
 0x3e3   :  { %v1971_v19 = vmax.f32 %v1770_v62, 0.0  ;;  %v2879_v40 = vmax.f32 %v2644_v33, 0.0  ;;  %v3244_v21 = vpop.xlane.xlu2 %3243 }
 0x3e4   :  { %v3515_v28 = vadd.f32 %v5070_v43, %v3244_v21 }
 0x3e5   :  { %4361 = vmatmul.msk.f32.gmra.mxu2 %vm2015_vm4, %v1971_v19  ;;  %v3011_v52 = vmul.f32 %v5787_v48, %v2879_v40 }
 0x3e6   :  { %v3858_v20 = vperm.slane %v3515_v28, %v5354_v8 }
 0x3e7   :  { %v3287_v54 = vsel %vm1090_vm2, %v3011_v52, 0.0 }
 0x3e8   :  { %v3859_v37 = vsel %vm6678_vm15, %v3858_v20, %v3857_v57  ;;  %v1772_v46 = vpop.f32.mrf.mxu1  ;;  %v2646_v9 = vpop.f32.mrf.mxu2  ;;  %3288 = vadd.xlane.f32.xlu2 %v3287_v54 }
 0x3e9   :  { %v1773_v27 = vadd.f32 %v5992_v58, %v1772_v46  ;;  %v2647_v48 = vadd.f32 %v6134_v25, %v2646_v9 }
 0x3eb   :  { %v1972_v23 = vmax.f32 %v1773_v27, 0.0  ;;  %v2880_v1 = vmax.f32 %v2647_v48, 0.0  ;;  %v3247_v53 = vpop.xlane.xlu0 %3246 }
 0x3ec   :  { %v3516_v5 = vadd.f32 %v5070_v43, %v3247_v53 }
 0x3ed   :  { %4362 = vmatmul.msk.f32.gmra.mxu2 %vm2015_vm4, %v1972_v23  ;;  %v3012_v24 = vmul.f32 %v6142_v10, %v2880_v1  ;;  %v6160_v23 = vpop.f32.mrf.mxu3 }
 0x3ee   :  { %v3860_v45 = vperm.slane %v3516_v5, %v5377_v42 }
 0x3ef   :  { %v3290_v49 = vsel %vm1090_vm2, %v3012_v24, 0.0 }
 0x3f0   :  { %v3861_v59 = vsel %vm6684_vm0, %v3860_v45, %v3859_v37  ;;  %v1775_v22 = vpop.f32.mrf.mxu1  ;;  %v2649_v4 = vpop.f32.mrf.mxu2  ;;  %3291 = vadd.xlane.f32.xlu0 %v3290_v49  ;;  %vm6686_vm0 = vcmask 982912  }
 0x3f1   :  { %v1776_v2 = vadd.f32 %v5992_v58, %v1775_v22  ;;  %v2650_v57 = vadd.f32 %v6134_v25, %v2649_v4 }
 0x3f3   :  { %v1973_v7 = vmax.f32 %v1776_v2, 0.0  ;;  %v2881_v62 = vmax.f32 %v2650_v57, 0.0  ;;  %v3250_v33 = vpop.xlane.xlu1 %3249 }
 0x3f4   :  { %v3517_v19 = vadd.f32 %v5070_v43, %v3250_v33 }
 0x3f5   :  { %4363 = vmatmul.msk.f32.gmra.mxu2 %vm2015_vm4, %v1973_v7  ;;  %v3013_v40 = vmul.f32 %v6142_v10, %v2881_v62 }
 0x3f6   :  { %v3862_v21 = vperm.slane %v3517_v19, %v5400_v14  ;;  %v6173_v19 = vpop.f32.mrf.mxu3 }
 0x3f7   :  { %v3293_v28 = vsel %vm1090_vm2, %v3013_v40, 0.0 }
 0x3f8   :  { %v3863_v52 = vsel %vm6685_vm1, %v3862_v21, %v3861_v59  ;;  %v1778_v20 = vpop.f32.mrf.mxu1  ;;  %v2652_v54 = vpop.f32.mrf.mxu2  ;;  %3294 = vadd.xlane.f32.xlu1 %v3293_v28  ;;  %vm3996_vm1 = vcmask 1043459  }
 0x3f9   :  { %v1779_v37 = vadd.f32 %v5992_v58, %v1778_v20  ;;  %v2653_v46 = vadd.f32 %v6134_v25, %v2652_v54 }
 0x3fb   :  { %v1974_v9 = vmax.f32 %v1779_v37, 0.0  ;;  %v2882_v27 = vmax.f32 %v2653_v46, 0.0  ;;  %v3253_v48 = vpop.xlane.xlu2 %3252 }
 0x3fc   :  { %v3518_v1 = vadd.f32 %v5070_v43, %v3253_v48 }
 0x3fd   :  { %4364 = vmatmul.msk.f32.gmra.mxu2 %vm2015_vm4, %v1974_v9  ;;  %v3014_v53 = vmul.f32 %v6142_v10, %v2882_v27 }
 0x3fe   :  { %v3864_v5 = vperm.slane %v3518_v1, %v5421_v47  ;;  %v1788_v1 = vadd.f32 %v5992_v58, %v5868_v0 }
 0x3ff   :  { %v3296_v24 = vsel %vm1090_vm2, %v3014_v53, 0.0 }
 0x400   :  { %v3865_v45 = vsel %vm6686_vm0, %v3864_v5, %v3863_v52  ;;  %v1781_v49 = vpop.f32.mrf.mxu1  ;;  %v2655_v59 = vpop.f32.mrf.mxu2  ;;  %3297 = vadd.xlane.f32.xlu2 %v3296_v24  ;;  %vm6687_vm0 = vcmask 851712  }
 0x401   :  { %v1782_v22 = vadd.f32 %v5992_v58, %v1781_v49  ;;  %v2656_v4 = vadd.f32 %v6134_v25, %v2655_v59  ;;  %v6188_v24 = vpop.f32.mrf.mxu3  ;;  %v1977_v59 = vmax.f32 %v1788_v1, 0.0 }
 0x403   :  { %v1975_v2 = vmax.f32 %v1782_v22, 0.0  ;;  %v2883_v57 = vmax.f32 %v2656_v4, 0.0  ;;  %v3256_v7 = vpop.xlane.xlu0 %3255 }
 0x404   :  { %v3519_v62 = vadd.f32 %v5070_v43, %v3256_v7 }
 0x405   :  { %4365 = vmatmul.msk.f32.gmra.mxu2 %vm2015_vm4, %v1975_v2  ;;  %v3015_v33 = vmul.f32 %v6142_v10, %v2883_v57 }
 0x406   :  { %v3866_v40 = vperm.slane %v3519_v62, %v5446_v12  ;;  %v1791_v62 = vadd.f32 %v5992_v58, %v5885_v36 }
 0x407   :  { %v3299_v21 = vsel %vm1090_vm2, %v3015_v33, 0.0 }
 0x408   :  { %v3867_v28 = vsel %vm3773_vm3, %v3866_v40, %v3865_v45  ;;  %v1784_v52 = vpop.f32.mrf.mxu1  ;;  %v2658_v20 = vpop.f32.mrf.mxu2  ;;  %3300 = vadd.xlane.f32.xlu0 %v3299_v21 }
 0x409   :  { %v6179_v54 = vsel %vm3996_vm1, %v3867_v28, %v6016_v6  ;;  %v1785_v37 = vadd.f32 %v5992_v58, %v1784_v52  ;;  %v2659_v46 = vadd.f32 %v6134_v25, %v2658_v20  ;;  %v6202_v52 = vpop.f32.mrf.mxu3  ;;  %v1978_v20 = vmax.f32 %v1791_v62, 0.0 }
 0x40a   :  { %vm6688_vm1 = vcmask 917312  }
 0x40b   :  { %v1976_v9 = vmax.f32 %v1785_v37, 0.0  ;;  %v2884_v27 = vmax.f32 %v2659_v46, 0.0  ;;  %v3259_v53 = vpop.xlane.xlu1 %3258 }
 0x40c   :  { %v3520_v49 = vadd.f32 %v5070_v43, %v3259_v53 }
 0x40d   :  { %4366 = vmatmul.msk.f32.vlgmr.msra.gmra.mxu3 %vm2015_vm4, %v1976_v9  ;;  %v3016_v48 = vmul.f32 %v6142_v10, %v2884_v27 }
 0x40e   :  { %v3868_v57 = vperm.slane %v3520_v49, %v5101_v3 }
 0x40f   :  { %v3302_v5 = vsel %vm1090_vm2, %v3016_v48, 0.0  ;;  %v1794_v48 = vadd.f32 %v5992_v58, %v5904_v60 }
 0x410   :  { %v2661_v6 = vpop.f32.mrf.mxu2  ;;  %3303 = vadd.xlane.f32.xlu1 %v3302_v5 }
 0x411   :  { %v2662_v45 = vadd.f32 %v6134_v25, %v2661_v6 }
 0x413   :  { %v2885_v22 = vmax.f32 %v2662_v45, 0.0  ;;  %v3262_v4 = vpop.xlane.xlu2 %3261  ;;  %v1979_v45 = vmax.f32 %v1794_v48, 0.0 }
 0x414   :  { %v3521_v2 = vadd.f32 %v5070_v43, %v3262_v4 }
 0x415   :  { %4367 = vmatmul.msk.f32.gmra.mxu3 %vm2015_vm4, %v1977_v59  ;;  %v3017_v0 = vmul.f32 %v6142_v10, %v2885_v22  ;;  %v6213_v22 = vpop.f32.mrf.mxu3 }
 0x416   :  { %v3869_v7 = vperm.slane %v3521_v2, %v5110_v15 }
 0x417   :  { %v3305_v33 = vsel %vm1090_vm2, %v3017_v0, 0.0  ;;  %v1797_v0 = vadd.f32 %v5992_v58, %v5928_v31 }
 0x418   :  { %v3870_v40 = vsel %vm3717_vm5, %v3869_v7, %v3868_v57  ;;  %v2664_v21 = vpop.f32.mrf.mxu2  ;;  %3306 = vadd.xlane.f32.xlu2 %v3305_v33 }
 0x419   :  { %v2665_v28 = vadd.f32 %v6134_v25, %v2664_v21 }
 0x41b   :  { %v2886_v37 = vmax.f32 %v2665_v28, 0.0  ;;  %v3265_v46 = vpop.xlane.xlu0 %3264 }
 0x41c   :  { %v3522_v9 = vadd.f32 %v5070_v43, %v3265_v46 }
 0x41d   :  { %4368 = vmatmul.msk.f32.gmra.mxu3 %vm2015_vm4, %v1978_v20  ;;  %v3018_v27 = vmul.f32 %v6142_v10, %v2886_v37  ;;  %v6227_v46 = vpop.f32.mrf.mxu3 }
 0x41e   :  { %v3871_v36 = vperm.slane %v3522_v9, %v5139_v35  ;;  %v1800_v9 = vadd.f32 %v5992_v58, %v5946_v55  ;;  %v1803_v55 = vadd.f32 %v5992_v58, %v5963_v29 }
 0x41f   :  { %v3308_v1 = vsel %vm1090_vm2, %v3018_v27, 0.0 }
 0x420   :  { %v3872_v53 = vsel %vm3721_vm6, %v3871_v36, %v3870_v40  ;;  %v2667_v5 = vpop.f32.mrf.mxu2  ;;  %3309 = vadd.xlane.f32.xlu0 %v3308_v1  ;;  %v1980_v40 = vmax.f32 %v1797_v0, 0.0 }
 0x421   :  { %v2668_v6 = vadd.f32 %v6134_v25, %v2667_v5 }
 0x423   :  { %v2887_v49 = vmax.f32 %v2668_v6, 0.0  ;;  %v3268_v59 = vpop.xlane.xlu1 %3267 }
 0x424   :  { %v3523_v4 = vadd.f32 %v5070_v43, %v3268_v59 }
 0x425   :  { %4369 = vmatmul.msk.f32.gmra.mxu3 %vm2015_vm4, %v1979_v45  ;;  %v3019_v2 = vmul.f32 %v6142_v10, %v2887_v49 }
 0x426   :  { %v3873_v60 = vperm.slane %v3523_v4, %v5162_v56 }
 0x427   :  { %v3311_v57 = vsel %vm1090_vm2, %v3019_v2, 0.0  ;;  %v6242_v2 = vpop.f32.mrf.mxu3 }
 0x428   :  { %v3874_v7 = vsel %vm3725_vm7, %v3873_v60, %v3872_v53  ;;  %v2670_v62 = vpop.f32.mrf.mxu2  ;;  %3312 = vadd.xlane.f32.xlu1 %v3311_v57  ;;  %v1981_v53 = vmax.f32 %v1800_v9, 0.0 }
 0x429   :  { %v2671_v33 = vadd.f32 %v6134_v25, %v2670_v62 }
 0x42b   :  { %v2888_v21 = vmax.f32 %v2671_v33, 0.0  ;;  %v3271_v28 = vpop.xlane.xlu2 %3270 }
 0x42c   :  { %v3524_v20 = vadd.f32 %v5070_v43, %v3271_v28  ;;  %v1806_v28 = vadd.f32 %v5992_v58, %v5980_v11 }
 0x42d   :  { %4370 = vmatmul.msk.f32.gmra.mxu3 %vm2015_vm4, %v1980_v40  ;;  %v3020_v37 = vmul.f32 %v6142_v10, %v2888_v21 }
 0x42e   :  { %v3875_v31 = vperm.slane %v3524_v20, %v5185_v18 }
 0x42f   :  { %v3314_v27 = vsel %vm1090_vm2, %v3020_v37, 0.0 }
 0x430   :  { %v3876_v36 = vsel %vm3729_vm8, %v3875_v31, %v3874_v7  ;;  %v2673_v48 = vpop.f32.mrf.mxu2  ;;  %3315 = vadd.xlane.f32.xlu2 %v3314_v27  ;;  %v1982_v7 = vmax.f32 %v1803_v55, 0.0  ;;  %v6255_v27 = vpop.f32.mrf.mxu3 }
 0x431   :  { %v2674_v1 = vadd.f32 %v6134_v25, %v2673_v48 }
 0x433   :  { %v2889_v5 = vmax.f32 %v2674_v1, 0.0  ;;  %v3274_v6 = vpop.xlane.xlu0 %3273 }
 0x434   :  { %v3525_v45 = vadd.f32 %v5070_v43, %v3274_v6  ;;  %v1809_v6 = vadd.f32 %v5992_v58, %v6042_v38 }
 0x435   :  { %4371 = vmatmul.msk.f32.gmra.mxu3 %vm2015_vm4, %v1981_v53  ;;  %v3021_v49 = vmul.f32 %v6142_v10, %v2889_v5 }
 0x436   :  { %v3877_v59 = vperm.slane %v3525_v45, %v5208_v39 }
 0x437   :  { %v3317_v4 = vsel %vm1090_vm2, %v3021_v49, 0.0 }
 0x438   :  { %v3878_v60 = vsel %vm3733_vm9, %v3877_v59, %v3876_v36  ;;  %v2676_v0 = vpop.f32.mrf.mxu2  ;;  %3318 = vadd.xlane.f32.xlu0 %v3317_v4  ;;  %v1983_v36 = vmax.f32 %v1806_v28, 0.0  ;;  %v1984_v4 = vmax.f32 %v1809_v6, 0.0 }
 0x439   :  { %v2677_v57 = vadd.f32 %v6134_v25, %v2676_v0 }
 0x43b   :  { %v2890_v62 = vmax.f32 %v2677_v57, 0.0  ;;  %v3277_v33 = vpop.xlane.xlu1 %3276  ;;  %v6266_v57 = vpop.f32.mrf.mxu3 }
 0x43c   :  { %v3526_v40 = vadd.f32 %v5070_v43, %v3277_v33  ;;  %v1812_v33 = vadd.f32 %v5992_v58, %v6054_v13 }
 0x43d   :  { %4372 = vmatmul.msk.f32.gmra.mxu3 %vm2015_vm4, %v1982_v7  ;;  %v3022_v21 = vmul.f32 %v6142_v10, %v2890_v62 }
 0x43e   :  { %v3879_v29 = vperm.slane %v3526_v40, %v5231_v63 }
 0x43f   :  { %v3320_v20 = vsel %vm1090_vm2, %v3022_v21, 0.0 }
 0x440   :  { %v3880_v37 = vsel %vm3737_vm10, %v3879_v29, %v3878_v60  ;;  %v2679_v31 = vpop.f32.mrf.mxu2  ;;  %3321 = vadd.xlane.f32.xlu1 %v3320_v20  ;;  %v1985_v20 = vmax.f32 %v1812_v33, 0.0 }
 0x441   :  { %v2680_v9 = vadd.f32 %v6134_v25, %v2679_v31 }
 0x443   :  { %v2891_v48 = vmax.f32 %v2680_v9, 0.0  ;;  %v3280_v1 = vpop.xlane.xlu2 %3279 }
 0x444   :  { %v3527_v53 = vadd.f32 %v5070_v43, %v3280_v1  ;;  %v1815_v1 = vadd.f32 %v5992_v58, %v6065_v41  ;;  %v1818_v41 = vadd.f32 %v5992_v58, %v6078_v30 }
 0x445   :  { %4373 = vmatmul.msk.f32.gmra.mxu3 %vm2015_vm4, %v1983_v36  ;;  %v3023_v5 = vmul.f32 %v6142_v10, %v2891_v48  ;;  %v6280_v48 = vpop.f32.mrf.mxu3 }
 0x446   :  { %v3881_v11 = vperm.slane %v3527_v53, %v5254_v26 }
 0x447   :  { %v3323_v45 = vsel %vm1090_vm2, %v3023_v5, 0.0 }
 0x448   :  { %v3882_v49 = vsel %vm3741_vm11, %v3881_v11, %v3880_v37  ;;  %v2682_v59 = vpop.f32.mrf.mxu2  ;;  %3324 = vadd.xlane.f32.xlu2 %v3323_v45  ;;  %v1986_v45 = vmax.f32 %v1815_v1, 0.0 }
 0x449   :  { %v2683_v55 = vadd.f32 %v6134_v25, %v2682_v59 }
 0x44b   :  { %v2892_v60 = vmax.f32 %v2683_v55, 0.0  ;;  %v3283_v0 = vpop.xlane.xlu0 %3282 }
 0x44c   :  { %v3528_v7 = vadd.f32 %v5070_v43, %v3283_v0 }
 0x44d   :  { %4374 = vmatmul.msk.f32.gmra.mxu3 %vm2015_vm4, %v1984_v4  ;;  %v3024_v62 = vmul.f32 %v6142_v10, %v2892_v60 }
 0x44e   :  { %v3883_v38 = vperm.slane %v3528_v7, %v5277_v51  ;;  %v6295_v7 = vpop.f32.mrf.mxu3 }
 0x44f   :  { %v3326_v40 = vsel %vm1090_vm2, %v3024_v62, 0.0 }
 0x450   :  { %v3884_v21 = vsel %vm3745_vm12, %v3883_v38, %v3882_v49  ;;  %v2685_v29 = vpop.f32.mrf.mxu2  ;;  %3327 = vadd.xlane.f32.xlu0 %v3326_v40  ;;  %v1987_v40 = vmax.f32 %v1818_v41, 0.0 }
 0x451   :  { %v2686_v28 = vadd.f32 %v6134_v25, %v2685_v29 }
 0x453   :  { %v2893_v37 = vmax.f32 %v2686_v28, 0.0  ;;  %v3286_v31 = vpop.xlane.xlu1 %3285 }
 0x454   :  { %v3529_v9 = vadd.f32 %v5070_v43, %v3286_v31 }
 0x455   :  { %4375 = vmatmul.msk.f32.gmra.mxu3 %vm2015_vm4, %v1985_v20  ;;  %v3025_v36 = vmul.f32 %v6142_v10, %v2893_v37  ;;  %v1821_v37 = vadd.f32 %v5992_v58, %v6090_v61 }
 0x456   :  { %v3885_v13 = vperm.slane %v3529_v9, %v5298_v16  ;;  %v6308_v1 = vpop.f32.mrf.mxu3 }
 0x457   :  { %v3329_v53 = vsel %vm1090_vm2, %v3025_v36, 0.0 }
 0x458   :  { %v3886_v5 = vsel %vm3749_vm13, %v3885_v13, %v3884_v21  ;;  %v2688_v11 = vpop.f32.mrf.mxu2  ;;  %3330 = vadd.xlane.f32.xlu1 %v3329_v53  ;;  %v1988_v53 = vmax.f32 %v1821_v37, 0.0 }
 0x459   :  { %v2689_v6 = vadd.f32 %v6134_v25, %v2688_v11 }
 0x45b   :  { %v2894_v49 = vmax.f32 %v2689_v6, 0.0  ;;  %v3289_v59 = vpop.xlane.xlu2 %3288 }
 0x45c   :  { %v3530_v55 = vadd.f32 %v5070_v43, %v3289_v59 }
 0x45d   :  { %4376 = vmatmul.msk.f32.gmra.mxu3 %vm2015_vm4, %v1986_v45  ;;  %v3026_v4 = vmul.f32 %v6142_v10, %v2894_v49  ;;  %v1824_v49 = vadd.f32 %v5992_v58, %v6102_v50 }
 0x45e   :  { %v3887_v60 = vperm.slane %v3530_v55, %v5326_v44 }
 0x45f   :  { %v3332_v0 = vsel %vm1090_vm2, %v3026_v4, 0.0  ;;  %v1989_v41 = vmax.f32 %v1824_v49, 0.0 }
 0x460   :  { %v3888_v62 = vsel %vm3753_vm14, %v3887_v60, %v3886_v5  ;;  %v2691_v38 = vpop.f32.mrf.mxu2  ;;  %3333 = vadd.xlane.f32.xlu2 %v3332_v0 }
 0x461   :  { %v2692_v33 = vadd.f32 %v6134_v25, %v2691_v38  ;;  %v6319_v38 = vpop.f32.mrf.mxu3 }
 0x463   :  { %v2895_v21 = vmax.f32 %v2692_v33, 0.0  ;;  %v3292_v29 = vpop.xlane.xlu0 %3291 }
 0x464   :  { %v3531_v28 = vadd.f32 %v5070_v43, %v3292_v29 }
 0x465   :  { %4377 = vmatmul.msk.f32.gmra.mxu3 %vm2015_vm4, %v1987_v40  ;;  %v3027_v20 = vmul.f32 %v6142_v10, %v2895_v21  ;;  %v1827_v21 = vadd.f32 %v5992_v58, %v6113_v17 }
 0x466   :  { %v3889_v30 = vperm.slane %v3531_v28, %v5354_v8 }
 0x467   :  { %v3335_v31 = vsel %vm1090_vm2, %v3027_v20, 0.0  ;;  %v1990_v37 = vmax.f32 %v1827_v21, 0.0 }
 0x468   :  { %v3890_v9 = vsel %vm6678_vm15, %v3889_v30, %v3888_v62  ;;  %v2694_v36 = vpop.f32.mrf.mxu2  ;;  %3336 = vadd.xlane.f32.xlu0 %v3335_v31 }
 0x469   :  { %v2695_v13 = vadd.f32 %v6134_v25, %v2694_v36 }
 0x46b   :  { %v2896_v5 = vmax.f32 %v2695_v13, 0.0  ;;  %v3295_v11 = vpop.xlane.xlu1 %3294 }
 0x46c   :  { %v3532_v6 = vadd.f32 %v5070_v43, %v3295_v11 }
 0x46d   :  { %4378 = vmatmul.msk.f32.gmra.mxu3 %vm2015_vm4, %v1988_v53  ;;  %v3028_v45 = vmul.f32 %v6142_v10, %v2896_v5  ;;  %v6333_v53 = vpop.f32.mrf.mxu3  ;;  %v1830_v5 = vadd.f32 %v5992_v58, %v6126_v32 }
 0x46e   :  { %v3891_v61 = vperm.slane %v3532_v6, %v5377_v42 }
 0x46f   :  { %v3338_v59 = vsel %vm1090_vm2, %v3028_v45, 0.0  ;;  %v1991_v49 = vmax.f32 %v1830_v5, 0.0 }
 0x470   :  { %v3892_v55 = vsel %vm6687_vm0, %v3891_v61, %v3890_v9  ;;  %v2697_v4 = vpop.f32.mrf.mxu2  ;;  %3339 = vadd.xlane.f32.xlu1 %v3338_v59  ;;  %vm6689_vm0 = vcmask 982912  }
 0x471   :  { %v2698_v60 = vadd.f32 %v6134_v25, %v2697_v4 }
 0x473   :  { %v2897_v0 = vmax.f32 %v2698_v60, 0.0  ;;  %v3298_v62 = vpop.xlane.xlu2 %3297 }
 0x474   :  { %v3533_v33 = vadd.f32 %v5070_v43, %v3298_v62 }
 0x475   :  { %4379 = vmatmul.msk.f32.gmra.mxu3 %vm2015_vm4, %v1989_v41  ;;  %v3029_v40 = vmul.f32 %v6142_v10, %v2897_v0  ;;  %v1833_v41 = vadd.f32 %v5992_v58, %v6150_v34  ;;  %v6348_v62 = vpop.f32.mrf.mxu3  ;;  %v1836_v34 = vadd.f32 %v5992_v58, %v6160_v23 }
 0x476   :  { %v3893_v50 = vperm.slane %v3533_v33, %v5400_v14 }
 0x477   :  { %v3341_v29 = vsel %vm1090_vm2, %v3029_v40, 0.0 }
 0x478   :  { %v3894_v28 = vsel %vm6688_vm1, %v3893_v50, %v3892_v55  ;;  %v2700_v20 = vpop.f32.mrf.mxu2  ;;  %3342 = vadd.xlane.f32.xlu2 %v3341_v29  ;;  %vm3998_vm1 = vcmask 1044484   ;;  %v1992_v29 = vmax.f32 %v1833_v41, 0.0 }
 0x479   :  { %v2701_v30 = vadd.f32 %v6134_v25, %v2700_v20 }
 0x47b   :  { %v2898_v31 = vmax.f32 %v2701_v30, 0.0  ;;  %v3301_v9 = vpop.xlane.xlu0 %3300 }
 0x47c   :  { %v3534_v36 = vadd.f32 %v5070_v43, %v3301_v9 }
 0x47d   :  { %4380 = vmatmul.msk.f32.gmra.mxu3 %vm2015_vm4, %v1990_v37  ;;  %v3030_v13 = vmul.f32 %v6142_v10, %v2898_v31 }
 0x47e   :  { %v3895_v17 = vperm.slane %v3534_v36, %v5421_v47  ;;  %v1993_v36 = vmax.f32 %v1836_v34, 0.0 }
 0x47f   :  { %v3344_v11 = vsel %vm1090_vm2, %v3030_v13, 0.0 }
 0x480   :  { %v3896_v6 = vsel %vm6689_vm0, %v3895_v17, %v3894_v28  ;;  %v2703_v45 = vpop.f32.mrf.mxu2  ;;  %3345 = vadd.xlane.f32.xlu0 %v3344_v11  ;;  %vm6690_vm0 = vcmask 851712  }
 0x481   :  { %v2704_v61 = vadd.f32 %v6134_v25, %v2703_v45 }
 0x483   :  { %v2899_v59 = vmax.f32 %v2704_v61, 0.0  ;;  %v3304_v55 = vpop.xlane.xlu1 %3303 }
 0x484   :  { %v3535_v4 = vadd.f32 %v5070_v43, %v3304_v55 }
 0x485   :  { %4381 = vmatmul.msk.f32.gmra.mxu3 %vm2015_vm4, %v1991_v49  ;;  %v3031_v60 = vmul.f32 %v6142_v10, %v2899_v59 }
 0x486   :  { %v3897_v32 = vperm.slane %v3535_v4, %v5446_v12 }
 0x487   :  { %v3347_v0 = vsel %vm1090_vm2, %v3031_v60, 0.0 }
 0x488   :  { %v3898_v33 = vsel %vm3773_vm3, %v3897_v32, %v3896_v6  ;;  %v2706_v40 = vpop.f32.mrf.mxu2  ;;  %3348 = vadd.xlane.f32.xlu1 %v3347_v0  ;;  %v6370_v6 = vld [vmem:[%s6669_s4] ss:$0 sm:$0xff] }
 0x489   :  { %v6352_v50 = vsel %vm3998_vm1, %v3898_v33, %v6179_v54  ;;  %v2707_v21 = vadd.f32 %v6134_v25, %v2706_v40  ;;  %v1839_v45 = vadd.f32 %v6370_v6, %v6173_v19  ;;  %v1842_v19 = vadd.f32 %v6370_v6, %v6188_v24 }
 0x48a   :  { %v1845_v24 = vadd.f32 %v6370_v6, %v6202_v52  ;;  %v1848_v52 = vadd.f32 %v6370_v6, %v6213_v22  ;;  %v1851_v22 = vadd.f32 %v6370_v6, %v6227_v46  ;;  %v1854_v46 = vadd.f32 %v6370_v6, %v6242_v2 }
 0x48b   :  { %v2900_v28 = vmax.f32 %v2707_v21, 0.0  ;;  %v3307_v30 = vpop.xlane.xlu2 %3306  ;;  %v1994_v4 = vmax.f32 %v1839_v45, 0.0  ;;  %vm6691_vm1 = vcmask 917312  }
 0x48c   :  { %v3536_v54 = vadd.f32 %v5070_v43, %v3307_v30 }
 0x48d   :  { %4382 = vmatmul.msk.f32.gmra.mxu3 %vm2015_vm4, %v1992_v29  ;;  %v3032_v20 = vmul.f32 %v6142_v10, %v2900_v28 }
 0x48e   :  { %v3899_v58 = vperm.slane %v3536_v54, %v5101_v3 }
 0x48f   :  { %v3350_v37 = vsel %vm1090_vm2, %v3032_v20, 0.0  ;;  %v1995_v20 = vmax.f32 %v1842_v19, 0.0 }
 0x490   :  { %v2709_v31 = vpop.f32.mrf.mxu3  ;;  %3351 = vadd.xlane.f32.xlu2 %v3350_v37 }
 0x491   :  { %v2710_v9 = vadd.f32 %v6134_v25, %v2709_v31 }
 0x493   :  { %v2901_v13 = vmax.f32 %v2710_v9, 0.0  ;;  %v3310_v17 = vpop.xlane.xlu0 %3309 }
 0x494   :  { %v3537_v5 = vadd.f32 %v5070_v43, %v3310_v17 }
 0x495   :  { %4383 = vmatmul.msk.f32.gmra.mxu3 %vm2015_vm4, %v1993_v36  ;;  %v3033_v11 = vmul.f32 %v6142_v10, %v2901_v13 }
 0x496   :  { %v3900_v23 = vperm.slane %v3537_v5, %v5110_v15  ;;  %v1996_v5 = vmax.f32 %v1845_v24, 0.0 }
 0x497   :  { %v3353_v61 = vsel %vm1090_vm2, %v3033_v11, 0.0 }
 0x498   :  { %v3901_v49 = vsel %vm3717_vm5, %v3900_v23, %v3899_v58  ;;  %v2712_v59 = vpop.f32.mrf.mxu3  ;;  %3354 = vadd.xlane.f32.xlu0 %v3353_v61 }
 0x499   :  { %v2713_v55 = vadd.f32 %v6134_v25, %v2712_v59 }
 0x49b   :  { %v2902_v60 = vmax.f32 %v2713_v55, 0.0  ;;  %v3313_v32 = vpop.xlane.xlu1 %3312 }
 0x49c   :  { %v3538_v41 = vadd.f32 %v5070_v43, %v3313_v32 }
 0x49d   :  { %4384 = vmatmul.msk.f32.gmra.mxu3 %vm2015_vm4, %v1994_v4  ;;  %v3034_v0 = vmul.f32 %v6142_v10, %v2902_v60  ;;  %v1997_v60 = vmax.f32 %v1848_v52, 0.0 }
 0x49e   :  { %v3902_v33 = vperm.slane %v3538_v41, %v5139_v35 }
 0x49f   :  { %v3356_v40 = vsel %vm1090_vm2, %v3034_v0, 0.0 }
 0x4a0   :  { %v3903_v21 = vsel %vm3721_vm6, %v3902_v33, %v3901_v49  ;;  %v2715_v29 = vpop.f32.mrf.mxu3  ;;  %3357 = vadd.xlane.f32.xlu1 %v3356_v40 }
 0x4a1   :  { %v2716_v28 = vadd.f32 %v6134_v25, %v2715_v29 }
 0x4a3   :  { %v2903_v34 = vmax.f32 %v2716_v28, 0.0  ;;  %v3316_v30 = vpop.xlane.xlu2 %3315 }
 0x4a4   :  { %v3539_v37 = vadd.f32 %v5070_v43, %v3316_v30 }
 0x4a5   :  { %4385 = vmatmul.msk.f32.gmra.mxu3 %vm2015_vm4, %v1995_v20  ;;  %v3035_v31 = vmul.f32 %v6142_v10, %v2903_v34  ;;  %v1998_v20 = vmax.f32 %v1851_v22, 0.0 }
 0x4a6   :  { %v3904_v9 = vperm.slane %v3539_v37, %v5162_v56 }
 0x4a7   :  { %v3359_v54 = vsel %vm1090_vm2, %v3035_v31, 0.0 }
 0x4a8   :  { %v3905_v36 = vsel %vm3725_vm7, %v3904_v9, %v3903_v21  ;;  %v2718_v13 = vpop.f32.mrf.mxu3  ;;  %3360 = vadd.xlane.f32.xlu2 %v3359_v54 }
 0x4a9   :  { %v2719_v17 = vadd.f32 %v6134_v25, %v2718_v13 }
 0x4ab   :  { %v2904_v11 = vmax.f32 %v2719_v17, 0.0  ;;  %v3319_v58 = vpop.xlane.xlu0 %3318  ;;  %v1999_v17 = vmax.f32 %v1854_v46, 0.0 }
 0x4ac   :  { %v3540_v23 = vadd.f32 %v5070_v43, %v3319_v58 }
 0x4ad   :  { %4386 = vmatmul.msk.f32.gmra.mxu3 %vm2015_vm4, %v1996_v5  ;;  %v3036_v45 = vmul.f32 %v6142_v10, %v2904_v11 }
 0x4ae   :  { %v3906_v61 = vperm.slane %v3540_v23, %v5185_v18  ;;  %v1857_v23 = vadd.f32 %v6370_v6, %v6255_v27 }
 0x4af   :  { %v3362_v49 = vsel %vm1090_vm2, %v3036_v45, 0.0 }
 0x4b0   :  { %v3907_v59 = vsel %vm3729_vm8, %v3906_v61, %v3905_v36  ;;  %v2721_v55 = vpop.f32.mrf.mxu3  ;;  %3363 = vadd.xlane.f32.xlu0 %v3362_v49  ;;  %v2000_v49 = vmax.f32 %v1857_v23, 0.0 }
 0x4b1   :  { %v2722_v4 = vadd.f32 %v6134_v25, %v2721_v55 }
 0x4b3   :  { %v2905_v32 = vmax.f32 %v2722_v4, 0.0  ;;  %v3322_v41 = vpop.xlane.xlu1 %3321 }
 0x4b4   :  { %v3541_v0 = vadd.f32 %v5070_v43, %v3322_v41  ;;  %v1860_v41 = vadd.f32 %v6370_v6, %v6266_v57 }
 0x4b5   :  { %4387 = vmatmul.msk.f32.gmra.mxu3 %vm2015_vm4, %v1997_v60  ;;  %v3037_v33 = vmul.f32 %v6142_v10, %v2905_v32 }
 0x4b6   :  { %v3908_v19 = vperm.slane %v3541_v0, %v5208_v39 }
 0x4b7   :  { %v3365_v40 = vsel %vm1090_vm2, %v3037_v33, 0.0 }
 0x4b8   :  { %v3909_v21 = vsel %vm3733_vm9, %v3908_v19, %v3907_v59  ;;  %v2724_v29 = vpop.f32.mrf.mxu3  ;;  %3366 = vadd.xlane.f32.xlu1 %v3365_v40 }
 0x4b9   :  { %v2725_v28 = vadd.f32 %v6134_v25, %v2724_v29 }
 0x4bb   :  { %v2906_v34 = vmax.f32 %v2725_v28, 0.0  ;;  %v3325_v30 = vpop.xlane.xlu2 %3324 }
 0x4bc   :  { %v3542_v37 = vadd.f32 %v5070_v43, %v3325_v30  ;;  %v1863_v30 = vadd.f32 %v6370_v6, %v6280_v48 }
 0x4bd   :  { %4388 = vmatmul.msk.f32.gmra.mxu3 %vm2015_vm4, %v1998_v20  ;;  %v3038_v31 = vmul.f32 %v6142_v10, %v2906_v34 }
 0x4be   :  { %v3910_v9 = vperm.slane %v3542_v37, %v5231_v63 }
 0x4bf   :  { %v3368_v24 = vsel %vm1090_vm2, %v3038_v31, 0.0 }
 0x4c0   :  { %v3911_v54 = vsel %vm3737_vm10, %v3910_v9, %v3909_v21  ;;  %v2727_v36 = vpop.f32.mrf.mxu3  ;;  %3369 = vadd.xlane.f32.xlu2 %v3368_v24  ;;  %v2001_v21 = vmax.f32 %v1860_v41, 0.0  ;;  %v2002_v24 = vmax.f32 %v1863_v30, 0.0 }
 0x4c1   :  { %v2728_v13 = vadd.f32 %v6134_v25, %v2727_v36 }
 0x4c3   :  { %v2907_v5 = vmax.f32 %v2728_v13, 0.0  ;;  %v3328_v11 = vpop.xlane.xlu0 %3327 }
 0x4c4   :  { %v3543_v2 = vadd.f32 %v5070_v43, %v3328_v11 }
 0x4c5   :  { %4389 = vmatmul.msk.f32.gmra.mxu3 %vm2015_vm4, %v1999_v17  ;;  %v3039_v58 = vmul.f32 %v6142_v10, %v2907_v5  ;;  %v1866_v17 = vadd.f32 %v6370_v6, %v6295_v7 }
 0x4c6   :  { %v3912_v59 = vperm.slane %v3543_v2, %v5254_v26 }
 0x4c7   :  { %v3371_v45 = vsel %vm1090_vm2, %v3039_v58, 0.0  ;;  %v2003_v23 = vmax.f32 %v1866_v17, 0.0 }
 0x4c8   :  { %v2730_v61 = vpop.f32.mrf.mxu3  ;;  %3372 = vadd.xlane.f32.xlu0 %v3371_v45  ;;  %v3913_v0 = vsel %vm3741_vm11, %v3912_v59, %v3911_v54  ;;  %v1869_v59 = vadd.f32 %v6370_v6, %v6308_v1 }
 0x4c9   :  { %v2731_v52 = vadd.f32 %v6134_v25, %v2730_v61 }
 0x4ca   :  { %v2004_v41 = vmax.f32 %v1869_v59, 0.0 }
 0x4cb   :  { %v2908_v55 = vmax.f32 %v2731_v52, 0.0  ;;  %v3331_v4 = vpop.xlane.xlu1 %3330 }
 0x4cc   :  { %v3544_v60 = vadd.f32 %v5070_v43, %v3331_v4 }
 0x4cd   :  { %4390 = vmatmul.msk.f32.gmra.mxu3 %vm2015_vm4, %v2000_v49  ;;  %v3040_v32 = vmul.f32 %v6142_v10, %v2908_v55 }
 0x4ce   :  { %v3914_v27 = vperm.slane %v3544_v60, %v5277_v51 }
 0x4cf   :  { %v3374_v33 = vsel %vm1090_vm2, %v3040_v32, 0.0 }
 0x4d0   :  { %v3915_v19 = vsel %vm3745_vm12, %v3914_v27, %v3913_v0  ;;  %v2733_v22 = vpop.f32.mrf.mxu3  ;;  %3375 = vadd.xlane.f32.xlu1 %v3374_v33 }
 0x4d1   :  { %v2734_v40 = vadd.f32 %v6134_v25, %v2733_v22 }
 0x4d3   :  { %v2909_v29 = vmax.f32 %v2734_v40, 0.0  ;;  %v3334_v28 = vpop.xlane.xlu2 %3333  ;;  %v1872_v40 = vadd.f32 %v6370_v6, %v6319_v38 }
 0x4d4   :  { %v3545_v20 = vadd.f32 %v5070_v43, %v3334_v28 }
 0x4d5   :  { %4391 = vmatmul.msk.f32.gmra.mxu3 %vm2015_vm4, %v2001_v21  ;;  %v3041_v34 = vmul.f32 %v6142_v10, %v2909_v29 }
 0x4d6   :  { %v3916_v57 = vperm.slane %v3545_v20, %v5298_v16 }
 0x4d7   :  { %v3377_v37 = vsel %vm1090_vm2, %v3041_v34, 0.0  ;;  %v2005_v34 = vmax.f32 %v1872_v40, 0.0 }
 0x4d8   :  { %v3917_v31 = vsel %vm3749_vm13, %v3916_v57, %v3915_v19  ;;  %v2736_v9 = vpop.f32.mrf.mxu3  ;;  %3378 = vadd.xlane.f32.xlu2 %v3377_v37 }
 0x4d9   :  { %v2737_v46 = vadd.f32 %v6134_v25, %v2736_v9 }
 0x4db   :  { %v2910_v54 = vmax.f32 %v2737_v46, 0.0  ;;  %v3337_v36 = vpop.xlane.xlu0 %3336 }
 0x4dc   :  { %v3546_v48 = vadd.f32 %v5070_v43, %v3337_v36 }
 0x4dd   :  { %4392 = vmatmul.msk.f32.gmra.mxu3 %vm2015_vm4, %v2002_v24  ;;  %v3042_v13 = vmul.f32 %v6142_v10, %v2910_v54 }
 0x4de   :  { %v3918_v2 = vperm.slane %v3546_v48, %v5326_v44 }
 0x4df   :  { %v3380_v5 = vsel %vm1090_vm2, %v3042_v13, 0.0 }
 0x4e0   :  { %v2739_v11 = vpop.f32.mrf.mxu3  ;;  %3381 = vadd.xlane.f32.xlu0 %v3380_v5  ;;  %v3919_v55 = vsel %vm3753_vm14, %v3918_v2, %v3917_v31  ;;  %v1875_v31 = vadd.f32 %v6370_v6, %v6333_v53 }
 0x4e1   :  { %v2740_v58 = vadd.f32 %v6134_v25, %v2739_v11  ;;  %v1878_v11 = vadd.f32 %v6370_v6, %v6348_v62 }
 0x4e2   :  { %v2006_v54 = vmax.f32 %v1875_v31, 0.0 }
 0x4e3   :  { %v2911_v45 = vmax.f32 %v2740_v58, 0.0  ;;  %v3340_v61 = vpop.xlane.xlu1 %3339 }
 0x4e4   :  { %v3547_v52 = vadd.f32 %v5070_v43, %v3340_v61 }
 0x4e5   :  { %4393 = vmatmul.msk.f32.gmra.mxu3 %vm2015_vm4, %v2003_v23  ;;  %v3043_v49 = vmul.f32 %v6142_v10, %v2911_v45 }
 0x4e6   :  { %v3920_v7 = vperm.slane %v3547_v52, %v5354_v8  ;;  %v2007_v52 = vmax.f32 %v1878_v11, 0.0 }
 0x4e7   :  { %v3383_v4 = vsel %vm1090_vm2, %v3043_v49, 0.0 }
 0x4e8   :  { %v3921_v60 = vsel %vm6678_vm15, %v3920_v7, %v3919_v55  ;;  %v2742_v32 = vpop.f32.mrf.mxu3  ;;  %3384 = vadd.xlane.f32.xlu1 %v3383_v4  ;;  %vm4000_vm15 = vcmask 1045509  }
 0x4e9   :  { %v2743_v27 = vadd.f32 %v6134_v25, %v2742_v32 }
 0x4eb   :  { %v2912_v0 = vmax.f32 %v2743_v27, 0.0  ;;  %v3343_v33 = vpop.xlane.xlu2 %3342 }
 0x4ec   :  { %v3548_v19 = vadd.f32 %v5070_v43, %v3343_v33 }
 0x4ed   :  { %4394 = vmatmul.msk.f32.gmra.mxu3 %vm2015_vm4, %v2004_v41  ;;  %v3044_v22 = vmul.f32 %v6142_v10, %v2912_v0 }
 0x4ee   :  { %v3922_v1 = vperm.slane %v3548_v19, %v5377_v42 }
 0x4ef   :  { %v3386_v21 = vsel %vm1090_vm2, %v3044_v22, 0.0 }
 0x4f0   :  { %v3923_v29 = vsel %vm6690_vm0, %v3922_v1, %v3921_v60  ;;  %v2745_v28 = vpop.f32.mrf.mxu3  ;;  %3387 = vadd.xlane.f32.xlu2 %v3386_v21  ;;  %vm6692_vm0 = vcmask 982912  }
 0x4f1   :  { %v2746_v20 = vadd.f32 %v6134_v25, %v2745_v28 }
 0x4f3   :  { %v2913_v57 = vmax.f32 %v2746_v20, 0.0  ;;  %v3346_v30 = vpop.xlane.xlu0 %3345 }
 0x4f4   :  { %v3549_v38 = vadd.f32 %v5070_v43, %v3346_v30 }
 0x4f5   :  { %4395 = vmatmul.msk.f32.gmra.mxu3 %vm2015_vm4, %v2005_v34  ;;  %v3045_v37 = vmul.f32 %v6142_v10, %v2913_v57 }
 0x4f6   :  { %v3924_v36 = vperm.slane %v3549_v38, %v5400_v14 }
 0x4f7   :  { %v3389_v9 = vsel %vm1090_vm2, %v3045_v37, 0.0 }
 0x4f8   :  { %v2748_v46 = vpop.f32.mrf.mxu3  ;;  %3390 = vadd.xlane.f32.xlu0 %v3389_v9  ;;  %v3925_v58 = vsel %vm6691_vm1, %v3924_v36, %v3923_v29 }
 0x4f9   :  { %v2749_v24 = vadd.f32 %v6134_v25, %v2748_v46 }
 0x4fb   :  { %v2914_v13 = vmax.f32 %v2749_v24, 0.0  ;;  %v3349_v17 = vpop.xlane.xlu1 %3348 }
 0x4fc   :  { %v3550_v48 = vadd.f32 %v5070_v43, %v3349_v17 }
 0x4fd   :  { %4396 = vmatmul.msk.f32.gmra.mxu3 %vm2015_vm4, %v2006_v54  ;;  %v3046_v5 = vmul.f32 %v6142_v10, %v2914_v13 }
 0x4fe   :  { %v3926_v53 = vperm.slane %v3550_v48, %v5421_v47 }
 0x4ff   :  { %v3392_v23 = vsel %vm1090_vm2, %v3046_v5, 0.0 }
 0x500   :  { %v3927_v2 = vsel %vm6692_vm0, %v3926_v53, %v3925_v58  ;;  %v2751_v45 = vpop.f32.mrf.mxu3  ;;  %3393 = vadd.xlane.f32.xlu1 %v3392_v23 }
 0x501   :  { %v2752_v61 = vadd.f32 %v6134_v25, %v2751_v45 }
 0x503   :  { %v2915_v49 = vmax.f32 %v2752_v61, 0.0  ;;  %v3352_v7 = vpop.xlane.xlu2 %3351 }
 0x504   :  { %v3551_v59 = vadd.f32 %v5070_v43, %v3352_v7 }
 0x505   :  { %4397 = vmatmul.msk.f32.gmra.mxu3 %vm2015_vm4, %v2007_v52  ;;  %v3047_v55 = vmul.f32 %v6142_v10, %v2915_v49  ;;  %vm6693_vm4 = vcmask 786112  }
 0x506   :  { %v3928_v62 = vperm.slane %v3551_v59, %v5446_v12 }
 0x507   :  { %v3395_v6 = vsel %vm1090_vm2, %v3047_v55, 0.0 }
 0x508   :  { %v3929_v4 = vsel %vm3773_vm3, %v3928_v62, %v3927_v2  ;;  %v6500_v60 = vpop.f32.mrf.mxu3  ;;  %3396 = vadd.xlane.f32.xlu2 %v3395_v6 }
 0x509   :  { %v6503_v32 = vsel %vm4000_vm15, %v3929_v4, %v6352_v50  ;;  %vm6695_vm15 = vmmov %vm6691_vm1  ;;  %vm4002_vm1 = vcmask 1046534  }
 0x50b   :  { %v3355_v22 = vpop.xlane.xlu0 %3354 }
 0x50c   :  { %v3552_v29 = vadd.f32 %v5070_v43, %v3355_v22 }
 0x50e   :  { %v3930_v30 = vperm.slane %v3552_v29, %v5101_v3 }
 0x510   :  { %v2757_v27 = vpop.f32.mrf.mxu3 }
 0x511   :  { %v2758_v41 = vadd.f32 %v6134_v25, %v2757_v27 }
 0x513   :  { %v2917_v0 = vmax.f32 %v2758_v41, 0.0  ;;  %v3358_v33 = vpop.xlane.xlu1 %3357 }
 0x514   :  { %v3553_v1 = vadd.f32 %v5070_v43, %v3358_v33 }
 0x515   :  { %v3049_v19 = vmul.f32 %v6142_v10, %v2917_v0 }
 0x516   :  { %v3931_v50 = vperm.slane %v3553_v1, %v5110_v15 }
 0x517   :  { %v3401_v40 = vsel %vm1090_vm2, %v3049_v19, 0.0 }
 0x518   :  { %v2760_v21 = vpop.f32.mrf.mxu3  ;;  %3402 = vadd.xlane.f32.xlu1 %v3401_v40  ;;  %v3932_v38 = vsel %vm3717_vm5, %v3931_v50, %v3930_v30 }
 0x519   :  { %v2761_v28 = vadd.f32 %v6134_v25, %v2760_v21  ;;  %v6522_v25 = vld [vmem:[%s6671_s6] ss:$0 sm:$0xff] }
 0x51b   :  { %v2918_v20 = vmax.f32 %v2761_v28, 0.0  ;;  %v3361_v34 = vpop.xlane.xlu2 %3360 }
 0x51c   :  { %v3554_v57 = vadd.f32 %v5070_v43, %v3361_v34 }
 0x51d   :  { %v3050_v37 = vmul.f32 %v6142_v10, %v2918_v20  ;;  %v6528_v10 = vld [vmem:[%s6672_s7] ss:$0 sm:$0xff] }
 0x51e   :  { %v3933_v31 = vperm.slane %v3554_v57, %v5139_v35 }
 0x51f   :  { %v3404_v9 = vsel %vm1090_vm2, %v3050_v37, 0.0 }
 0x520   :  { %v3934_v46 = vsel %vm3721_vm6, %v3933_v31, %v3932_v38  ;;  %v2763_v24 = vpop.f32.mrf.mxu3  ;;  %3405 = vadd.xlane.f32.xlu2 %v3404_v9 }
 0x521   :  { %v2764_v54 = vadd.f32 %v6522_v25, %v2763_v24 }
 0x523   :  { %v2919_v36 = vmax.f32 %v2764_v54, 0.0  ;;  %v3364_v13 = vpop.xlane.xlu0 %3363 }
 0x524   :  { %v3555_v48 = vadd.f32 %v5070_v43, %v3364_v13 }
 0x525   :  { %v3051_v17 = vmul.f32 %v6528_v10, %v2919_v36 }
 0x526   :  { %v3935_v58 = vperm.slane %v3555_v48, %v5162_v56 }
 0x527   :  { %v3407_v5 = vsel %vm1090_vm2, %v3051_v17, 0.0 }
 0x528   :  { %v2766_v53 = vpop.f32.mrf.mxu3  ;;  %3408 = vadd.xlane.f32.xlu1 %v3407_v5  ;;  %v3936_v49 = vsel %vm3725_vm7, %v3935_v58, %v3934_v46 }
 0x529   :  { %v2767_v11 = vadd.f32 %v6522_v25, %v2766_v53 }
 0x52b   :  { %v2920_v23 = vmax.f32 %v2767_v11, 0.0  ;;  %v3367_v2 = vpop.xlane.xlu1 %3366 }
 0x52c   :  { %v3556_v45 = vadd.f32 %v5070_v43, %v3367_v2 }
 0x52d   :  { %v3052_v61 = vmul.f32 %v6528_v10, %v2920_v23 }
 0x52e   :  { %v3937_v52 = vperm.slane %v3556_v45, %v5185_v18 }
 0x52f   :  { %v3410_v7 = vsel %vm1090_vm2, %v3052_v61, 0.0 }
 0x530   :  { %v3938_v59 = vsel %vm3729_vm8, %v3937_v52, %v3936_v49  ;;  %v2769_v55 = vpop.f32.mrf.mxu3  ;;  %3411 = vadd.xlane.f32.xlu2 %v3410_v7 }
 0x531   :  { %v2770_v62 = vadd.f32 %v6522_v25, %v2769_v55 }
 0x533   :  { %v2921_v6 = vmax.f32 %v2770_v62, 0.0  ;;  %v3370_v4 = vpop.xlane.xlu2 %3369 }
 0x534   :  { %v3557_v27 = vadd.f32 %v5070_v43, %v3370_v4 }
 0x535   :  { %v3053_v41 = vmul.f32 %v6528_v10, %v2921_v6  ;;  %v2755_v6 = vadd.f32 %v6522_v25, %v6500_v60 }
 0x536   :  { %v3939_v0 = vperm.slane %v3557_v27, %v5208_v39 }
 0x537   :  { %v3413_v33 = vsel %vm1090_vm2, %v3053_v41, 0.0 }
 0x538   :  { %v3940_v19 = vsel %vm3733_vm9, %v3939_v0, %v3938_v59  ;;  %v2772_v22 = vpop.f32.mrf.mxu3  ;;  %3414 = vadd.xlane.f32.xlu1 %v3413_v33 }
 0x539   :  { %v2773_v1 = vadd.f32 %v6522_v25, %v2772_v22  ;;  %v2916_v22 = vmax.f32 %v2755_v6, 0.0 }
 0x53b   :  { %v2922_v40 = vmax.f32 %v2773_v1, 0.0  ;;  %v3373_v21 = vpop.xlane.xlu0 %3372 }
 0x53c   :  { %v3558_v28 = vadd.f32 %v5070_v43, %v3373_v21 }
 0x53d   :  { %v3054_v29 = vmul.f32 %v6528_v10, %v2922_v40 }
 0x53e   :  { %v3941_v57 = vperm.slane %v3558_v28, %v5231_v63 }
 0x53f   :  { %v3416_v50 = vsel %vm1090_vm2, %v3054_v29, 0.0 }
 0x540   :  { %v2775_v20 = vpop.f32.mrf.mxu3  ;;  %3417 = vadd.xlane.f32.xlu2 %v3416_v50  ;;  %v3942_v46 = vsel %vm3737_vm10, %v3941_v57, %v3940_v19 }
 0x541   :  { %v2776_v34 = vadd.f32 %v6522_v25, %v2775_v20  ;;  %v3048_v20 = vmul.f32 %v6528_v10, %v2916_v22 }
 0x543   :  { %v2923_v30 = vmax.f32 %v2776_v34, 0.0  ;;  %v3376_v37 = vpop.xlane.xlu1 %3375 }
 0x544   :  { %v3559_v31 = vadd.f32 %v5070_v43, %v3376_v37  ;;  %v3398_v37 = vsel %vm1090_vm2, %v3048_v20, 0.0 }
 0x545   :  { %v3055_v38 = vmul.f32 %v6528_v10, %v2923_v30 }
 0x546   :  { %v3943_v9 = vperm.slane %v3559_v31, %v5254_v26 }
 0x547   :  { %v3419_v24 = vsel %vm1090_vm2, %v3055_v38, 0.0 }
 0x548   :  { %v3944_v54 = vsel %vm3741_vm11, %v3943_v9, %v3942_v46  ;;  %v2778_v36 = vpop.f32.mrf.mxu3  ;;  %3420 = vadd.xlane.f32.xlu1 %v3419_v24 }
 0x549   :  { %v2779_v13 = vadd.f32 %v6522_v25, %v2778_v36 }
 0x54b   :  { %v2924_v17 = vmax.f32 %v2779_v13, 0.0  ;;  %v3379_v48 = vpop.xlane.xlu2 %3378 }
 0x54c   :  { %v3560_v5 = vadd.f32 %v5070_v43, %v3379_v48 }
 0x54d   :  { %v3056_v53 = vmul.f32 %v6528_v10, %v2924_v17 }
 0x54e   :  { %v3945_v11 = vperm.slane %v3560_v5, %v5277_v51 }
 0x54f   :  { %v3422_v58 = vsel %vm1090_vm2, %v3056_v53, 0.0 }
 0x550   :  { %v3946_v23 = vsel %vm3745_vm12, %v3945_v11, %v3944_v54  ;;  %v2781_v2 = vpop.f32.mrf.mxu3  ;;  %3423 = vadd.xlane.f32.xlu2 %v3422_v58 }
 0x551   :  { %v2782_v45 = vadd.f32 %v6522_v25, %v2781_v2 }
 0x553   :  { %v2925_v61 = vmax.f32 %v2782_v45, 0.0  ;;  %v3382_v52 = vpop.xlane.xlu0 %3381 }
 0x554   :  { %v3561_v7 = vadd.f32 %v5070_v43, %v3382_v52 }
 0x555   :  { %v3057_v49 = vmul.f32 %v6528_v10, %v2925_v61 }
 0x556   :  { %v3947_v4 = vperm.slane %v3561_v7, %v5298_v16 }
 0x557   :  { %v3425_v59 = vsel %vm1090_vm2, %v3057_v49, 0.0 }
 0x558   :  { %v2784_v55 = vpop.f32.mrf.mxu3  ;;  %3426 = vadd.xlane.f32.xlu1 %v3425_v59  ;;  %v3948_v1 = vsel %vm3749_vm13, %v3947_v4, %v3946_v23 }
 0x559   :  { %v2785_v62 = vadd.f32 %v6522_v25, %v2784_v55 }
 0x55b   :  { %v2926_v27 = vmax.f32 %v2785_v62, 0.0  ;;  %v3385_v41 = vpop.xlane.xlu1 %3384 }
 0x55c   :  { %v3562_v0 = vadd.f32 %v5070_v43, %v3385_v41 }
 0x55d   :  { %v3058_v33 = vmul.f32 %v6528_v10, %v2926_v27 }
 0x55e   :  { %v3949_v19 = vperm.slane %v3562_v0, %v5326_v44 }
 0x55f   :  { %v3428_v40 = vsel %vm1090_vm2, %v3058_v33, 0.0 }
 0x560   :  { %v3950_v21 = vsel %vm3753_vm14, %v3949_v19, %v3948_v1  ;;  %v2787_v29 = vpop.f32.mrf.mxu3  ;;  %3429 = vadd.xlane.f32.xlu2 %v3428_v40 }
 0x561   :  { %v2788_v60 = vadd.f32 %v6522_v25, %v2787_v29 }
 0x563   :  { %v2927_v28 = vmax.f32 %v2788_v60, 0.0  ;;  %v3388_v50 = vpop.xlane.xlu2 %3387 }
 0x564   :  { %v3563_v34 = vadd.f32 %v5070_v43, %v3388_v50 }
 0x565   :  { %v3059_v57 = vmul.f32 %v6528_v10, %v2927_v28 }
 0x566   :  { %v3951_v30 = vperm.slane %v3563_v34, %v5354_v8 }
 0x567   :  { %v3431_v31 = vsel %vm1090_vm2, %v3059_v57, 0.0 }
 0x568   :  { %v3952_v38 = vsel %vm6693_vm4, %v3951_v30, %v3950_v21  ;;  %v2790_v9 = vpop.f32.mrf.mxu3  ;;  %3399 = vadd.xlane.f32.xlu2 %v3398_v37  ;;  %3432 = vadd.xlane.f32.xlu0 %v3431_v31 }
 0x569   :  { %v2791_v46 = vadd.f32 %v6522_v25, %v2790_v9 }
 0x56b   :  { %v2928_v24 = vmax.f32 %v2791_v46, 0.0  ;;  %v3391_v29 = vpop.xlane.xlu0 %3390 }
 0x56c   :  { %v3564_v50 = vadd.f32 %v5070_v43, %v3391_v29 }
 0x56d   :  { %v3060_v54 = vmul.f32 %v6528_v10, %v2928_v24 }
 0x56e   :  { %v3953_v20 = vperm.slane %v3564_v50, %v5377_v42 }
 0x56f   :  { %v3434_v36 = vsel %vm1090_vm2, %v3060_v54, 0.0 }
 0x570   :  { %v2793_v13 = vpop.f32.mrf.mxu3  ;;  %3435 = vadd.xlane.f32.xlu1 %v3434_v36 }
 0x571   :  { %v2794_v17 = vadd.f32 %v6522_v25, %v2793_v13 }
 0x573   :  { %v2929_v48 = vmax.f32 %v2794_v17, 0.0  ;;  %v3394_v33 = vpop.xlane.xlu1 %3393 }
 0x575   :  { %v3061_v5 = vmul.f32 %v6528_v10, %v2929_v48 }
 0x577   :  { %v3437_v53 = vsel %vm1090_vm2, %v3061_v5, 0.0 }
 0x578   :  { %v2796_v11 = vpop.f32.mrf.mxu3  ;;  %3438 = vadd.xlane.f32.xlu2 %v3437_v53 }
 0x579   :  { %v2797_v58 = vadd.f32 %v6522_v25, %v2796_v11 }
 0x57b   :  { %v2930_v23 = vmax.f32 %v2797_v58, 0.0  ;;  %v3397_v41 = vpop.xlane.xlu2 %3396 }
 0x57d   :  { %v3062_v2 = vmul.f32 %v6528_v10, %v2930_v23 }
 0x57f   :  { %v3440_v45 = vsel %vm1090_vm2, %v3062_v2, 0.0 }
 0x580   :  { %v2799_v61 = vpop.f32.mrf.mxu3  ;;  %3441 = vadd.xlane.f32.xlu1 %v3440_v45 }
 0x581   :  { %v2800_v52 = vadd.f32 %v6522_v25, %v2799_v61 }
 0x583   :  { %v2931_v49 = vmax.f32 %v2800_v52, 0.0 }
 0x585   :  { %v3063_v7 = vmul.f32 %v6528_v10, %v2931_v49 }
 0x587   :  { %v3443_v59 = vsel %vm1090_vm2, %v3063_v7, 0.0 }
 0x588   :  { %v2802_v55 = vpop.f32.mrf.mxu3  ;;  %3444 = vadd.xlane.f32.xlu1 %v3443_v59 }
 0x589   :  { %v2803_v62 = vadd.f32 %v6522_v25, %v2802_v55  ;;  %v3565_v25 = vadd.f32 %v5070_v43, %v3394_v33 }
 0x58b   :  { %v2932_v6 = vmax.f32 %v2803_v62, 0.0  ;;  %v3403_v22 = vpop.xlane.xlu1 %3402  ;;  %v3955_v34 = vperm.slane %v3565_v25, %v5400_v14 }
 0x58d   :  { %v3064_v4 = vmul.f32 %v6528_v10, %v2932_v6  ;;  %v3566_v10 = vadd.f32 %v5070_v43, %v3397_v41 }
 0x58f   :  { %v3446_v27 = vsel %vm1090_vm2, %v3064_v4, 0.0  ;;  %v3957_v57 = vperm.slane %v3566_v10, %v5421_v47  ;;  %vm6694_vm2 = vcmask 851712  }
 0x590   :  { %3447 = vadd.xlane.f32.xlu2 %v3446_v27  ;;  %v3954_v9 = vsel %vm6694_vm2, %v3953_v20, %v3952_v38  ;;  %v3568_v38 = vadd.f32 %v5070_v43, %v3403_v22 }
 0x591   :  { %v3956_v46 = vsel %vm6695_vm15, %v3955_v34, %v3954_v9 }
 0x592   :  { %v3958_v54 = vsel %vm6692_vm0, %v3957_v57, %v3956_v46  ;;  %v3961_v52 = vperm.slane %v3568_v38, %v5101_v3 }
 0x593   :  { %v3406_v0 = vpop.xlane.xlu2 %3405 }
 0x594   :  { %v3569_v5 = vadd.f32 %v5070_v43, %v3406_v0 }
 0x596   :  { %v3962_v2 = vperm.slane %v3569_v5, %v5110_v15 }
 0x598   :  { %v3963_v6 = vsel %vm3717_vm5, %v3962_v2, %v3961_v52  ;;  %vm6696_vm5 = vmmov %vm6693_vm4 }
 0x59b   :  { %v3409_v40 = vpop.xlane.xlu1 %3408 }
 0x59c   :  { %v3570_v53 = vadd.f32 %v5070_v43, %v3409_v40 }
 0x59e   :  { %v3964_v61 = vperm.slane %v3570_v53, %v5139_v35 }
 0x5a0   :  { %v3965_v27 = vsel %vm3721_vm6, %v3964_v61, %v3963_v6  ;;  %vm6697_vm6 = vmmov %vm6694_vm2 }
 0x5a3   :  { %v3412_v19 = vpop.xlane.xlu2 %3411 }
 0x5a4   :  { %v3571_v58 = vadd.f32 %v5070_v43, %v3412_v19 }
 0x5a6   :  { %v3966_v49 = vperm.slane %v3571_v58, %v5162_v56 }
 0x5a8   :  { %v3967_v41 = vsel %vm3725_vm7, %v3966_v49, %v3965_v27  ;;  %vm6698_vm7 = vmmov %vm6695_vm15 }
 0x5ab   :  { %v3415_v60 = vpop.xlane.xlu1 %3414 }
 0x5ac   :  { %v3572_v23 = vadd.f32 %v5070_v43, %v3415_v60 }
 0x5ae   :  { %v3968_v55 = vperm.slane %v3572_v23, %v5185_v18 }
 0x5b0   :  { %v3969_v19 = vsel %vm3729_vm8, %v3968_v55, %v3967_v41  ;;  %vm4004_vm8 = vcmask 1047559  }
 0x5b3   :  { %v3418_v1 = vpop.xlane.xlu2 %3417 }
 0x5b4   :  { %v3573_v45 = vadd.f32 %v5070_v43, %v3418_v1 }
 0x5b6   :  { %v3970_v15 = vperm.slane %v3573_v45, %v5208_v39 }
 0x5b8   :  { %v3971_v1 = vsel %vm3733_vm9, %v3970_v15, %v3969_v19  ;;  %vm6699_vm9 = vmmov %vm6692_vm0 }
 0x5bb   :  { %v3421_v30 = vpop.xlane.xlu1 %3420 }
 0x5c3   :  { %v3424_v21 = vpop.xlane.xlu2 %3423 }
 0x5c4   :  { %v3575_v7 = vadd.f32 %v5070_v43, %v3424_v21 }
 0x5c6   :  { %v3974_v0 = vperm.slane %v3575_v7, %v5254_v26 }
 0x5cb   :  { %v3427_v17 = vpop.xlane.xlu1 %3426 }
 0x5cc   :  { %v3576_v62 = vadd.f32 %v5070_v43, %v3427_v17 }
 0x5ce   :  { %v3976_v39 = vperm.slane %v3576_v62, %v5277_v51 }
 0x5d3   :  { %v3430_v28 = vpop.xlane.xlu2 %3429 }
 0x5d4   :  { %v3577_v4 = vadd.f32 %v5070_v43, %v3430_v28 }
 0x5d6   :  { %v3978_v40 = vperm.slane %v3577_v4, %v5298_v16 }
 0x5db   :  { %v3400_v37 = vpop.xlane.xlu2 %3399  ;;  %v3433_v59 = vpop.xlane.xlu0 %3432 }
 0x5dc   :  { %v3567_v31 = vadd.f32 %v5070_v43, %v3400_v37  ;;  %v3578_v56 = vadd.f32 %v5070_v43, %v3433_v59 }
 0x5de   :  { %v3959_v24 = vperm.slane %v3567_v31, %v5446_v12  ;;  %v3980_v29 = vperm.slane %v3578_v56, %v5326_v44 }
 0x5e0   :  { %v3960_v36 = vsel %vm3773_vm3, %v3959_v24, %v3958_v54 }
 0x5e1   :  { %v4003_v13 = vsel %vm4002_vm1, %v3960_v36, %v6503_v32  ;;  %v3574_v32 = vadd.f32 %v5070_v43, %v3421_v30 }
 0x5e3   :  { %v3436_v48 = vpop.xlane.xlu1 %3435  ;;  %v3972_v3 = vperm.slane %v3574_v32, %v5231_v63 }
 0x5e4   :  { %v3579_v18 = vadd.f32 %v5070_v43, %v3436_v48 }
 0x5e5   :  { %v3973_v21 = vsel %vm3737_vm10, %v3972_v3, %v3971_v1 }
 0x5e6   :  { %v3975_v60 = vsel %vm3741_vm11, %v3974_v0, %v3973_v21  ;;  %v3982_v28 = vperm.slane %v3579_v18, %v5354_v8 }
 0x5e7   :  { %v3977_v51 = vsel %vm3745_vm12, %v3976_v39, %v3975_v60 }
 0x5e8   :  { %v3979_v25 = vsel %vm3749_vm13, %v3978_v40, %v3977_v51 }
 0x5e9   :  { %v3981_v10 = vsel %vm3753_vm14, %v3980_v29, %v3979_v25 }
 0x5ea   :  { %v3983_v44 = vsel %vm6696_vm5, %v3982_v28, %v3981_v10 }
 0x5eb   :  { %v3439_v35 = vpop.xlane.xlu2 %3438 }
 0x5ec   :  { %v3580_v22 = vadd.f32 %v5070_v43, %v3439_v35 }
 0x5ee   :  { %v3984_v50 = vperm.slane %v3580_v22, %v5377_v42 }
 0x5f0   :  { %v3985_v30 = vsel %vm6697_vm6, %v3984_v50, %v3983_v44 }
 0x5f3   :  { %v3442_v11 = vpop.xlane.xlu1 %3441 }
 0x5f4   :  { %v3581_v63 = vadd.f32 %v5070_v43, %v3442_v11 }
 0x5f6   :  { %v3986_v16 = vperm.slane %v3581_v63, %v5400_v14 }
 0x5f8   :  { %v3987_v8 = vsel %vm6698_vm7, %v3986_v16, %v3985_v30 }
 0x5fb   :  { %v3445_v33 = vpop.xlane.xlu1 %3444 }
 0x5fc   :  { %v3582_v26 = vadd.f32 %v5070_v43, %v3445_v33 }
 0x5fe   :  { %v3988_v20 = vperm.slane %v3582_v26, %v5421_v47 }
 0x600   :  { %v3989_v37 = vsel %vm6699_vm9, %v3988_v20, %v3987_v8 }
 0x603   :  { %v3448_v34 = vpop.xlane.xlu2 %3447 }
 0x604   :  { %v3583_v57 = vadd.f32 %v5070_v43, %v3448_v34 }
 0x606   :  { %v3990_v42 = vperm.slane %v3583_v57, %v5446_v12 }
 0x608   :  { %v3991_v14 = vsel %vm3773_vm3, %v3990_v42, %v3989_v37 }
 0x609   :  { %v4005_v31 = vsel %vm4004_vm8, %v3991_v14, %v4003_v13 }
 0x60a   :  { %4007 = vst [vmem:[%s6674_s9] sm:$0xff] %v4005_v31 }

</bundles_post_ra>
